<compile_context>
chip_gen: v7x
topology: tpu7x:2x2x1
jax: 0.10.0
libtpu: 0.0.40
codegen_flags: <defaults>
</compile_context>

<pallas_src>
import numpy as np

import jax
import jax.numpy as jnp
from jax.experimental import pallas as pl
from jax.experimental.pallas import tpu as pltpu


# ----------------------------------------------------------------------------
# Kernel body helpers (traced inside the single fused pallas_call)
# ----------------------------------------------------------------------------
def _conv_stage(xin_ref, w_ref, b_ref, yout_ref):
    """One 2x2 / stride-2 conv + bias + ReLU stage on row-flattened features.

    xin_ref : (1, H_in,  W_in*C_in)       current batch element
    w_ref   : (2, W_in*C_in, W_out*C_out) block-diagonal packed taps
              (index 0 = top input row dh=0, index 1 = bottom row dh=1)
    b_ref   : (1, W_out*C_out)            bias tiled across output pixels
    yout_ref: (1, H_out, W_out*C_out)
    """
    h_out = yout_ref.shape[1]
    w_top = w_ref[0]                       # (K_in, K_out)
    w_bot = w_ref[1]
    bias = b_ref[...]                      # (1, K_out)
    for ho in range(h_out):                # static unroll; H_out <= 16 here
        top = xin_ref[0, 2 * ho:2 * ho + 1, :]        # (1, K_in)
        bot = xin_ref[0, 2 * ho + 1:2 * ho + 2, :]    # (1, K_in)
        acc = jnp.dot(top, w_top, preferred_element_type=jnp.float32)
        acc = acc + jnp.dot(bot, w_bot, preferred_element_type=jnp.float32)
        yout_ref[0, ho:ho + 1, :] = jnp.maximum(acc + bias, 0.0)


def _mask_level(mask_ref, mout_ref, stride):
    """Nearest-neighbor mask downsample by an integer stride = strided copy.

    mask_ref: (1, H, W//8, 8)                  float padding mask, cols grouped by 8
    mout_ref: (1, H//stride, W//8, 8//stride)
    out[i, q, v] = mask[i*stride, q, v*stride]   (== mask[::s, ::s])
    """
    h_s = mout_ref.shape[1]
    per_group = mout_ref.shape[3]          # 8 // stride
    for i in range(h_s):                   # static unroll (<= 16 rows)
        for v in range(per_group):
            mout_ref[0, i, :, v:v + 1] = (
                mask_ref[0, i * stride, :, v * stride:v * stride + 1])


def _masked_backbone_kernel(x_ref, mask_ref,
                            w1_ref, b1_ref, w2_ref, b2_ref, w3_ref, b3_ref,
                            f1_ref, f2_ref, f3_ref,
                            m1_ref, m2_ref, m3_ref):
    # Backbone: three conv stages chained entirely in VMEM (res2/res3 output
    # buffers are read back as the next stage's input -- no HBM round trip).
    _conv_stage(x_ref, w1_ref, b1_ref, f1_ref)
    _conv_stage(f1_ref, w2_ref, b2_ref, f2_ref)
    _conv_stage(f2_ref, w3_ref, b3_ref, f3_ref)
    # Padding-mask "interpolation": pure strided copies at strides 2 / 4 / 8.
    _mask_level(mask_ref, m1_ref, 2)
    _mask_level(mask_ref, m2_ref, 4)
    _mask_level(mask_ref, m3_ref, 8)


# ----------------------------------------------------------------------------
# Host-side weight packing: 2x2/s2 conv -> "row matmul" block-diagonal form
# ----------------------------------------------------------------------------
def _pack_stage_weights(w, b, w_in):
    """w: (2, 2, Ci, Co), b: (Co,), w_in = input spatial width.

    Returns
      a    : (2, w_in*Ci, (w_in//2)*Co)  a[dh] maps a flattened input row to a
             flattened output row; only the 2x2-tap entries are non-zero.
      bias : (1, (w_in//2)*Co)
    """
    w = np.asarray(w, dtype=np.float32)
    b = np.asarray(b, dtype=np.float32)
    ci, co = w.shape[2], w.shape[3]
    w_out = w_in // 2
    a = np.zeros((2, w_in * ci, w_out * co), np.float32)
    for u in range(w_out):                              # output pixel in row
        r0 = slice((2 * u) * ci, (2 * u + 1) * ci)      # input pixel 2u
        r1 = slice((2 * u + 1) * ci, (2 * u + 2) * ci)  # input pixel 2u+1
        c = slice(u * co, (u + 1) * co)
        a[0, r0, c] = w[0, 0]
        a[0, r1, c] = w[0, 1]
        a[1, r0, c] = w[1, 0]
        a[1, r1, c] = w[1, 1]
    bias = np.tile(b.reshape(1, co), (1, w_out))
    return jnp.asarray(a), jnp.asarray(bias)


def init_backbone_params(key, in_ch, channels):
    params = []
    cin = in_ch
    for cout in channels:
        key, k1, k2 = jax.random.split(key, 3)
        w = jax.random.normal(k1, (2, 2, cin, cout), jnp.float32) / jnp.sqrt(4.0 * cin)
        b = 0.01 * jax.random.normal(k2, (cout,), jnp.float32)
        params.append((w, b))
        cin = cout
    return params


# ----------------------------------------------------------------------------
# Thin wrapper mirroring MaskedBackbone: backbone features + per-level masks
# ----------------------------------------------------------------------------
class MaskedBackbonePallas:

    def __init__(self, params, strides, channels):
        self.params = params
        self.feature_strides = list(strides)    # mirrors backbone_shape[f].stride
        self.num_channels = list(channels)      # mirrors backbone_shape[f].channels

    def __call__(self, tensors, mask):
        # tensors: (N, H, W, Cin) f32 (NHWC); mask: (N, H, W) bool, True == padded.
        N, H, W, cin = tensors.shape
        assert H % 8 == 0 and W % 8 == 0, "three stride-2 stages need /8 sizes"
        c1, c2, c3 = self.num_channels
        h1, h2, h3 = H // 2, H // 4, H // 8
        w1s, w2s, w3s = W // 2, W // 4, W // 8

        # Row-flattened image and column-grouped float mask.  Both are
        # contiguous reshapes: no transpose, no extra HBM traffic.
        x_rows = tensors.reshape(N, H, W * cin)
        mask_g8 = mask.astype(jnp.float32).reshape(N, H, W // 8, 8)

        # Pack conv weights into block-diagonal row-matmul form (host side).
        packed = []
        w_in = W
        for (w, b) in self.params:
            packed.append(_pack_stage_weights(w, b, w_in))
            w_in //= 2
        (a1, bb1), (a2, bb2), (a3, bb3) = packed

        out_shapes = (
            jax.ShapeDtypeStruct((N, h1, w1s * c1), jnp.float32),   # res2 rows
            jax.ShapeDtypeStruct((N, h2, w2s * c2), jnp.float32),   # res3 rows
            jax.ShapeDtypeStruct((N, h3, w3s * c3), jnp.float32),   # res4 rows
            jax.ShapeDtypeStruct((N, h1, W // 8, 4), jnp.float32),  # mask s=2
            jax.ShapeDtypeStruct((N, h2, W // 8, 2), jnp.float32),  # mask s=4
            jax.ShapeDtypeStruct((N, h3, W // 8, 1), jnp.float32),  # mask s=8
        )

        def batch_spec(shape):
            zeros = (0,) * (len(shape) - 1)
            return pl.BlockSpec((1,) + tuple(shape[1:]),
                                lambda n: (n,) + zeros)

        def bcast_spec(arr):
            zeros = (0,) * arr.ndim
            return pl.BlockSpec(arr.shape, lambda n: zeros)

        in_specs = [
            batch_spec(x_rows.shape),
            batch_spec(mask_g8.shape),
            bcast_spec(a1), bcast_spec(bb1),
            bcast_spec(a2), bcast_spec(bb2),
            bcast_spec(a3), bcast_spec(bb3),
        ]
        out_specs = tuple(batch_spec(s.shape) for s in out_shapes)

        f1, f2, f3, m1, m2, m3 = pl.pallas_call(
            _masked_backbone_kernel,
            out_shape=out_shapes,
            grid=(N,),
            in_specs=in_specs,
            out_specs=out_specs,
            compiler_params=pltpu.CompilerParams(
                dimension_semantics=("parallel",)),
        )(x_rows, mask_g8, a1, bb1, a2, bb2, a3, bb3)

        feats = (f1.reshape(N, h1, w1s, c1),
                 f2.reshape(N, h2, w2s, c2),
                 f3.reshape(N, h3, w3s, c3))
        masks = (m1.reshape(N, h1, w1s).astype(jnp.bool_),
                 m2.reshape(N, h2, w2s).astype(jnp.bool_),
                 m3.reshape(N, h3, w3s).astype(jnp.bool_))
        return {
            "res2": (feats[0], masks[0]),    # NestedTensor(x, mask)
            "res3": (feats[1], masks[1]),
            "res4": (feats[2], masks[2]),
        }


# ----------------------------------------------------------------------------
if __name__ == "__main__":
    key = jax.random.PRNGKey(0)
    N, Cin, H, W = 2, 3, 32, 32
    channels = (8, 16, 32)
    strides = (2, 4, 8)

    k_img, k_par = jax.random.split(key)
    images = jax.random.normal(k_img, (N, H, W, Cin), jnp.float32)

    # Padding mask like detectron2 NestedTensor: True where padded.
    image_sizes = [(28, 30), (32, 24)]
    mask = jnp.ones((N, H, W), dtype=jnp.bool_)
    for i, (h, w) in enumerate(image_sizes):
        mask = mask.at[i, :h, :w].set(False)

    params = init_backbone_params(k_par, Cin, channels)
    model = MaskedBackbonePallas(params, strides, channels)

    out = model(images, mask)
    out = jax.block_until_ready(out)

    # --- correctness check against a pure-JAX reference ----------------------
    x_chain = images
    for i, (w, b) in enumerate(params):
        name = f"res{i + 2}"
        n_, hi, wi, ci = x_chain.shape
        ho, wo = hi // 2, wi // 2
        patches = (
            x_chain.reshape(n_, ho, 2, wo, 2, ci)
            .transpose(0, 1, 3, 2, 4, 5)
            .reshape(n_, ho, wo, 4 * ci)
        )
        x_chain = jnp.maximum(
            jnp.einsum("nhwk,kc->nhwc", patches, w.reshape(4 * ci, -1)) + b, 0.0)
        feat, m = out[name]
        assert feat.shape == (n_, ho, wo, channels[i]) and feat.dtype == jnp.float32
        assert jnp.allclose(feat, x_chain, atol=1e-4, rtol=1e-4)
        s = strides[i]
        m_expect = mask[:, ::s, ::s]        # nearest-down at integer stride
        assert m.dtype == jnp.bool_ and bool(jnp.all(m == m_expect))

    print("KERNEL_OK")
</pallas_src>

<mosaic_0001>
module attributes {stable_mosaic.version = 11 : i64} {
  func.func @_masked_backbone_kernel(%arg0: i32, %arg1: memref<1x32x96xf32, #tpu.memory_space<vmem>>, %arg2: memref<1x32x4x8xf32, #tpu.memory_space<vmem>>, %arg3: memref<2x96x128xf32, #tpu.memory_space<vmem>>, %arg4: memref<1x128xf32, #tpu.memory_space<vmem>>, %arg5: memref<2x128x128xf32, #tpu.memory_space<vmem>>, %arg6: memref<1x128xf32, #tpu.memory_space<vmem>>, %arg7: memref<2x128x128xf32, #tpu.memory_space<vmem>>, %arg8: memref<1x128xf32, #tpu.memory_space<vmem>>, %arg9: memref<1x16x128xf32, #tpu.memory_space<vmem>>, %arg10: memref<1x8x128xf32, #tpu.memory_space<vmem>>, %arg11: memref<1x4x128xf32, #tpu.memory_space<vmem>>, %arg12: memref<1x16x4x4xf32, #tpu.memory_space<vmem>>, %arg13: memref<1x8x4x2xf32, #tpu.memory_space<vmem>>, %arg14: memref<1x4x4x1xf32, #tpu.memory_space<vmem>>) attributes {dimension_semantics = [#tpu.dimension_semantics<parallel>], iteration_bounds = array<i64: 2>, scalar_prefetch = 0 : i64, scratch_operands = 0 : i64, tpu.core_type = #tpu.core_type<tc>, window_params = [{transform_indices = @transform_0, window_bounds = array<i64: 1, 32, 96>}, {transform_indices = @transform_1, window_bounds = array<i64: 1, 32, 4, 8>}, {pipeline_mode = #tpu.pipeline_mode<synchronous>, transform_indices = @transform_2, window_bounds = array<i64: 2, 96, 128>}, {pipeline_mode = #tpu.pipeline_mode<synchronous>, transform_indices = @transform_3, window_bounds = array<i64: 1, 128>}, {pipeline_mode = #tpu.pipeline_mode<synchronous>, transform_indices = @transform_4, window_bounds = array<i64: 2, 128, 128>}, {pipeline_mode = #tpu.pipeline_mode<synchronous>, transform_indices = @transform_5, window_bounds = array<i64: 1, 128>}, {pipeline_mode = #tpu.pipeline_mode<synchronous>, transform_indices = @transform_6, window_bounds = array<i64: 2, 128, 128>}, {pipeline_mode = #tpu.pipeline_mode<synchronous>, transform_indices = @transform_7, window_bounds = array<i64: 1, 128>}, {transform_indices = @transform_8, window_bounds = array<i64: 1, 16, 128>}, {transform_indices = @transform_9, window_bounds = array<i64: 1, 8, 128>}, {transform_indices = @transform_10, window_bounds = array<i64: 1, 4, 128>}, {transform_indices = @transform_11, window_bounds = array<i64: 1, 16, 4, 4>}, {transform_indices = @transform_12, window_bounds = array<i64: 1, 8, 4, 2>}, {transform_indices = @transform_13, window_bounds = array<i64: 1, 4, 4, 1>}]} {
    %c0 = arith.constant 0 : index
    %c0_0 = arith.constant 0 : index
    %c0_1 = arith.constant 0 : index
    %0 = vector.load %arg3[%c0, %c0_0, %c0_1] : memref<2x96x128xf32, #tpu.memory_space<vmem>>, vector<1x96x128xf32>
    %1 = vector.shape_cast %0 : vector<1x96x128xf32> to vector<96x128xf32>
    %c1 = arith.constant 1 : index
    %c0_2 = arith.constant 0 : index
    %c0_3 = arith.constant 0 : index
    %2 = vector.load %arg3[%c1, %c0_2, %c0_3] : memref<2x96x128xf32, #tpu.memory_space<vmem>>, vector<1x96x128xf32>
    %3 = vector.shape_cast %2 : vector<1x96x128xf32> to vector<96x128xf32>
    %c0_4 = arith.constant 0 : index
    %c0_5 = arith.constant 0 : index
    %4 = vector.load %arg4[%c0_4, %c0_5] : memref<1x128xf32, #tpu.memory_space<vmem>>, vector<1x128xf32>
    %c0_6 = arith.constant 0 : index
    %c0_7 = arith.constant 0 : index
    %c0_8 = arith.constant 0 : index
    %5 = vector.load %arg1[%c0_6, %c0_7, %c0_8] : memref<1x32x96xf32, #tpu.memory_space<vmem>>, vector<1x1x96xf32>
    %6 = vector.shape_cast %5 : vector<1x1x96xf32> to vector<1x96xf32>
    %c0_9 = arith.constant 0 : index
    %c1_10 = arith.constant 1 : index
    %c0_11 = arith.constant 0 : index
    %7 = vector.load %arg1[%c0_9, %c1_10, %c0_11] : memref<1x32x96xf32, #tpu.memory_space<vmem>>, vector<1x1x96xf32>
    %8 = vector.shape_cast %7 : vector<1x1x96xf32> to vector<1x96xf32>
    %cst = arith.constant dense<0.000000e+00> : vector<1x128xf32>
    %9 = tpu.matmul %6, %1, %cst {dimension_numbers = #tpu.dot_dimension_numbers<[1], [0], [0], [1], [0, 0, 1, 1], [], []>} : vector<1x96xf32>, vector<96x128xf32>, vector<1x128xf32> -> vector<1x128xf32>
    %cst_12 = arith.constant dense<0.000000e+00> : vector<1x128xf32>
    %10 = tpu.matmul %8, %3, %cst_12 {dimension_numbers = #tpu.dot_dimension_numbers<[1], [0], [0], [1], [0, 0, 1, 1], [], []>} : vector<1x96xf32>, vector<96x128xf32>, vector<1x128xf32> -> vector<1x128xf32>
    %11 = arith.addf %9, %10 : vector<1x128xf32>
    %12 = arith.addf %11, %4 : vector<1x128xf32>
    %cst_13 = arith.constant 0.000000e+00 : f32
    %13 = vector.broadcast %cst_13 : f32 to vector<1x128xf32>
    %14 = arith.maximumf %12, %13 : vector<1x128xf32>
    %c0_14 = arith.constant 0 : index
    %c0_15 = arith.constant 0 : index
    %c0_16 = arith.constant 0 : index
    %15 = vector.load %arg9[%c0_14, %c0_15, %c0_16] : memref<1x16x128xf32, #tpu.memory_space<vmem>>, vector<1x1x128xf32>
    %16 = vector.shape_cast %15 : vector<1x1x128xf32> to vector<1x128xf32>
    %17 = vector.shape_cast %14 : vector<1x128xf32> to vector<1x1x128xf32>
    tpu.vector_store %arg9[%c0_14, %c0_15, %c0_16], %17 {strides = array<i32>} : memref<1x16x128xf32, #tpu.memory_space<vmem>>, vector<1x1x128xf32>,
    %c0_17 = arith.constant 0 : index
    %c2 = arith.constant 2 : index
    %c0_18 = arith.constant 0 : index
    %18 = vector.load %arg1[%c0_17, %c2, %c0_18] : memref<1x32x96xf32, #tpu.memory_space<vmem>>, vector<1x1x96xf32>
    %19 = vector.shape_cast %18 : vector<1x1x96xf32> to vector<1x96xf32>
    %c0_19 = arith.constant 0 : index
    %c3 = arith.constant 3 : index
    %c0_20 = arith.constant 0 : index
    %20 = vector.load %arg1[%c0_19, %c3, %c0_20] : memref<1x32x96xf32, #tpu.memory_space<vmem>>, vector<1x1x96xf32>
    %21 = vector.shape_cast %20 : vector<1x1x96xf32> to vector<1x96xf32>
    %cst_21 = arith.constant dense<0.000000e+00> : vector<1x128xf32>
    %22 = tpu.matmul %19, %1, %cst_21 {dimension_numbers = #tpu.dot_dimension_numbers<[1], [0], [0], [1], [0, 0, 1, 1], [], []>} : vector<1x96xf32>, vector<96x128xf32>, vector<1x128xf32> -> vector<1x128xf32>
    %cst_22 = arith.constant dense<0.000000e+00> : vector<1x128xf32>
    %23 = tpu.matmul %21, %3, %cst_22 {dimension_numbers = #tpu.dot_dimension_numbers<[1], [0], [0], [1], [0, 0, 1, 1], [], []>} : vector<1x96xf32>, vector<96x128xf32>, vector<1x128xf32> -> vector<1x128xf32>
    %24 = arith.addf %22, %23 : vector<1x128xf32>
    %25 = arith.addf %24, %4 : vector<1x128xf32>
    %cst_23 = arith.constant 0.000000e+00 : f32
    %26 = vector.broadcast %cst_23 : f32 to vector<1x128xf32>
    %27 = arith.maximumf %25, %26 : vector<1x128xf32>
    %c0_24 = arith.constant 0 : index
    %c1_25 = arith.constant 1 : index
    %c0_26 = arith.constant 0 : index
    %28 = vector.load %arg9[%c0_24, %c1_25, %c0_26] : memref<1x16x128xf32, #tpu.memory_space<vmem>>, vector<1x1x128xf32>
    %29 = vector.shape_cast %28 : vector<1x1x128xf32> to vector<1x128xf32>
    %30 = vector.shape_cast %27 : vector<1x128xf32> to vector<1x1x128xf32>
    tpu.vector_store %arg9[%c0_24, %c1_25, %c0_26], %30 {strides = array<i32>} : memref<1x16x128xf32, #tpu.memory_space<vmem>>, vector<1x1x128xf32>,
    %c0_27 = arith.constant 0 : index
    %c4 = arith.constant 4 : index
    %c0_28 = arith.constant 0 : index
    %31 = vector.load %arg1[%c0_27, %c4, %c0_28] : memref<1x32x96xf32, #tpu.memory_space<vmem>>, vector<1x1x96xf32>
    %32 = vector.shape_cast %31 : vector<1x1x96xf32> to vector<1x96xf32>
    %c0_29 = arith.constant 0 : index
    %c5 = arith.constant 5 : index
    %c0_30 = arith.constant 0 : index
    %33 = vector.load %arg1[%c0_29, %c5, %c0_30] : memref<1x32x96xf32, #tpu.memory_space<vmem>>, vector<1x1x96xf32>
    %34 = vector.shape_cast %33 : vector<1x1x96xf32> to vector<1x96xf32>
    %cst_31 = arith.constant dense<0.000000e+00> : vector<1x128xf32>
    %35 = tpu.matmul %32, %1, %cst_31 {dimension_numbers = #tpu.dot_dimension_numbers<[1], [0], [0], [1], [0, 0, 1, 1], [], []>} : vector<1x96xf32>, vector<96x128xf32>, vector<1x128xf32> -> vector<1x128xf32>
    %cst_32 = arith.constant dense<0.000000e+00> : vector<1x128xf32>
    %36 = tpu.matmul %34, %3, %cst_32 {dimension_numbers = #tpu.dot_dimension_numbers<[1], [0], [0], [1], [0, 0, 1, 1], [], []>} : vector<1x96xf32>, vector<96x128xf32>, vector<1x128xf32> -> vector<1x128xf32>
    %37 = arith.addf %35, %36 : vector<1x128xf32>
    %38 = arith.addf %37, %4 : vector<1x128xf32>
    %cst_33 = arith.constant 0.000000e+00 : f32
    %39 = vector.broadcast %cst_33 : f32 to vector<1x128xf32>
    %40 = arith.maximumf %38, %39 : vector<1x128xf32>
    %c0_34 = arith.constant 0 : index
    %c2_35 = arith.constant 2 : index
    %c0_36 = arith.constant 0 : index
    %41 = vector.load %arg9[%c0_34, %c2_35, %c0_36] : memref<1x16x128xf32, #tpu.memory_space<vmem>>, vector<1x1x128xf32>
    %42 = vector.shape_cast %41 : vector<1x1x128xf32> to vector<1x128xf32>
    %43 = vector.shape_cast %40 : vector<1x128xf32> to vector<1x1x128xf32>
    tpu.vector_store %arg9[%c0_34, %c2_35, %c0_36], %43 {strides = array<i32>} : memref<1x16x128xf32, #tpu.memory_space<vmem>>, vector<1x1x128xf32>,
    %c0_37 = arith.constant 0 : index
    %c6 = arith.constant 6 : index
    %c0_38 = arith.constant 0 : index
    %44 = vector.load %arg1[%c0_37, %c6, %c0_38] : memref<1x32x96xf32, #tpu.memory_space<vmem>>, vector<1x1x96xf32>
    %45 = vector.shape_cast %44 : vector<1x1x96xf32> to vector<1x96xf32>
    %c0_39 = arith.constant 0 : index
    %c7 = arith.constant 7 : index
    %c0_40 = arith.constant 0 : index
    %46 = vector.load %arg1[%c0_39, %c7, %c0_40] : memref<1x32x96xf32, #tpu.memory_space<vmem>>, vector<1x1x96xf32>
    %47 = vector.shape_cast %46 : vector<1x1x96xf32> to vector<1x96xf32>
    %cst_41 = arith.constant dense<0.000000e+00> : vector<1x128xf32>
    %48 = tpu.matmul %45, %1, %cst_41 {dimension_numbers = #tpu.dot_dimension_numbers<[1], [0], [0], [1], [0, 0, 1, 1], [], []>} : vector<1x96xf32>, vector<96x128xf32>, vector<1x128xf32> -> vector<1x128xf32>
    %cst_42 = arith.constant dense<0.000000e+00> : vector<1x128xf32>
    %49 = tpu.matmul %47, %3, %cst_42 {dimension_numbers = #tpu.dot_dimension_numbers<[1], [0], [0], [1], [0, 0, 1, 1], [], []>} : vector<1x96xf32>, vector<96x128xf32>, vector<1x128xf32> -> vector<1x128xf32>
    %50 = arith.addf %48, %49 : vector<1x128xf32>
    %51 = arith.addf %50, %4 : vector<1x128xf32>
    %cst_43 = arith.constant 0.000000e+00 : f32
    %52 = vector.broadcast %cst_43 : f32 to vector<1x128xf32>
    %53 = arith.maximumf %51, %52 : vector<1x128xf32>
    %c0_44 = arith.constant 0 : index
    %c3_45 = arith.constant 3 : index
    %c0_46 = arith.constant 0 : index
    %54 = vector.load %arg9[%c0_44, %c3_45, %c0_46] : memref<1x16x128xf32, #tpu.memory_space<vmem>>, vector<1x1x128xf32>
    %55 = vector.shape_cast %54 : vector<1x1x128xf32> to vector<1x128xf32>
    %56 = vector.shape_cast %53 : vector<1x128xf32> to vector<1x1x128xf32>
    tpu.vector_store %arg9[%c0_44, %c3_45, %c0_46], %56 {strides = array<i32>} : memref<1x16x128xf32, #tpu.memory_space<vmem>>, vector<1x1x128xf32>,
    %c0_47 = arith.constant 0 : index
    %c8 = arith.constant 8 : index
    %c0_48 = arith.constant 0 : index
    %57 = vector.load %arg1[%c0_47, %c8, %c0_48] : memref<1x32x96xf32, #tpu.memory_space<vmem>>, vector<1x1x96xf32>
    %58 = vector.shape_cast %57 : vector<1x1x96xf32> to vector<1x96xf32>
    %c0_49 = arith.constant 0 : index
    %c9 = arith.constant 9 : index
    %c0_50 = arith.constant 0 : index
    %59 = vector.load %arg1[%c0_49, %c9, %c0_50] : memref<1x32x96xf32, #tpu.memory_space<vmem>>, vector<1x1x96xf32>
    %60 = vector.shape_cast %59 : vector<1x1x96xf32> to vector<1x96xf32>
    %cst_51 = arith.constant dense<0.000000e+00> : vector<1x128xf32>
    %61 = tpu.matmul %58, %1, %cst_51 {dimension_numbers = #tpu.dot_dimension_numbers<[1], [0], [0], [1], [0, 0, 1, 1], [], []>} : vector<1x96xf32>, vector<96x128xf32>, vector<1x128xf32> -> vector<1x128xf32>
    %cst_52 = arith.constant dense<0.000000e+00> : vector<1x128xf32>
    %62 = tpu.matmul %60, %3, %cst_52 {dimension_numbers = #tpu.dot_dimension_numbers<[1], [0], [0], [1], [0, 0, 1, 1], [], []>} : vector<1x96xf32>, vector<96x128xf32>, vector<1x128xf32> -> vector<1x128xf32>
    %63 = arith.addf %61, %62 : vector<1x128xf32>
    %64 = arith.addf %63, %4 : vector<1x128xf32>
    %cst_53 = arith.constant 0.000000e+00 : f32
    %65 = vector.broadcast %cst_53 : f32 to vector<1x128xf32>
    %66 = arith.maximumf %64, %65 : vector<1x128xf32>
    %c0_54 = arith.constant 0 : index
    %c4_55 = arith.constant 4 : index
    %c0_56 = arith.constant 0 : index
    %67 = vector.load %arg9[%c0_54, %c4_55, %c0_56] : memref<1x16x128xf32, #tpu.memory_space<vmem>>, vector<1x1x128xf32>
    %68 = vector.shape_cast %67 : vector<1x1x128xf32> to vector<1x128xf32>
    %69 = vector.shape_cast %66 : vector<1x128xf32> to vector<1x1x128xf32>
    tpu.vector_store %arg9[%c0_54, %c4_55, %c0_56], %69 {strides = array<i32>} : memref<1x16x128xf32, #tpu.memory_space<vmem>>, vector<1x1x128xf32>,
    %c0_57 = arith.constant 0 : index
    %c10 = arith.constant 10 : index
    %c0_58 = arith.constant 0 : index
    %70 = vector.load %arg1[%c0_57, %c10, %c0_58] : memref<1x32x96xf32, #tpu.memory_space<vmem>>, vector<1x1x96xf32>
    %71 = vector.shape_cast %70 : vector<1x1x96xf32> to vector<1x96xf32>
    %c0_59 = arith.constant 0 : index
    %c11 = arith.constant 11 : index
    %c0_60 = arith.constant 0 : index
    %72 = vector.load %arg1[%c0_59, %c11, %c0_60] : memref<1x32x96xf32, #tpu.memory_space<vmem>>, vector<1x1x96xf32>
    %73 = vector.shape_cast %72 : vector<1x1x96xf32> to vector<1x96xf32>
    %cst_61 = arith.constant dense<0.000000e+00> : vector<1x128xf32>
    %74 = tpu.matmul %71, %1, %cst_61 {dimension_numbers = #tpu.dot_dimension_numbers<[1], [0], [0], [1], [0, 0, 1, 1], [], []>} : vector<1x96xf32>, vector<96x128xf32>, vector<1x128xf32> -> vector<1x128xf32>
    %cst_62 = arith.constant dense<0.000000e+00> : vector<1x128xf32>
    %75 = tpu.matmul %73, %3, %cst_62 {dimension_numbers = #tpu.dot_dimension_numbers<[1], [0], [0], [1], [0, 0, 1, 1], [], []>} : vector<1x96xf32>, vector<96x128xf32>, vector<1x128xf32> -> vector<1x128xf32>
    %76 = arith.addf %74, %75 : vector<1x128xf32>
    %77 = arith.addf %76, %4 : vector<1x128xf32>
    %cst_63 = arith.constant 0.000000e+00 : f32
    %78 = vector.broadcast %cst_63 : f32 to vector<1x128xf32>
    %79 = arith.maximumf %77, %78 : vector<1x128xf32>
    %c0_64 = arith.constant 0 : index
    %c5_65 = arith.constant 5 : index
    %c0_66 = arith.constant 0 : index
    %80 = vector.load %arg9[%c0_64, %c5_65, %c0_66] : memref<1x16x128xf32, #tpu.memory_space<vmem>>, vector<1x1x128xf32>
    %81 = vector.shape_cast %80 : vector<1x1x128xf32> to vector<1x128xf32>
    %82 = vector.shape_cast %79 : vector<1x128xf32> to vector<1x1x128xf32>
    tpu.vector_store %arg9[%c0_64, %c5_65, %c0_66], %82 {strides = array<i32>} : memref<1x16x128xf32, #tpu.memory_space<vmem>>, vector<1x1x128xf32>,
    %c0_67 = arith.constant 0 : index
    %c12 = arith.constant 12 : index
    %c0_68 = arith.constant 0 : index
    %83 = vector.load %arg1[%c0_67, %c12, %c0_68] : memref<1x32x96xf32, #tpu.memory_space<vmem>>, vector<1x1x96xf32>
    %84 = vector.shape_cast %83 : vector<1x1x96xf32> to vector<1x96xf32>
    %c0_69 = arith.constant 0 : index
    %c13 = arith.constant 13 : index
    %c0_70 = arith.constant 0 : index
    %85 = vector.load %arg1[%c0_69, %c13, %c0_70] : memref<1x32x96xf32, #tpu.memory_space<vmem>>, vector<1x1x96xf32>
    %86 = vector.shape_cast %85 : vector<1x1x96xf32> to vector<1x96xf32>
    %cst_71 = arith.constant dense<0.000000e+00> : vector<1x128xf32>
    %87 = tpu.matmul %84, %1, %cst_71 {dimension_numbers = #tpu.dot_dimension_numbers<[1], [0], [0], [1], [0, 0, 1, 1], [], []>} : vector<1x96xf32>, vector<96x128xf32>, vector<1x128xf32> -> vector<1x128xf32>
    %cst_72 = arith.constant dense<0.000000e+00> : vector<1x128xf32>
    %88 = tpu.matmul %86, %3, %cst_72 {dimension_numbers = #tpu.dot_dimension_numbers<[1], [0], [0], [1], [0, 0, 1, 1], [], []>} : vector<1x96xf32>, vector<96x128xf32>, vector<1x128xf32> -> vector<1x128xf32>
    %89 = arith.addf %87, %88 : vector<1x128xf32>
    %90 = arith.addf %89, %4 : vector<1x128xf32>
    %cst_73 = arith.constant 0.000000e+00 : f32
    %91 = vector.broadcast %cst_73 : f32 to vector<1x128xf32>
    %92 = arith.maximumf %90, %91 : vector<1x128xf32>
    %c0_74 = arith.constant 0 : index
    %c6_75 = arith.constant 6 : index
    %c0_76 = arith.constant 0 : index
    %93 = vector.load %arg9[%c0_74, %c6_75, %c0_76] : memref<1x16x128xf32, #tpu.memory_space<vmem>>, vector<1x1x128xf32>
    %94 = vector.shape_cast %93 : vector<1x1x128xf32> to vector<1x128xf32>
    %95 = vector.shape_cast %92 : vector<1x128xf32> to vector<1x1x128xf32>
    tpu.vector_store %arg9[%c0_74, %c6_75, %c0_76], %95 {strides = array<i32>} : memref<1x16x128xf32, #tpu.memory_space<vmem>>, vector<1x1x128xf32>,
    %c0_77 = arith.constant 0 : index
    %c14 = arith.constant 14 : index
    %c0_78 = arith.constant 0 : index
    %96 = vector.load %arg1[%c0_77, %c14, %c0_78] : memref<1x32x96xf32, #tpu.memory_space<vmem>>, vector<1x1x96xf32>
    %97 = vector.shape_cast %96 : vector<1x1x96xf32> to vector<1x96xf32>
    %c0_79 = arith.constant 0 : index
    %c15 = arith.constant 15 : index
    %c0_80 = arith.constant 0 : index
    %98 = vector.load %arg1[%c0_79, %c15, %c0_80] : memref<1x32x96xf32, #tpu.memory_space<vmem>>, vector<1x1x96xf32>
    %99 = vector.shape_cast %98 : vector<1x1x96xf32> to vector<1x96xf32>
    %cst_81 = arith.constant dense<0.000000e+00> : vector<1x128xf32>
    %100 = tpu.matmul %97, %1, %cst_81 {dimension_numbers = #tpu.dot_dimension_numbers<[1], [0], [0], [1], [0, 0, 1, 1], [], []>} : vector<1x96xf32>, vector<96x128xf32>, vector<1x128xf32> -> vector<1x128xf32>
    %cst_82 = arith.constant dense<0.000000e+00> : vector<1x128xf32>
    %101 = tpu.matmul %99, %3, %cst_82 {dimension_numbers = #tpu.dot_dimension_numbers<[1], [0], [0], [1], [0, 0, 1, 1], [], []>} : vector<1x96xf32>, vector<96x128xf32>, vector<1x128xf32> -> vector<1x128xf32>
    %102 = arith.addf %100, %101 : vector<1x128xf32>
    %103 = arith.addf %102, %4 : vector<1x128xf32>
    %cst_83 = arith.constant 0.000000e+00 : f32
    %104 = vector.broadcast %cst_83 : f32 to vector<1x128xf32>
    %105 = arith.maximumf %103, %104 : vector<1x128xf32>
    %c0_84 = arith.constant 0 : index
    %c7_85 = arith.constant 7 : index
    %c0_86 = arith.constant 0 : index
    %106 = vector.load %arg9[%c0_84, %c7_85, %c0_86] : memref<1x16x128xf32, #tpu.memory_space<vmem>>, vector<1x1x128xf32>
    %107 = vector.shape_cast %106 : vector<1x1x128xf32> to vector<1x128xf32>
    %108 = vector.shape_cast %105 : vector<1x128xf32> to vector<1x1x128xf32>
    tpu.vector_store %arg9[%c0_84, %c7_85, %c0_86], %108 {strides = array<i32>} : memref<1x16x128xf32, #tpu.memory_space<vmem>>, vector<1x1x128xf32>,
    %c0_87 = arith.constant 0 : index
    %c16 = arith.constant 16 : index
    %c0_88 = arith.constant 0 : index
    %109 = vector.load %arg1[%c0_87, %c16, %c0_88] : memref<1x32x96xf32, #tpu.memory_space<vmem>>, vector<1x1x96xf32>
    %110 = vector.shape_cast %109 : vector<1x1x96xf32> to vector<1x96xf32>
    %c0_89 = arith.constant 0 : index
    %c17 = arith.constant 17 : index
    %c0_90 = arith.constant 0 : index
    %111 = vector.load %arg1[%c0_89, %c17, %c0_90] : memref<1x32x96xf32, #tpu.memory_space<vmem>>, vector<1x1x96xf32>
    %112 = vector.shape_cast %111 : vector<1x1x96xf32> to vector<1x96xf32>
    %cst_91 = arith.constant dense<0.000000e+00> : vector<1x128xf32>
    %113 = tpu.matmul %110, %1, %cst_91 {dimension_numbers = #tpu.dot_dimension_numbers<[1], [0], [0], [1], [0, 0, 1, 1], [], []>} : vector<1x96xf32>, vector<96x128xf32>, vector<1x128xf32> -> vector<1x128xf32>
    %cst_92 = arith.constant dense<0.000000e+00> : vector<1x128xf32>
    %114 = tpu.matmul %112, %3, %cst_92 {dimension_numbers = #tpu.dot_dimension_numbers<[1], [0], [0], [1], [0, 0, 1, 1], [], []>} : vector<1x96xf32>, vector<96x128xf32>, vector<1x128xf32> -> vector<1x128xf32>
    %115 = arith.addf %113, %114 : vector<1x128xf32>
    %116 = arith.addf %115, %4 : vector<1x128xf32>
    %cst_93 = arith.constant 0.000000e+00 : f32
    %117 = vector.broadcast %cst_93 : f32 to vector<1x128xf32>
    %118 = arith.maximumf %116, %117 : vector<1x128xf32>
    %c0_94 = arith.constant 0 : index
    %c8_95 = arith.constant 8 : index
    %c0_96 = arith.constant 0 : index
    %119 = vector.load %arg9[%c0_94, %c8_95, %c0_96] : memref<1x16x128xf32, #tpu.memory_space<vmem>>, vector<1x1x128xf32>
    %120 = vector.shape_cast %119 : vector<1x1x128xf32> to vector<1x128xf32>
    %121 = vector.shape_cast %118 : vector<1x128xf32> to vector<1x1x128xf32>
    tpu.vector_store %arg9[%c0_94, %c8_95, %c0_96], %121 {strides = array<i32>} : memref<1x16x128xf32, #tpu.memory_space<vmem>>, vector<1x1x128xf32>,
    %c0_97 = arith.constant 0 : index
    %c18 = arith.constant 18 : index
    %c0_98 = arith.constant 0 : index
    %122 = vector.load %arg1[%c0_97, %c18, %c0_98] : memref<1x32x96xf32, #tpu.memory_space<vmem>>, vector<1x1x96xf32>
    %123 = vector.shape_cast %122 : vector<1x1x96xf32> to vector<1x96xf32>
    %c0_99 = arith.constant 0 : index
    %c19 = arith.constant 19 : index
    %c0_100 = arith.constant 0 : index
    %124 = vector.load %arg1[%c0_99, %c19, %c0_100] : memref<1x32x96xf32, #tpu.memory_space<vmem>>, vector<1x1x96xf32>
    %125 = vector.shape_cast %124 : vector<1x1x96xf32> to vector<1x96xf32>
    %cst_101 = arith.constant dense<0.000000e+00> : vector<1x128xf32>
    %126 = tpu.matmul %123, %1, %cst_101 {dimension_numbers = #tpu.dot_dimension_numbers<[1], [0], [0], [1], [0, 0, 1, 1], [], []>} : vector<1x96xf32>, vector<96x128xf32>, vector<1x128xf32> -> vector<1x128xf32>
    %cst_102 = arith.constant dense<0.000000e+00> : vector<1x128xf32>
    %127 = tpu.matmul %125, %3, %cst_102 {dimension_numbers = #tpu.dot_dimension_numbers<[1], [0], [0], [1], [0, 0, 1, 1], [], []>} : vector<1x96xf32>, vector<96x128xf32>, vector<1x128xf32> -> vector<1x128xf32>
    %128 = arith.addf %126, %127 : vector<1x128xf32>
    %129 = arith.addf %128, %4 : vector<1x128xf32>
    %cst_103 = arith.constant 0.000000e+00 : f32
    %130 = vector.broadcast %cst_103 : f32 to vector<1x128xf32>
    %131 = arith.maximumf %129, %130 : vector<1x128xf32>
    %c0_104 = arith.constant 0 : index
    %c9_105 = arith.constant 9 : index
    %c0_106 = arith.constant 0 : index
    %132 = vector.load %arg9[%c0_104, %c9_105, %c0_106] : memref<1x16x128xf32, #tpu.memory_space<vmem>>, vector<1x1x128xf32>
    %133 = vector.shape_cast %132 : vector<1x1x128xf32> to vector<1x128xf32>
    %134 = vector.shape_cast %131 : vector<1x128xf32> to vector<1x1x128xf32>
    tpu.vector_store %arg9[%c0_104, %c9_105, %c0_106], %134 {strides = array<i32>} : memref<1x16x128xf32, #tpu.memory_space<vmem>>, vector<1x1x128xf32>,
    %c0_107 = arith.constant 0 : index
    %c20 = arith.constant 20 : index
    %c0_108 = arith.constant 0 : index
    %135 = vector.load %arg1[%c0_107, %c20, %c0_108] : memref<1x32x96xf32, #tpu.memory_space<vmem>>, vector<1x1x96xf32>
    %136 = vector.shape_cast %135 : vector<1x1x96xf32> to vector<1x96xf32>
    %c0_109 = arith.constant 0 : index
    %c21 = arith.constant 21 : index
    %c0_110 = arith.constant 0 : index
    %137 = vector.load %arg1[%c0_109, %c21, %c0_110] : memref<1x32x96xf32, #tpu.memory_space<vmem>>, vector<1x1x96xf32>
    %138 = vector.shape_cast %137 : vector<1x1x96xf32> to vector<1x96xf32>
    %cst_111 = arith.constant dense<0.000000e+00> : vector<1x128xf32>
    %139 = tpu.matmul %136, %1, %cst_111 {dimension_numbers = #tpu.dot_dimension_numbers<[1], [0], [0], [1], [0, 0, 1, 1], [], []>} : vector<1x96xf32>, vector<96x128xf32>, vector<1x128xf32> -> vector<1x128xf32>
    %cst_112 = arith.constant dense<0.000000e+00> : vector<1x128xf32>
    %140 = tpu.matmul %138, %3, %cst_112 {dimension_numbers = #tpu.dot_dimension_numbers<[1], [0], [0], [1], [0, 0, 1, 1], [], []>} : vector<1x96xf32>, vector<96x128xf32>, vector<1x128xf32> -> vector<1x128xf32>
    %141 = arith.addf %139, %140 : vector<1x128xf32>
    %142 = arith.addf %141, %4 : vector<1x128xf32>
    %cst_113 = arith.constant 0.000000e+00 : f32
    %143 = vector.broadcast %cst_113 : f32 to vector<1x128xf32>
    %144 = arith.maximumf %142, %143 : vector<1x128xf32>
    %c0_114 = arith.constant 0 : index
    %c10_115 = arith.constant 10 : index
    %c0_116 = arith.constant 0 : index
    %145 = vector.load %arg9[%c0_114, %c10_115, %c0_116] : memref<1x16x128xf32, #tpu.memory_space<vmem>>, vector<1x1x128xf32>
    %146 = vector.shape_cast %145 : vector<1x1x128xf32> to vector<1x128xf32>
    %147 = vector.shape_cast %144 : vector<1x128xf32> to vector<1x1x128xf32>
    tpu.vector_store %arg9[%c0_114, %c10_115, %c0_116], %147 {strides = array<i32>} : memref<1x16x128xf32, #tpu.memory_space<vmem>>, vector<1x1x128xf32>,
    %c0_117 = arith.constant 0 : index
    %c22 = arith.constant 22 : index
    %c0_118 = arith.constant 0 : index
    %148 = vector.load %arg1[%c0_117, %c22, %c0_118] : memref<1x32x96xf32, #tpu.memory_space<vmem>>, vector<1x1x96xf32>
    %149 = vector.shape_cast %148 : vector<1x1x96xf32> to vector<1x96xf32>
    %c0_119 = arith.constant 0 : index
    %c23 = arith.constant 23 : index
    %c0_120 = arith.constant 0 : index
    %150 = vector.load %arg1[%c0_119, %c23, %c0_120] : memref<1x32x96xf32, #tpu.memory_space<vmem>>, vector<1x1x96xf32>
    %151 = vector.shape_cast %150 : vector<1x1x96xf32> to vector<1x96xf32>
    %cst_121 = arith.constant dense<0.000000e+00> : vector<1x128xf32>
    %152 = tpu.matmul %149, %1, %cst_121 {dimension_numbers = #tpu.dot_dimension_numbers<[1], [0], [0], [1], [0, 0, 1, 1], [], []>} : vector<1x96xf32>, vector<96x128xf32>, vector<1x128xf32> -> vector<1x128xf32>
    %cst_122 = arith.constant dense<0.000000e+00> : vector<1x128xf32>
    %153 = tpu.matmul %151, %3, %cst_122 {dimension_numbers = #tpu.dot_dimension_numbers<[1], [0], [0], [1], [0, 0, 1, 1], [], []>} : vector<1x96xf32>, vector<96x128xf32>, vector<1x128xf32> -> vector<1x128xf32>
    %154 = arith.addf %152, %153 : vector<1x128xf32>
    %155 = arith.addf %154, %4 : vector<1x128xf32>
    %cst_123 = arith.constant 0.000000e+00 : f32
    %156 = vector.broadcast %cst_123 : f32 to vector<1x128xf32>
    %157 = arith.maximumf %155, %156 : vector<1x128xf32>
    %c0_124 = arith.constant 0 : index
    %c11_125 = arith.constant 11 : index
    %c0_126 = arith.constant 0 : index
    %158 = vector.load %arg9[%c0_124, %c11_125, %c0_126] : memref<1x16x128xf32, #tpu.memory_space<vmem>>, vector<1x1x128xf32>
    %159 = vector.shape_cast %158 : vector<1x1x128xf32> to vector<1x128xf32>
    %160 = vector.shape_cast %157 : vector<1x128xf32> to vector<1x1x128xf32>
    tpu.vector_store %arg9[%c0_124, %c11_125, %c0_126], %160 {strides = array<i32>} : memref<1x16x128xf32, #tpu.memory_space<vmem>>, vector<1x1x128xf32>,
    %c0_127 = arith.constant 0 : index
    %c24 = arith.constant 24 : index
    %c0_128 = arith.constant 0 : index
    %161 = vector.load %arg1[%c0_127, %c24, %c0_128] : memref<1x32x96xf32, #tpu.memory_space<vmem>>, vector<1x1x96xf32>
    %162 = vector.shape_cast %161 : vector<1x1x96xf32> to vector<1x96xf32>
    %c0_129 = arith.constant 0 : index
    %c25 = arith.constant 25 : index
    %c0_130 = arith.constant 0 : index
    %163 = vector.load %arg1[%c0_129, %c25, %c0_130] : memref<1x32x96xf32, #tpu.memory_space<vmem>>, vector<1x1x96xf32>
    %164 = vector.shape_cast %163 : vector<1x1x96xf32> to vector<1x96xf32>
    %cst_131 = arith.constant dense<0.000000e+00> : vector<1x128xf32>
    %165 = tpu.matmul %162, %1, %cst_131 {dimension_numbers = #tpu.dot_dimension_numbers<[1], [0], [0], [1], [0, 0, 1, 1], [], []>} : vector<1x96xf32>, vector<96x128xf32>, vector<1x128xf32> -> vector<1x128xf32>
    %cst_132 = arith.constant dense<0.000000e+00> : vector<1x128xf32>
    %166 = tpu.matmul %164, %3, %cst_132 {dimension_numbers = #tpu.dot_dimension_numbers<[1], [0], [0], [1], [0, 0, 1, 1], [], []>} : vector<1x96xf32>, vector<96x128xf32>, vector<1x128xf32> -> vector<1x128xf32>
    %167 = arith.addf %165, %166 : vector<1x128xf32>
    %168 = arith.addf %167, %4 : vector<1x128xf32>
    %cst_133 = arith.constant 0.000000e+00 : f32
    %169 = vector.broadcast %cst_133 : f32 to vector<1x128xf32>
    %170 = arith.maximumf %168, %169 : vector<1x128xf32>
    %c0_134 = arith.constant 0 : index
    %c12_135 = arith.constant 12 : index
    %c0_136 = arith.constant 0 : index
    %171 = vector.load %arg9[%c0_134, %c12_135, %c0_136] : memref<1x16x128xf32, #tpu.memory_space<vmem>>, vector<1x1x128xf32>
    %172 = vector.shape_cast %171 : vector<1x1x128xf32> to vector<1x128xf32>
    %173 = vector.shape_cast %170 : vector<1x128xf32> to vector<1x1x128xf32>
    tpu.vector_store %arg9[%c0_134, %c12_135, %c0_136], %173 {strides = array<i32>} : memref<1x16x128xf32, #tpu.memory_space<vmem>>, vector<1x1x128xf32>,
    %c0_137 = arith.constant 0 : index
    %c26 = arith.constant 26 : index
    %c0_138 = arith.constant 0 : index
    %174 = vector.load %arg1[%c0_137, %c26, %c0_138] : memref<1x32x96xf32, #tpu.memory_space<vmem>>, vector<1x1x96xf32>
    %175 = vector.shape_cast %174 : vector<1x1x96xf32> to vector<1x96xf32>
    %c0_139 = arith.constant 0 : index
    %c27 = arith.constant 27 : index
    %c0_140 = arith.constant 0 : index
    %176 = vector.load %arg1[%c0_139, %c27, %c0_140] : memref<1x32x96xf32, #tpu.memory_space<vmem>>, vector<1x1x96xf32>
    %177 = vector.shape_cast %176 : vector<1x1x96xf32> to vector<1x96xf32>
    %cst_141 = arith.constant dense<0.000000e+00> : vector<1x128xf32>
    %178 = tpu.matmul %175, %1, %cst_141 {dimension_numbers = #tpu.dot_dimension_numbers<[1], [0], [0], [1], [0, 0, 1, 1], [], []>} : vector<1x96xf32>, vector<96x128xf32>, vector<1x128xf32> -> vector<1x128xf32>
    %cst_142 = arith.constant dense<0.000000e+00> : vector<1x128xf32>
    %179 = tpu.matmul %177, %3, %cst_142 {dimension_numbers = #tpu.dot_dimension_numbers<[1], [0], [0], [1], [0, 0, 1, 1], [], []>} : vector<1x96xf32>, vector<96x128xf32>, vector<1x128xf32> -> vector<1x128xf32>
    %180 = arith.addf %178, %179 : vector<1x128xf32>
    %181 = arith.addf %180, %4 : vector<1x128xf32>
    %cst_143 = arith.constant 0.000000e+00 : f32
    %182 = vector.broadcast %cst_143 : f32 to vector<1x128xf32>
    %183 = arith.maximumf %181, %182 : vector<1x128xf32>
    %c0_144 = arith.constant 0 : index
    %c13_145 = arith.constant 13 : index
    %c0_146 = arith.constant 0 : index
    %184 = vector.load %arg9[%c0_144, %c13_145, %c0_146] : memref<1x16x128xf32, #tpu.memory_space<vmem>>, vector<1x1x128xf32>
    %185 = vector.shape_cast %184 : vector<1x1x128xf32> to vector<1x128xf32>
    %186 = vector.shape_cast %183 : vector<1x128xf32> to vector<1x1x128xf32>
    tpu.vector_store %arg9[%c0_144, %c13_145, %c0_146], %186 {strides = array<i32>} : memref<1x16x128xf32, #tpu.memory_space<vmem>>, vector<1x1x128xf32>,
    %c0_147 = arith.constant 0 : index
    %c28 = arith.constant 28 : index
    %c0_148 = arith.constant 0 : index
    %187 = vector.load %arg1[%c0_147, %c28, %c0_148] : memref<1x32x96xf32, #tpu.memory_space<vmem>>, vector<1x1x96xf32>
    %188 = vector.shape_cast %187 : vector<1x1x96xf32> to vector<1x96xf32>
    %c0_149 = arith.constant 0 : index
    %c29 = arith.constant 29 : index
    %c0_150 = arith.constant 0 : index
    %189 = vector.load %arg1[%c0_149, %c29, %c0_150] : memref<1x32x96xf32, #tpu.memory_space<vmem>>, vector<1x1x96xf32>
    %190 = vector.shape_cast %189 : vector<1x1x96xf32> to vector<1x96xf32>
    %cst_151 = arith.constant dense<0.000000e+00> : vector<1x128xf32>
    %191 = tpu.matmul %188, %1, %cst_151 {dimension_numbers = #tpu.dot_dimension_numbers<[1], [0], [0], [1], [0, 0, 1, 1], [], []>} : vector<1x96xf32>, vector<96x128xf32>, vector<1x128xf32> -> vector<1x128xf32>
    %cst_152 = arith.constant dense<0.000000e+00> : vector<1x128xf32>
    %192 = tpu.matmul %190, %3, %cst_152 {dimension_numbers = #tpu.dot_dimension_numbers<[1], [0], [0], [1], [0, 0, 1, 1], [], []>} : vector<1x96xf32>, vector<96x128xf32>, vector<1x128xf32> -> vector<1x128xf32>
    %193 = arith.addf %191, %192 : vector<1x128xf32>
    %194 = arith.addf %193, %4 : vector<1x128xf32>
    %cst_153 = arith.constant 0.000000e+00 : f32
    %195 = vector.broadcast %cst_153 : f32 to vector<1x128xf32>
    %196 = arith.maximumf %194, %195 : vector<1x128xf32>
    %c0_154 = arith.constant 0 : index
    %c14_155 = arith.constant 14 : index
    %c0_156 = arith.constant 0 : index
    %197 = vector.load %arg9[%c0_154, %c14_155, %c0_156] : memref<1x16x128xf32, #tpu.memory_space<vmem>>, vector<1x1x128xf32>
    %198 = vector.shape_cast %197 : vector<1x1x128xf32> to vector<1x128xf32>
    %199 = vector.shape_cast %196 : vector<1x128xf32> to vector<1x1x128xf32>
    tpu.vector_store %arg9[%c0_154, %c14_155, %c0_156], %199 {strides = array<i32>} : memref<1x16x128xf32, #tpu.memory_space<vmem>>, vector<1x1x128xf32>,
    %c0_157 = arith.constant 0 : index
    %c30 = arith.constant 30 : index
    %c0_158 = arith.constant 0 : index
    %200 = vector.load %arg1[%c0_157, %c30, %c0_158] : memref<1x32x96xf32, #tpu.memory_space<vmem>>, vector<1x1x96xf32>
    %201 = vector.shape_cast %200 : vector<1x1x96xf32> to vector<1x96xf32>
    %c0_159 = arith.constant 0 : index
    %c31 = arith.constant 31 : index
    %c0_160 = arith.constant 0 : index
    %202 = vector.load %arg1[%c0_159, %c31, %c0_160] : memref<1x32x96xf32, #tpu.memory_space<vmem>>, vector<1x1x96xf32>
    %203 = vector.shape_cast %202 : vector<1x1x96xf32> to vector<1x96xf32>
    %cst_161 = arith.constant dense<0.000000e+00> : vector<1x128xf32>
    %204 = tpu.matmul %201, %1, %cst_161 {dimension_numbers = #tpu.dot_dimension_numbers<[1], [0], [0], [1], [0, 0, 1, 1], [], []>} : vector<1x96xf32>, vector<96x128xf32>, vector<1x128xf32> -> vector<1x128xf32>
    %cst_162 = arith.constant dense<0.000000e+00> : vector<1x128xf32>
    %205 = tpu.matmul %203, %3, %cst_162 {dimension_numbers = #tpu.dot_dimension_numbers<[1], [0], [0], [1], [0, 0, 1, 1], [], []>} : vector<1x96xf32>, vector<96x128xf32>, vector<1x128xf32> -> vector<1x128xf32>
    %206 = arith.addf %204, %205 : vector<1x128xf32>
    %207 = arith.addf %206, %4 : vector<1x128xf32>
    %cst_163 = arith.constant 0.000000e+00 : f32
    %208 = vector.broadcast %cst_163 : f32 to vector<1x128xf32>
    %209 = arith.maximumf %207, %208 : vector<1x128xf32>
    %c0_164 = arith.constant 0 : index
    %c15_165 = arith.constant 15 : index
    %c0_166 = arith.constant 0 : index
    %210 = vector.load %arg9[%c0_164, %c15_165, %c0_166] : memref<1x16x128xf32, #tpu.memory_space<vmem>>, vector<1x1x128xf32>
    %211 = vector.shape_cast %210 : vector<1x1x128xf32> to vector<1x128xf32>
    %212 = vector.shape_cast %209 : vector<1x128xf32> to vector<1x1x128xf32>
    tpu.vector_store %arg9[%c0_164, %c15_165, %c0_166], %212 {strides = array<i32>} : memref<1x16x128xf32, #tpu.memory_space<vmem>>, vector<1x1x128xf32>,
    %c0_167 = arith.constant 0 : index
    %c0_168 = arith.constant 0 : index
    %c0_169 = arith.constant 0 : index
    %213 = vector.load %arg5[%c0_167, %c0_168, %c0_169] : memref<2x128x128xf32, #tpu.memory_space<vmem>>, vector<1x128x128xf32>
    %214 = vector.shape_cast %213 : vector<1x128x128xf32> to vector<128x128xf32>
    %c1_170 = arith.constant 1 : index
    %c0_171 = arith.constant 0 : index
    %c0_172 = arith.constant 0 : index
    %215 = vector.load %arg5[%c1_170, %c0_171, %c0_172] : memref<2x128x128xf32, #tpu.memory_space<vmem>>, vector<1x128x128xf32>
    %216 = vector.shape_cast %215 : vector<1x128x128xf32> to vector<128x128xf32>
    %c0_173 = arith.constant 0 : index
    %c0_174 = arith.constant 0 : index
    %217 = vector.load %arg6[%c0_173, %c0_174] : memref<1x128xf32, #tpu.memory_space<vmem>>, vector<1x128xf32>
    %c0_175 = arith.constant 0 : index
    %c0_176 = arith.constant 0 : index
    %c0_177 = arith.constant 0 : index
    %218 = vector.load %arg9[%c0_175, %c0_176, %c0_177] : memref<1x16x128xf32, #tpu.memory_space<vmem>>, vector<1x1x128xf32>
    %219 = vector.shape_cast %218 : vector<1x1x128xf32> to vector<1x128xf32>
    %c0_178 = arith.constant 0 : index
    %c1_179 = arith.constant 1 : index
    %c0_180 = arith.constant 0 : index
    %220 = vector.load %arg9[%c0_178, %c1_179, %c0_180] : memref<1x16x128xf32, #tpu.memory_space<vmem>>, vector<1x1x128xf32>
    %221 = vector.shape_cast %220 : vector<1x1x128xf32> to vector<1x128xf32>
    %cst_181 = arith.constant dense<0.000000e+00> : vector<1x128xf32>
    %222 = tpu.matmul %219, %214, %cst_181 {dimension_numbers = #tpu.dot_dimension_numbers<[1], [0], [0], [1], [0, 0, 1, 1], [], []>} : vector<1x128xf32>, vector<128x128xf32>, vector<1x128xf32> -> vector<1x128xf32>
    %cst_182 = arith.constant dense<0.000000e+00> : vector<1x128xf32>
    %223 = tpu.matmul %221, %216, %cst_182 {dimension_numbers = #tpu.dot_dimension_numbers<[1], [0], [0], [1], [0, 0, 1, 1], [], []>} : vector<1x128xf32>, vector<128x128xf32>, vector<1x128xf32> -> vector<1x128xf32>
    %224 = arith.addf %222, %223 : vector<1x128xf32>
    %225 = arith.addf %224, %217 : vector<1x128xf32>
    %cst_183 = arith.constant 0.000000e+00 : f32
    %226 = vector.broadcast %cst_183 : f32 to vector<1x128xf32>
    %227 = arith.maximumf %225, %226 : vector<1x128xf32>
    %c0_184 = arith.constant 0 : index
    %c0_185 = arith.constant 0 : index
    %c0_186 = arith.constant 0 : index
    %228 = vector.load %arg10[%c0_184, %c0_185, %c0_186] : memref<1x8x128xf32, #tpu.memory_space<vmem>>, vector<1x1x128xf32>
    %229 = vector.shape_cast %228 : vector<1x1x128xf32> to vector<1x128xf32>
    %230 = vector.shape_cast %227 : vector<1x128xf32> to vector<1x1x128xf32>
    tpu.vector_store %arg10[%c0_184, %c0_185, %c0_186], %230 {strides = array<i32>} : memref<1x8x128xf32, #tpu.memory_space<vmem>>, vector<1x1x128xf32>,
    %c0_187 = arith.constant 0 : index
    %c2_188 = arith.constant 2 : index
    %c0_189 = arith.constant 0 : index
    %231 = vector.load %arg9[%c0_187, %c2_188, %c0_189] : memref<1x16x128xf32, #tpu.memory_space<vmem>>, vector<1x1x128xf32>
    %232 = vector.shape_cast %231 : vector<1x1x128xf32> to vector<1x128xf32>
    %c0_190 = arith.constant 0 : index
    %c3_191 = arith.constant 3 : index
    %c0_192 = arith.constant 0 : index
    %233 = vector.load %arg9[%c0_190, %c3_191, %c0_192] : memref<1x16x128xf32, #tpu.memory_space<vmem>>, vector<1x1x128xf32>
    %234 = vector.shape_cast %233 : vector<1x1x128xf32> to vector<1x128xf32>
    %cst_193 = arith.constant dense<0.000000e+00> : vector<1x128xf32>
    %235 = tpu.matmul %232, %214, %cst_193 {dimension_numbers = #tpu.dot_dimension_numbers<[1], [0], [0], [1], [0, 0, 1, 1], [], []>} : vector<1x128xf32>, vector<128x128xf32>, vector<1x128xf32> -> vector<1x128xf32>
    %cst_194 = arith.constant dense<0.000000e+00> : vector<1x128xf32>
    %236 = tpu.matmul %234, %216, %cst_194 {dimension_numbers = #tpu.dot_dimension_numbers<[1], [0], [0], [1], [0, 0, 1, 1], [], []>} : vector<1x128xf32>, vector<128x128xf32>, vector<1x128xf32> -> vector<1x128xf32>
    %237 = arith.addf %235, %236 : vector<1x128xf32>
    %238 = arith.addf %237, %217 : vector<1x128xf32>
    %cst_195 = arith.constant 0.000000e+00 : f32
    %239 = vector.broadcast %cst_195 : f32 to vector<1x128xf32>
    %240 = arith.maximumf %238, %239 : vector<1x128xf32>
    %c0_196 = arith.constant 0 : index
    %c1_197 = arith.constant 1 : index
    %c0_198 = arith.constant 0 : index
    %241 = vector.load %arg10[%c0_196, %c1_197, %c0_198] : memref<1x8x128xf32, #tpu.memory_space<vmem>>, vector<1x1x128xf32>
    %242 = vector.shape_cast %241 : vector<1x1x128xf32> to vector<1x128xf32>
    %243 = vector.shape_cast %240 : vector<1x128xf32> to vector<1x1x128xf32>
    tpu.vector_store %arg10[%c0_196, %c1_197, %c0_198], %243 {strides = array<i32>} : memref<1x8x128xf32, #tpu.memory_space<vmem>>, vector<1x1x128xf32>,
    %c0_199 = arith.constant 0 : index
    %c4_200 = arith.constant 4 : index
    %c0_201 = arith.constant 0 : index
    %244 = vector.load %arg9[%c0_199, %c4_200, %c0_201] : memref<1x16x128xf32, #tpu.memory_space<vmem>>, vector<1x1x128xf32>
    %245 = vector.shape_cast %244 : vector<1x1x128xf32> to vector<1x128xf32>
    %c0_202 = arith.constant 0 : index
    %c5_203 = arith.constant 5 : index
    %c0_204 = arith.constant 0 : index
    %246 = vector.load %arg9[%c0_202, %c5_203, %c0_204] : memref<1x16x128xf32, #tpu.memory_space<vmem>>, vector<1x1x128xf32>
    %247 = vector.shape_cast %246 : vector<1x1x128xf32> to vector<1x128xf32>
    %cst_205 = arith.constant dense<0.000000e+00> : vector<1x128xf32>
    %248 = tpu.matmul %245, %214, %cst_205 {dimension_numbers = #tpu.dot_dimension_numbers<[1], [0], [0], [1], [0, 0, 1, 1], [], []>} : vector<1x128xf32>, vector<128x128xf32>, vector<1x128xf32> -> vector<1x128xf32>
    %cst_206 = arith.constant dense<0.000000e+00> : vector<1x128xf32>
    %249 = tpu.matmul %247, %216, %cst_206 {dimension_numbers = #tpu.dot_dimension_numbers<[1], [0], [0], [1], [0, 0, 1, 1], [], []>} : vector<1x128xf32>, vector<128x128xf32>, vector<1x128xf32> -> vector<1x128xf32>
    %250 = arith.addf %248, %249 : vector<1x128xf32>
    %251 = arith.addf %250, %217 : vector<1x128xf32>
    %cst_207 = arith.constant 0.000000e+00 : f32
    %252 = vector.broadcast %cst_207 : f32 to vector<1x128xf32>
    %253 = arith.maximumf %251, %252 : vector<1x128xf32>
    %c0_208 = arith.constant 0 : index
    %c2_209 = arith.constant 2 : index
    %c0_210 = arith.constant 0 : index
    %254 = vector.load %arg10[%c0_208, %c2_209, %c0_210] : memref<1x8x128xf32, #tpu.memory_space<vmem>>, vector<1x1x128xf32>
    %255 = vector.shape_cast %254 : vector<1x1x128xf32> to vector<1x128xf32>
    %256 = vector.shape_cast %253 : vector<1x128xf32> to vector<1x1x128xf32>
    tpu.vector_store %arg10[%c0_208, %c2_209, %c0_210], %256 {strides = array<i32>} : memref<1x8x128xf32, #tpu.memory_space<vmem>>, vector<1x1x128xf32>,
    %c0_211 = arith.constant 0 : index
    %c6_212 = arith.constant 6 : index
    %c0_213 = arith.constant 0 : index
    %257 = vector.load %arg9[%c0_211, %c6_212, %c0_213] : memref<1x16x128xf32, #tpu.memory_space<vmem>>, vector<1x1x128xf32>
    %258 = vector.shape_cast %257 : vector<1x1x128xf32> to vector<1x128xf32>
    %c0_214 = arith.constant 0 : index
    %c7_215 = arith.constant 7 : index
    %c0_216 = arith.constant 0 : index
    %259 = vector.load %arg9[%c0_214, %c7_215, %c0_216] : memref<1x16x128xf32, #tpu.memory_space<vmem>>, vector<1x1x128xf32>
    %260 = vector.shape_cast %259 : vector<1x1x128xf32> to vector<1x128xf32>
    %cst_217 = arith.constant dense<0.000000e+00> : vector<1x128xf32>
    %261 = tpu.matmul %258, %214, %cst_217 {dimension_numbers = #tpu.dot_dimension_numbers<[1], [0], [0], [1], [0, 0, 1, 1], [], []>} : vector<1x128xf32>, vector<128x128xf32>, vector<1x128xf32> -> vector<1x128xf32>
    %cst_218 = arith.constant dense<0.000000e+00> : vector<1x128xf32>
    %262 = tpu.matmul %260, %216, %cst_218 {dimension_numbers = #tpu.dot_dimension_numbers<[1], [0], [0], [1], [0, 0, 1, 1], [], []>} : vector<1x128xf32>, vector<128x128xf32>, vector<1x128xf32> -> vector<1x128xf32>
    %263 = arith.addf %261, %262 : vector<1x128xf32>
    %264 = arith.addf %263, %217 : vector<1x128xf32>
    %cst_219 = arith.constant 0.000000e+00 : f32
    %265 = vector.broadcast %cst_219 : f32 to vector<1x128xf32>
    %266 = arith.maximumf %264, %265 : vector<1x128xf32>
    %c0_220 = arith.constant 0 : index
    %c3_221 = arith.constant 3 : index
    %c0_222 = arith.constant 0 : index
    %267 = vector.load %arg10[%c0_220, %c3_221, %c0_222] : memref<1x8x128xf32, #tpu.memory_space<vmem>>, vector<1x1x128xf32>
    %268 = vector.shape_cast %267 : vector<1x1x128xf32> to vector<1x128xf32>
    %269 = vector.shape_cast %266 : vector<1x128xf32> to vector<1x1x128xf32>
    tpu.vector_store %arg10[%c0_220, %c3_221, %c0_222], %269 {strides = array<i32>} : memref<1x8x128xf32, #tpu.memory_space<vmem>>, vector<1x1x128xf32>,
    %c0_223 = arith.constant 0 : index
    %c8_224 = arith.constant 8 : index
    %c0_225 = arith.constant 0 : index
    %270 = vector.load %arg9[%c0_223, %c8_224, %c0_225] : memref<1x16x128xf32, #tpu.memory_space<vmem>>, vector<1x1x128xf32>
    %271 = vector.shape_cast %270 : vector<1x1x128xf32> to vector<1x128xf32>
    %c0_226 = arith.constant 0 : index
    %c9_227 = arith.constant 9 : index
    %c0_228 = arith.constant 0 : index
    %272 = vector.load %arg9[%c0_226, %c9_227, %c0_228] : memref<1x16x128xf32, #tpu.memory_space<vmem>>, vector<1x1x128xf32>
    %273 = vector.shape_cast %272 : vector<1x1x128xf32> to vector<1x128xf32>
    %cst_229 = arith.constant dense<0.000000e+00> : vector<1x128xf32>
    %274 = tpu.matmul %271, %214, %cst_229 {dimension_numbers = #tpu.dot_dimension_numbers<[1], [0], [0], [1], [0, 0, 1, 1], [], []>} : vector<1x128xf32>, vector<128x128xf32>, vector<1x128xf32> -> vector<1x128xf32>
    %cst_230 = arith.constant dense<0.000000e+00> : vector<1x128xf32>
    %275 = tpu.matmul %273, %216, %cst_230 {dimension_numbers = #tpu.dot_dimension_numbers<[1], [0], [0], [1], [0, 0, 1, 1], [], []>} : vector<1x128xf32>, vector<128x128xf32>, vector<1x128xf32> -> vector<1x128xf32>
    %276 = arith.addf %274, %275 : vector<1x128xf32>
    %277 = arith.addf %276, %217 : vector<1x128xf32>
    %cst_231 = arith.constant 0.000000e+00 : f32
    %278 = vector.broadcast %cst_231 : f32 to vector<1x128xf32>
    %279 = arith.maximumf %277, %278 : vector<1x128xf32>
    %c0_232 = arith.constant 0 : index
    %c4_233 = arith.constant 4 : index
    %c0_234 = arith.constant 0 : index
    %280 = vector.load %arg10[%c0_232, %c4_233, %c0_234] : memref<1x8x128xf32, #tpu.memory_space<vmem>>, vector<1x1x128xf32>
    %281 = vector.shape_cast %280 : vector<1x1x128xf32> to vector<1x128xf32>
    %282 = vector.shape_cast %279 : vector<1x128xf32> to vector<1x1x128xf32>
    tpu.vector_store %arg10[%c0_232, %c4_233, %c0_234], %282 {strides = array<i32>} : memref<1x8x128xf32, #tpu.memory_space<vmem>>, vector<1x1x128xf32>,
    %c0_235 = arith.constant 0 : index
    %c10_236 = arith.constant 10 : index
    %c0_237 = arith.constant 0 : index
    %283 = vector.load %arg9[%c0_235, %c10_236, %c0_237] : memref<1x16x128xf32, #tpu.memory_space<vmem>>, vector<1x1x128xf32>
    %284 = vector.shape_cast %283 : vector<1x1x128xf32> to vector<1x128xf32>
    %c0_238 = arith.constant 0 : index
    %c11_239 = arith.constant 11 : index
    %c0_240 = arith.constant 0 : index
    %285 = vector.load %arg9[%c0_238, %c11_239, %c0_240] : memref<1x16x128xf32, #tpu.memory_space<vmem>>, vector<1x1x128xf32>
    %286 = vector.shape_cast %285 : vector<1x1x128xf32> to vector<1x128xf32>
    %cst_241 = arith.constant dense<0.000000e+00> : vector<1x128xf32>
    %287 = tpu.matmul %284, %214, %cst_241 {dimension_numbers = #tpu.dot_dimension_numbers<[1], [0], [0], [1], [0, 0, 1, 1], [], []>} : vector<1x128xf32>, vector<128x128xf32>, vector<1x128xf32> -> vector<1x128xf32>
    %cst_242 = arith.constant dense<0.000000e+00> : vector<1x128xf32>
    %288 = tpu.matmul %286, %216, %cst_242 {dimension_numbers = #tpu.dot_dimension_numbers<[1], [0], [0], [1], [0, 0, 1, 1], [], []>} : vector<1x128xf32>, vector<128x128xf32>, vector<1x128xf32> -> vector<1x128xf32>
    %289 = arith.addf %287, %288 : vector<1x128xf32>
    %290 = arith.addf %289, %217 : vector<1x128xf32>
    %cst_243 = arith.constant 0.000000e+00 : f32
    %291 = vector.broadcast %cst_243 : f32 to vector<1x128xf32>
    %292 = arith.maximumf %290, %291 : vector<1x128xf32>
    %c0_244 = arith.constant 0 : index
    %c5_245 = arith.constant 5 : index
    %c0_246 = arith.constant 0 : index
    %293 = vector.load %arg10[%c0_244, %c5_245, %c0_246] : memref<1x8x128xf32, #tpu.memory_space<vmem>>, vector<1x1x128xf32>
    %294 = vector.shape_cast %293 : vector<1x1x128xf32> to vector<1x128xf32>
    %295 = vector.shape_cast %292 : vector<1x128xf32> to vector<1x1x128xf32>
    tpu.vector_store %arg10[%c0_244, %c5_245, %c0_246], %295 {strides = array<i32>} : memref<1x8x128xf32, #tpu.memory_space<vmem>>, vector<1x1x128xf32>,
    %c0_247 = arith.constant 0 : index
    %c12_248 = arith.constant 12 : index
    %c0_249 = arith.constant 0 : index
    %296 = vector.load %arg9[%c0_247, %c12_248, %c0_249] : memref<1x16x128xf32, #tpu.memory_space<vmem>>, vector<1x1x128xf32>
    %297 = vector.shape_cast %296 : vector<1x1x128xf32> to vector<1x128xf32>
    %c0_250 = arith.constant 0 : index
    %c13_251 = arith.constant 13 : index
    %c0_252 = arith.constant 0 : index
    %298 = vector.load %arg9[%c0_250, %c13_251, %c0_252] : memref<1x16x128xf32, #tpu.memory_space<vmem>>, vector<1x1x128xf32>
    %299 = vector.shape_cast %298 : vector<1x1x128xf32> to vector<1x128xf32>
    %cst_253 = arith.constant dense<0.000000e+00> : vector<1x128xf32>
    %300 = tpu.matmul %297, %214, %cst_253 {dimension_numbers = #tpu.dot_dimension_numbers<[1], [0], [0], [1], [0, 0, 1, 1], [], []>} : vector<1x128xf32>, vector<128x128xf32>, vector<1x128xf32> -> vector<1x128xf32>
    %cst_254 = arith.constant dense<0.000000e+00> : vector<1x128xf32>
    %301 = tpu.matmul %299, %216, %cst_254 {dimension_numbers = #tpu.dot_dimension_numbers<[1], [0], [0], [1], [0, 0, 1, 1], [], []>} : vector<1x128xf32>, vector<128x128xf32>, vector<1x128xf32> -> vector<1x128xf32>
    %302 = arith.addf %300, %301 : vector<1x128xf32>
    %303 = arith.addf %302, %217 : vector<1x128xf32>
    %cst_255 = arith.constant 0.000000e+00 : f32
    %304 = vector.broadcast %cst_255 : f32 to vector<1x128xf32>
    %305 = arith.maximumf %303, %304 : vector<1x128xf32>
    %c0_256 = arith.constant 0 : index
    %c6_257 = arith.constant 6 : index
    %c0_258 = arith.constant 0 : index
    %306 = vector.load %arg10[%c0_256, %c6_257, %c0_258] : memref<1x8x128xf32, #tpu.memory_space<vmem>>, vector<1x1x128xf32>
    %307 = vector.shape_cast %306 : vector<1x1x128xf32> to vector<1x128xf32>
    %308 = vector.shape_cast %305 : vector<1x128xf32> to vector<1x1x128xf32>
    tpu.vector_store %arg10[%c0_256, %c6_257, %c0_258], %308 {strides = array<i32>} : memref<1x8x128xf32, #tpu.memory_space<vmem>>, vector<1x1x128xf32>,
    %c0_259 = arith.constant 0 : index
    %c14_260 = arith.constant 14 : index
    %c0_261 = arith.constant 0 : index
    %309 = vector.load %arg9[%c0_259, %c14_260, %c0_261] : memref<1x16x128xf32, #tpu.memory_space<vmem>>, vector<1x1x128xf32>
    %310 = vector.shape_cast %309 : vector<1x1x128xf32> to vector<1x128xf32>
    %c0_262 = arith.constant 0 : index
    %c15_263 = arith.constant 15 : index
    %c0_264 = arith.constant 0 : index
    %311 = vector.load %arg9[%c0_262, %c15_263, %c0_264] : memref<1x16x128xf32, #tpu.memory_space<vmem>>, vector<1x1x128xf32>
    %312 = vector.shape_cast %311 : vector<1x1x128xf32> to vector<1x128xf32>
    %cst_265 = arith.constant dense<0.000000e+00> : vector<1x128xf32>
    %313 = tpu.matmul %310, %214, %cst_265 {dimension_numbers = #tpu.dot_dimension_numbers<[1], [0], [0], [1], [0, 0, 1, 1], [], []>} : vector<1x128xf32>, vector<128x128xf32>, vector<1x128xf32> -> vector<1x128xf32>
    %cst_266 = arith.constant dense<0.000000e+00> : vector<1x128xf32>
    %314 = tpu.matmul %312, %216, %cst_266 {dimension_numbers = #tpu.dot_dimension_numbers<[1], [0], [0], [1], [0, 0, 1, 1], [], []>} : vector<1x128xf32>, vector<128x128xf32>, vector<1x128xf32> -> vector<1x128xf32>
    %315 = arith.addf %313, %314 : vector<1x128xf32>
    %316 = arith.addf %315, %217 : vector<1x128xf32>
    %cst_267 = arith.constant 0.000000e+00 : f32
    %317 = vector.broadcast %cst_267 : f32 to vector<1x128xf32>
    %318 = arith.maximumf %316, %317 : vector<1x128xf32>
    %c0_268 = arith.constant 0 : index
    %c7_269 = arith.constant 7 : index
    %c0_270 = arith.constant 0 : index
    %319 = vector.load %arg10[%c0_268, %c7_269, %c0_270] : memref<1x8x128xf32, #tpu.memory_space<vmem>>, vector<1x1x128xf32>
    %320 = vector.shape_cast %319 : vector<1x1x128xf32> to vector<1x128xf32>
    %321 = vector.shape_cast %318 : vector<1x128xf32> to vector<1x1x128xf32>
    tpu.vector_store %arg10[%c0_268, %c7_269, %c0_270], %321 {strides = array<i32>} : memref<1x8x128xf32, #tpu.memory_space<vmem>>, vector<1x1x128xf32>,
    %c0_271 = arith.constant 0 : index
    %c0_272 = arith.constant 0 : index
    %c0_273 = arith.constant 0 : index
    %322 = vector.load %arg7[%c0_271, %c0_272, %c0_273] : memref<2x128x128xf32, #tpu.memory_space<vmem>>, vector<1x128x128xf32>
    %323 = vector.shape_cast %322 : vector<1x128x128xf32> to vector<128x128xf32>
    %c1_274 = arith.constant 1 : index
    %c0_275 = arith.constant 0 : index
    %c0_276 = arith.constant 0 : index
    %324 = vector.load %arg7[%c1_274, %c0_275, %c0_276] : memref<2x128x128xf32, #tpu.memory_space<vmem>>, vector<1x128x128xf32>
    %325 = vector.shape_cast %324 : vector<1x128x128xf32> to vector<128x128xf32>
    %c0_277 = arith.constant 0 : index
    %c0_278 = arith.constant 0 : index
    %326 = vector.load %arg8[%c0_277, %c0_278] : memref<1x128xf32, #tpu.memory_space<vmem>>, vector<1x128xf32>
    %c0_279 = arith.constant 0 : index
    %c0_280 = arith.constant 0 : index
    %c0_281 = arith.constant 0 : index
    %327 = vector.load %arg10[%c0_279, %c0_280, %c0_281] : memref<1x8x128xf32, #tpu.memory_space<vmem>>, vector<1x1x128xf32>
    %328 = vector.shape_cast %327 : vector<1x1x128xf32> to vector<1x128xf32>
    %c0_282 = arith.constant 0 : index
    %c1_283 = arith.constant 1 : index
    %c0_284 = arith.constant 0 : index
    %329 = vector.load %arg10[%c0_282, %c1_283, %c0_284] : memref<1x8x128xf32, #tpu.memory_space<vmem>>, vector<1x1x128xf32>
    %330 = vector.shape_cast %329 : vector<1x1x128xf32> to vector<1x128xf32>
    %cst_285 = arith.constant dense<0.000000e+00> : vector<1x128xf32>
    %331 = tpu.matmul %328, %323, %cst_285 {dimension_numbers = #tpu.dot_dimension_numbers<[1], [0], [0], [1], [0, 0, 1, 1], [], []>} : vector<1x128xf32>, vector<128x128xf32>, vector<1x128xf32> -> vector<1x128xf32>
    %cst_286 = arith.constant dense<0.000000e+00> : vector<1x128xf32>
    %332 = tpu.matmul %330, %325, %cst_286 {dimension_numbers = #tpu.dot_dimension_numbers<[1], [0], [0], [1], [0, 0, 1, 1], [], []>} : vector<1x128xf32>, vector<128x128xf32>, vector<1x128xf32> -> vector<1x128xf32>
    %333 = arith.addf %331, %332 : vector<1x128xf32>
    %334 = arith.addf %333, %326 : vector<1x128xf32>
    %cst_287 = arith.constant 0.000000e+00 : f32
    %335 = vector.broadcast %cst_287 : f32 to vector<1x128xf32>
    %336 = arith.maximumf %334, %335 : vector<1x128xf32>
    %c0_288 = arith.constant 0 : index
    %c0_289 = arith.constant 0 : index
    %c0_290 = arith.constant 0 : index
    %337 = vector.load %arg11[%c0_288, %c0_289, %c0_290] : memref<1x4x128xf32, #tpu.memory_space<vmem>>, vector<1x1x128xf32>
    %338 = vector.shape_cast %337 : vector<1x1x128xf32> to vector<1x128xf32>
    %339 = vector.shape_cast %336 : vector<1x128xf32> to vector<1x1x128xf32>
    tpu.vector_store %arg11[%c0_288, %c0_289, %c0_290], %339 {strides = array<i32>} : memref<1x4x128xf32, #tpu.memory_space<vmem>>, vector<1x1x128xf32>,
    %c0_291 = arith.constant 0 : index
    %c2_292 = arith.constant 2 : index
    %c0_293 = arith.constant 0 : index
    %340 = vector.load %arg10[%c0_291, %c2_292, %c0_293] : memref<1x8x128xf32, #tpu.memory_space<vmem>>, vector<1x1x128xf32>
    %341 = vector.shape_cast %340 : vector<1x1x128xf32> to vector<1x128xf32>
    %c0_294 = arith.constant 0 : index
    %c3_295 = arith.constant 3 : index
    %c0_296 = arith.constant 0 : index
    %342 = vector.load %arg10[%c0_294, %c3_295, %c0_296] : memref<1x8x128xf32, #tpu.memory_space<vmem>>, vector<1x1x128xf32>
    %343 = vector.shape_cast %342 : vector<1x1x128xf32> to vector<1x128xf32>
    %cst_297 = arith.constant dense<0.000000e+00> : vector<1x128xf32>
    %344 = tpu.matmul %341, %323, %cst_297 {dimension_numbers = #tpu.dot_dimension_numbers<[1], [0], [0], [1], [0, 0, 1, 1], [], []>} : vector<1x128xf32>, vector<128x128xf32>, vector<1x128xf32> -> vector<1x128xf32>
    %cst_298 = arith.constant dense<0.000000e+00> : vector<1x128xf32>
    %345 = tpu.matmul %343, %325, %cst_298 {dimension_numbers = #tpu.dot_dimension_numbers<[1], [0], [0], [1], [0, 0, 1, 1], [], []>} : vector<1x128xf32>, vector<128x128xf32>, vector<1x128xf32> -> vector<1x128xf32>
    %346 = arith.addf %344, %345 : vector<1x128xf32>
    %347 = arith.addf %346, %326 : vector<1x128xf32>
    %cst_299 = arith.constant 0.000000e+00 : f32
    %348 = vector.broadcast %cst_299 : f32 to vector<1x128xf32>
    %349 = arith.maximumf %347, %348 : vector<1x128xf32>
    %c0_300 = arith.constant 0 : index
    %c1_301 = arith.constant 1 : index
    %c0_302 = arith.constant 0 : index
    %350 = vector.load %arg11[%c0_300, %c1_301, %c0_302] : memref<1x4x128xf32, #tpu.memory_space<vmem>>, vector<1x1x128xf32>
    %351 = vector.shape_cast %350 : vector<1x1x128xf32> to vector<1x128xf32>
    %352 = vector.shape_cast %349 : vector<1x128xf32> to vector<1x1x128xf32>
    tpu.vector_store %arg11[%c0_300, %c1_301, %c0_302], %352 {strides = array<i32>} : memref<1x4x128xf32, #tpu.memory_space<vmem>>, vector<1x1x128xf32>,
    %c0_303 = arith.constant 0 : index
    %c4_304 = arith.constant 4 : index
    %c0_305 = arith.constant 0 : index
    %353 = vector.load %arg10[%c0_303, %c4_304, %c0_305] : memref<1x8x128xf32, #tpu.memory_space<vmem>>, vector<1x1x128xf32>
    %354 = vector.shape_cast %353 : vector<1x1x128xf32> to vector<1x128xf32>
    %c0_306 = arith.constant 0 : index
    %c5_307 = arith.constant 5 : index
    %c0_308 = arith.constant 0 : index
    %355 = vector.load %arg10[%c0_306, %c5_307, %c0_308] : memref<1x8x128xf32, #tpu.memory_space<vmem>>, vector<1x1x128xf32>
    %356 = vector.shape_cast %355 : vector<1x1x128xf32> to vector<1x128xf32>
    %cst_309 = arith.constant dense<0.000000e+00> : vector<1x128xf32>
    %357 = tpu.matmul %354, %323, %cst_309 {dimension_numbers = #tpu.dot_dimension_numbers<[1], [0], [0], [1], [0, 0, 1, 1], [], []>} : vector<1x128xf32>, vector<128x128xf32>, vector<1x128xf32> -> vector<1x128xf32>
    %cst_310 = arith.constant dense<0.000000e+00> : vector<1x128xf32>
    %358 = tpu.matmul %356, %325, %cst_310 {dimension_numbers = #tpu.dot_dimension_numbers<[1], [0], [0], [1], [0, 0, 1, 1], [], []>} : vector<1x128xf32>, vector<128x128xf32>, vector<1x128xf32> -> vector<1x128xf32>
    %359 = arith.addf %357, %358 : vector<1x128xf32>
    %360 = arith.addf %359, %326 : vector<1x128xf32>
    %cst_311 = arith.constant 0.000000e+00 : f32
    %361 = vector.broadcast %cst_311 : f32 to vector<1x128xf32>
    %362 = arith.maximumf %360, %361 : vector<1x128xf32>
    %c0_312 = arith.constant 0 : index
    %c2_313 = arith.constant 2 : index
    %c0_314 = arith.constant 0 : index
    %363 = vector.load %arg11[%c0_312, %c2_313, %c0_314] : memref<1x4x128xf32, #tpu.memory_space<vmem>>, vector<1x1x128xf32>
    %364 = vector.shape_cast %363 : vector<1x1x128xf32> to vector<1x128xf32>
    %365 = vector.shape_cast %362 : vector<1x128xf32> to vector<1x1x128xf32>
    tpu.vector_store %arg11[%c0_312, %c2_313, %c0_314], %365 {strides = array<i32>} : memref<1x4x128xf32, #tpu.memory_space<vmem>>, vector<1x1x128xf32>,
    %c0_315 = arith.constant 0 : index
    %c6_316 = arith.constant 6 : index
    %c0_317 = arith.constant 0 : index
    %366 = vector.load %arg10[%c0_315, %c6_316, %c0_317] : memref<1x8x128xf32, #tpu.memory_space<vmem>>, vector<1x1x128xf32>
    %367 = vector.shape_cast %366 : vector<1x1x128xf32> to vector<1x128xf32>
    %c0_318 = arith.constant 0 : index
    %c7_319 = arith.constant 7 : index
    %c0_320 = arith.constant 0 : index
    %368 = vector.load %arg10[%c0_318, %c7_319, %c0_320] : memref<1x8x128xf32, #tpu.memory_space<vmem>>, vector<1x1x128xf32>
    %369 = vector.shape_cast %368 : vector<1x1x128xf32> to vector<1x128xf32>
    %cst_321 = arith.constant dense<0.000000e+00> : vector<1x128xf32>
    %370 = tpu.matmul %367, %323, %cst_321 {dimension_numbers = #tpu.dot_dimension_numbers<[1], [0], [0], [1], [0, 0, 1, 1], [], []>} : vector<1x128xf32>, vector<128x128xf32>, vector<1x128xf32> -> vector<1x128xf32>
    %cst_322 = arith.constant dense<0.000000e+00> : vector<1x128xf32>
    %371 = tpu.matmul %369, %325, %cst_322 {dimension_numbers = #tpu.dot_dimension_numbers<[1], [0], [0], [1], [0, 0, 1, 1], [], []>} : vector<1x128xf32>, vector<128x128xf32>, vector<1x128xf32> -> vector<1x128xf32>
    %372 = arith.addf %370, %371 : vector<1x128xf32>
    %373 = arith.addf %372, %326 : vector<1x128xf32>
    %cst_323 = arith.constant 0.000000e+00 : f32
    %374 = vector.broadcast %cst_323 : f32 to vector<1x128xf32>
    %375 = arith.maximumf %373, %374 : vector<1x128xf32>
    %c0_324 = arith.constant 0 : index
    %c3_325 = arith.constant 3 : index
    %c0_326 = arith.constant 0 : index
    %376 = vector.load %arg11[%c0_324, %c3_325, %c0_326] : memref<1x4x128xf32, #tpu.memory_space<vmem>>, vector<1x1x128xf32>
    %377 = vector.shape_cast %376 : vector<1x1x128xf32> to vector<1x128xf32>
    %378 = vector.shape_cast %375 : vector<1x128xf32> to vector<1x1x128xf32>
    tpu.vector_store %arg11[%c0_324, %c3_325, %c0_326], %378 {strides = array<i32>} : memref<1x4x128xf32, #tpu.memory_space<vmem>>, vector<1x1x128xf32>,
    %c0_327 = arith.constant 0 : index
    %c0_328 = arith.constant 0 : index
    %c0_329 = arith.constant 0 : index
    %c0_330 = arith.constant 0 : index
    %379 = vector.load %arg2[%c0_327, %c0_328, %c0_329, %c0_330] : memref<1x32x4x8xf32, #tpu.memory_space<vmem>>, vector<1x1x4x1xf32>
    %380 = vector.shape_cast %379 : vector<1x1x4x1xf32> to vector<4x1xf32>
    %c0_331 = arith.constant 0 : index
    %c0_332 = arith.constant 0 : index
    %c0_333 = arith.constant 0 : index
    %c0_334 = arith.constant 0 : index
    %381 = vector.load %arg12[%c0_331, %c0_332, %c0_333, %c0_334] : memref<1x16x4x4xf32, #tpu.memory_space<vmem>>, vector<1x1x4x1xf32>
    %382 = vector.shape_cast %381 : vector<1x1x4x1xf32> to vector<4x1xf32>
    %383 = vector.shape_cast %380 : vector<4x1xf32> to vector<1x1x4x1xf32>
    tpu.vector_store %arg12[%c0_331, %c0_332, %c0_333, %c0_334], %383 {strides = array<i32>} : memref<1x16x4x4xf32, #tpu.memory_space<vmem>>, vector<1x1x4x1xf32>,
    %c0_335 = arith.constant 0 : index
    %c0_336 = arith.constant 0 : index
    %c0_337 = arith.constant 0 : index
    %c2_338 = arith.constant 2 : index
    %384 = vector.load %arg2[%c0_335, %c0_336, %c0_337, %c2_338] : memref<1x32x4x8xf32, #tpu.memory_space<vmem>>, vector<1x1x4x1xf32>
    %385 = vector.shape_cast %384 : vector<1x1x4x1xf32> to vector<4x1xf32>
    %c0_339 = arith.constant 0 : index
    %c0_340 = arith.constant 0 : index
    %c0_341 = arith.constant 0 : index
    %c1_342 = arith.constant 1 : index
    %386 = vector.load %arg12[%c0_339, %c0_340, %c0_341, %c1_342] : memref<1x16x4x4xf32, #tpu.memory_space<vmem>>, vector<1x1x4x1xf32>
    %387 = vector.shape_cast %386 : vector<1x1x4x1xf32> to vector<4x1xf32>
    %388 = vector.shape_cast %385 : vector<4x1xf32> to vector<1x1x4x1xf32>
    tpu.vector_store %arg12[%c0_339, %c0_340, %c0_341, %c1_342], %388 {strides = array<i32>} : memref<1x16x4x4xf32, #tpu.memory_space<vmem>>, vector<1x1x4x1xf32>,
    %c0_343 = arith.constant 0 : index
    %c0_344 = arith.constant 0 : index
    %c0_345 = arith.constant 0 : index
    %c4_346 = arith.constant 4 : index
    %389 = vector.load %arg2[%c0_343, %c0_344, %c0_345, %c4_346] : memref<1x32x4x8xf32, #tpu.memory_space<vmem>>, vector<1x1x4x1xf32>
    %390 = vector.shape_cast %389 : vector<1x1x4x1xf32> to vector<4x1xf32>
    %c0_347 = arith.constant 0 : index
    %c0_348 = arith.constant 0 : index
    %c0_349 = arith.constant 0 : index
    %c2_350 = arith.constant 2 : index
    %391 = vector.load %arg12[%c0_347, %c0_348, %c0_349, %c2_350] : memref<1x16x4x4xf32, #tpu.memory_space<vmem>>, vector<1x1x4x1xf32>
    %392 = vector.shape_cast %391 : vector<1x1x4x1xf32> to vector<4x1xf32>
    %393 = vector.shape_cast %390 : vector<4x1xf32> to vector<1x1x4x1xf32>
    tpu.vector_store %arg12[%c0_347, %c0_348, %c0_349, %c2_350], %393 {strides = array<i32>} : memref<1x16x4x4xf32, #tpu.memory_space<vmem>>, vector<1x1x4x1xf32>,
    %c0_351 = arith.constant 0 : index
    %c0_352 = arith.constant 0 : index
    %c0_353 = arith.constant 0 : index
    %c6_354 = arith.constant 6 : index
    %394 = vector.load %arg2[%c0_351, %c0_352, %c0_353, %c6_354] : memref<1x32x4x8xf32, #tpu.memory_space<vmem>>, vector<1x1x4x1xf32>
    %395 = vector.shape_cast %394 : vector<1x1x4x1xf32> to vector<4x1xf32>
    %c0_355 = arith.constant 0 : index
    %c0_356 = arith.constant 0 : index
    %c0_357 = arith.constant 0 : index
    %c3_358 = arith.constant 3 : index
    %396 = vector.load %arg12[%c0_355, %c0_356, %c0_357, %c3_358] : memref<1x16x4x4xf32, #tpu.memory_space<vmem>>, vector<1x1x4x1xf32>
    %397 = vector.shape_cast %396 : vector<1x1x4x1xf32> to vector<4x1xf32>
    %398 = vector.shape_cast %395 : vector<4x1xf32> to vector<1x1x4x1xf32>
    tpu.vector_store %arg12[%c0_355, %c0_356, %c0_357, %c3_358], %398 {strides = array<i32>} : memref<1x16x4x4xf32, #tpu.memory_space<vmem>>, vector<1x1x4x1xf32>,
    %c0_359 = arith.constant 0 : index
    %c2_360 = arith.constant 2 : index
    %c0_361 = arith.constant 0 : index
    %c0_362 = arith.constant 0 : index
    %399 = vector.load %arg2[%c0_359, %c2_360, %c0_361, %c0_362] : memref<1x32x4x8xf32, #tpu.memory_space<vmem>>, vector<1x1x4x1xf32>
    %400 = vector.shape_cast %399 : vector<1x1x4x1xf32> to vector<4x1xf32>
    %c0_363 = arith.constant 0 : index
    %c1_364 = arith.constant 1 : index
    %c0_365 = arith.constant 0 : index
    %c0_366 = arith.constant 0 : index
    %401 = vector.load %arg12[%c0_363, %c1_364, %c0_365, %c0_366] : memref<1x16x4x4xf32, #tpu.memory_space<vmem>>, vector<1x1x4x1xf32>
    %402 = vector.shape_cast %401 : vector<1x1x4x1xf32> to vector<4x1xf32>
    %403 = vector.shape_cast %400 : vector<4x1xf32> to vector<1x1x4x1xf32>
    tpu.vector_store %arg12[%c0_363, %c1_364, %c0_365, %c0_366], %403 {strides = array<i32>} : memref<1x16x4x4xf32, #tpu.memory_space<vmem>>, vector<1x1x4x1xf32>,
    %c0_367 = arith.constant 0 : index
    %c2_368 = arith.constant 2 : index
    %c0_369 = arith.constant 0 : index
    %c2_370 = arith.constant 2 : index
    %404 = vector.load %arg2[%c0_367, %c2_368, %c0_369, %c2_370] : memref<1x32x4x8xf32, #tpu.memory_space<vmem>>, vector<1x1x4x1xf32>
    %405 = vector.shape_cast %404 : vector<1x1x4x1xf32> to vector<4x1xf32>
    %c0_371 = arith.constant 0 : index
    %c1_372 = arith.constant 1 : index
    %c0_373 = arith.constant 0 : index
    %c1_374 = arith.constant 1 : index
    %406 = vector.load %arg12[%c0_371, %c1_372, %c0_373, %c1_374] : memref<1x16x4x4xf32, #tpu.memory_space<vmem>>, vector<1x1x4x1xf32>
    %407 = vector.shape_cast %406 : vector<1x1x4x1xf32> to vector<4x1xf32>
    %408 = vector.shape_cast %405 : vector<4x1xf32> to vector<1x1x4x1xf32>
    tpu.vector_store %arg12[%c0_371, %c1_372, %c0_373, %c1_374], %408 {strides = array<i32>} : memref<1x16x4x4xf32, #tpu.memory_space<vmem>>, vector<1x1x4x1xf32>,
    %c0_375 = arith.constant 0 : index
    %c2_376 = arith.constant 2 : index
    %c0_377 = arith.constant 0 : index
    %c4_378 = arith.constant 4 : index
    %409 = vector.load %arg2[%c0_375, %c2_376, %c0_377, %c4_378] : memref<1x32x4x8xf32, #tpu.memory_space<vmem>>, vector<1x1x4x1xf32>
    %410 = vector.shape_cast %409 : vector<1x1x4x1xf32> to vector<4x1xf32>
    %c0_379 = arith.constant 0 : index
    %c1_380 = arith.constant 1 : index
    %c0_381 = arith.constant 0 : index
    %c2_382 = arith.constant 2 : index
    %411 = vector.load %arg12[%c0_379, %c1_380, %c0_381, %c2_382] : memref<1x16x4x4xf32, #tpu.memory_space<vmem>>, vector<1x1x4x1xf32>
    %412 = vector.shape_cast %411 : vector<1x1x4x1xf32> to vector<4x1xf32>
    %413 = vector.shape_cast %410 : vector<4x1xf32> to vector<1x1x4x1xf32>
    tpu.vector_store %arg12[%c0_379, %c1_380, %c0_381, %c2_382], %413 {strides = array<i32>} : memref<1x16x4x4xf32, #tpu.memory_space<vmem>>, vector<1x1x4x1xf32>,
    %c0_383 = arith.constant 0 : index
    %c2_384 = arith.constant 2 : index
    %c0_385 = arith.constant 0 : index
    %c6_386 = arith.constant 6 : index
    %414 = vector.load %arg2[%c0_383, %c2_384, %c0_385, %c6_386] : memref<1x32x4x8xf32, #tpu.memory_space<vmem>>, vector<1x1x4x1xf32>
    %415 = vector.shape_cast %414 : vector<1x1x4x1xf32> to vector<4x1xf32>
    %c0_387 = arith.constant 0 : index
    %c1_388 = arith.constant 1 : index
    %c0_389 = arith.constant 0 : index
    %c3_390 = arith.constant 3 : index
    %416 = vector.load %arg12[%c0_387, %c1_388, %c0_389, %c3_390] : memref<1x16x4x4xf32, #tpu.memory_space<vmem>>, vector<1x1x4x1xf32>
    %417 = vector.shape_cast %416 : vector<1x1x4x1xf32> to vector<4x1xf32>
    %418 = vector.shape_cast %415 : vector<4x1xf32> to vector<1x1x4x1xf32>
    tpu.vector_store %arg12[%c0_387, %c1_388, %c0_389, %c3_390], %418 {strides = array<i32>} : memref<1x16x4x4xf32, #tpu.memory_space<vmem>>, vector<1x1x4x1xf32>,
    %c0_391 = arith.constant 0 : index
    %c4_392 = arith.constant 4 : index
    %c0_393 = arith.constant 0 : index
    %c0_394 = arith.constant 0 : index
    %419 = vector.load %arg2[%c0_391, %c4_392, %c0_393, %c0_394] : memref<1x32x4x8xf32, #tpu.memory_space<vmem>>, vector<1x1x4x1xf32>
    %420 = vector.shape_cast %419 : vector<1x1x4x1xf32> to vector<4x1xf32>
    %c0_395 = arith.constant 0 : index
    %c2_396 = arith.constant 2 : index
    %c0_397 = arith.constant 0 : index
    %c0_398 = arith.constant 0 : index
    %421 = vector.load %arg12[%c0_395, %c2_396, %c0_397, %c0_398] : memref<1x16x4x4xf32, #tpu.memory_space<vmem>>, vector<1x1x4x1xf32>
    %422 = vector.shape_cast %421 : vector<1x1x4x1xf32> to vector<4x1xf32>
    %423 = vector.shape_cast %420 : vector<4x1xf32> to vector<1x1x4x1xf32>
    tpu.vector_store %arg12[%c0_395, %c2_396, %c0_397, %c0_398], %423 {strides = array<i32>} : memref<1x16x4x4xf32, #tpu.memory_space<vmem>>, vector<1x1x4x1xf32>,
    %c0_399 = arith.constant 0 : index
    %c4_400 = arith.constant 4 : index
    %c0_401 = arith.constant 0 : index
    %c2_402 = arith.constant 2 : index
    %424 = vector.load %arg2[%c0_399, %c4_400, %c0_401, %c2_402] : memref<1x32x4x8xf32, #tpu.memory_space<vmem>>, vector<1x1x4x1xf32>
    %425 = vector.shape_cast %424 : vector<1x1x4x1xf32> to vector<4x1xf32>
    %c0_403 = arith.constant 0 : index
    %c2_404 = arith.constant 2 : index
    %c0_405 = arith.constant 0 : index
    %c1_406 = arith.constant 1 : index
    %426 = vector.load %arg12[%c0_403, %c2_404, %c0_405, %c1_406] : memref<1x16x4x4xf32, #tpu.memory_space<vmem>>, vector<1x1x4x1xf32>
    %427 = vector.shape_cast %426 : vector<1x1x4x1xf32> to vector<4x1xf32>
    %428 = vector.shape_cast %425 : vector<4x1xf32> to vector<1x1x4x1xf32>
    tpu.vector_store %arg12[%c0_403, %c2_404, %c0_405, %c1_406], %428 {strides = array<i32>} : memref<1x16x4x4xf32, #tpu.memory_space<vmem>>, vector<1x1x4x1xf32>,
    %c0_407 = arith.constant 0 : index
    %c4_408 = arith.constant 4 : index
    %c0_409 = arith.constant 0 : index
    %c4_410 = arith.constant 4 : index
    %429 = vector.load %arg2[%c0_407, %c4_408, %c0_409, %c4_410] : memref<1x32x4x8xf32, #tpu.memory_space<vmem>>, vector<1x1x4x1xf32>
    %430 = vector.shape_cast %429 : vector<1x1x4x1xf32> to vector<4x1xf32>
    %c0_411 = arith.constant 0 : index
    %c2_412 = arith.constant 2 : index
    %c0_413 = arith.constant 0 : index
    %c2_414 = arith.constant 2 : index
    %431 = vector.load %arg12[%c0_411, %c2_412, %c0_413, %c2_414] : memref<1x16x4x4xf32, #tpu.memory_space<vmem>>, vector<1x1x4x1xf32>
    %432 = vector.shape_cast %431 : vector<1x1x4x1xf32> to vector<4x1xf32>
    %433 = vector.shape_cast %430 : vector<4x1xf32> to vector<1x1x4x1xf32>
    tpu.vector_store %arg12[%c0_411, %c2_412, %c0_413, %c2_414], %433 {strides = array<i32>} : memref<1x16x4x4xf32, #tpu.memory_space<vmem>>, vector<1x1x4x1xf32>,
    %c0_415 = arith.constant 0 : index
    %c4_416 = arith.constant 4 : index
    %c0_417 = arith.constant 0 : index
    %c6_418 = arith.constant 6 : index
    %434 = vector.load %arg2[%c0_415, %c4_416, %c0_417, %c6_418] : memref<1x32x4x8xf32, #tpu.memory_space<vmem>>, vector<1x1x4x1xf32>
    %435 = vector.shape_cast %434 : vector<1x1x4x1xf32> to vector<4x1xf32>
    %c0_419 = arith.constant 0 : index
    %c2_420 = arith.constant 2 : index
    %c0_421 = arith.constant 0 : index
    %c3_422 = arith.constant 3 : index
    %436 = vector.load %arg12[%c0_419, %c2_420, %c0_421, %c3_422] : memref<1x16x4x4xf32, #tpu.memory_space<vmem>>, vector<1x1x4x1xf32>
    %437 = vector.shape_cast %436 : vector<1x1x4x1xf32> to vector<4x1xf32>
    %438 = vector.shape_cast %435 : vector<4x1xf32> to vector<1x1x4x1xf32>
    tpu.vector_store %arg12[%c0_419, %c2_420, %c0_421, %c3_422], %438 {strides = array<i32>} : memref<1x16x4x4xf32, #tpu.memory_space<vmem>>, vector<1x1x4x1xf32>,
    %c0_423 = arith.constant 0 : index
    %c6_424 = arith.constant 6 : index
    %c0_425 = arith.constant 0 : index
    %c0_426 = arith.constant 0 : index
    %439 = vector.load %arg2[%c0_423, %c6_424, %c0_425, %c0_426] : memref<1x32x4x8xf32, #tpu.memory_space<vmem>>, vector<1x1x4x1xf32>
    %440 = vector.shape_cast %439 : vector<1x1x4x1xf32> to vector<4x1xf32>
    %c0_427 = arith.constant 0 : index
    %c3_428 = arith.constant 3 : index
    %c0_429 = arith.constant 0 : index
    %c0_430 = arith.constant 0 : index
    %441 = vector.load %arg12[%c0_427, %c3_428, %c0_429, %c0_430] : memref<1x16x4x4xf32, #tpu.memory_space<vmem>>, vector<1x1x4x1xf32>
    %442 = vector.shape_cast %441 : vector<1x1x4x1xf32> to vector<4x1xf32>
    %443 = vector.shape_cast %440 : vector<4x1xf32> to vector<1x1x4x1xf32>
    tpu.vector_store %arg12[%c0_427, %c3_428, %c0_429, %c0_430], %443 {strides = array<i32>} : memref<1x16x4x4xf32, #tpu.memory_space<vmem>>, vector<1x1x4x1xf32>,
    %c0_431 = arith.constant 0 : index
    %c6_432 = arith.constant 6 : index
    %c0_433 = arith.constant 0 : index
    %c2_434 = arith.constant 2 : index
    %444 = vector.load %arg2[%c0_431, %c6_432, %c0_433, %c2_434] : memref<1x32x4x8xf32, #tpu.memory_space<vmem>>, vector<1x1x4x1xf32>
    %445 = vector.shape_cast %444 : vector<1x1x4x1xf32> to vector<4x1xf32>
    %c0_435 = arith.constant 0 : index
    %c3_436 = arith.constant 3 : index
    %c0_437 = arith.constant 0 : index
    %c1_438 = arith.constant 1 : index
    %446 = vector.load %arg12[%c0_435, %c3_436, %c0_437, %c1_438] : memref<1x16x4x4xf32, #tpu.memory_space<vmem>>, vector<1x1x4x1xf32>
    %447 = vector.shape_cast %446 : vector<1x1x4x1xf32> to vector<4x1xf32>
    %448 = vector.shape_cast %445 : vector<4x1xf32> to vector<1x1x4x1xf32>
    tpu.vector_store %arg12[%c0_435, %c3_436, %c0_437, %c1_438], %448 {strides = array<i32>} : memref<1x16x4x4xf32, #tpu.memory_space<vmem>>, vector<1x1x4x1xf32>,
    %c0_439 = arith.constant 0 : index
    %c6_440 = arith.constant 6 : index
    %c0_441 = arith.constant 0 : index
    %c4_442 = arith.constant 4 : index
    %449 = vector.load %arg2[%c0_439, %c6_440, %c0_441, %c4_442] : memref<1x32x4x8xf32, #tpu.memory_space<vmem>>, vector<1x1x4x1xf32>
    %450 = vector.shape_cast %449 : vector<1x1x4x1xf32> to vector<4x1xf32>
    %c0_443 = arith.constant 0 : index
    %c3_444 = arith.constant 3 : index
    %c0_445 = arith.constant 0 : index
    %c2_446 = arith.constant 2 : index
    %451 = vector.load %arg12[%c0_443, %c3_444, %c0_445, %c2_446] : memref<1x16x4x4xf32, #tpu.memory_space<vmem>>, vector<1x1x4x1xf32>
    %452 = vector.shape_cast %451 : vector<1x1x4x1xf32> to vector<4x1xf32>
    %453 = vector.shape_cast %450 : vector<4x1xf32> to vector<1x1x4x1xf32>
    tpu.vector_store %arg12[%c0_443, %c3_444, %c0_445, %c2_446], %453 {strides = array<i32>} : memref<1x16x4x4xf32, #tpu.memory_space<vmem>>, vector<1x1x4x1xf32>,
    %c0_447 = arith.constant 0 : index
    %c6_448 = arith.constant 6 : index
    %c0_449 = arith.constant 0 : index
    %c6_450 = arith.constant 6 : index
    %454 = vector.load %arg2[%c0_447, %c6_448, %c0_449, %c6_450] : memref<1x32x4x8xf32, #tpu.memory_space<vmem>>, vector<1x1x4x1xf32>
    %455 = vector.shape_cast %454 : vector<1x1x4x1xf32> to vector<4x1xf32>
    %c0_451 = arith.constant 0 : index
    %c3_452 = arith.constant 3 : index
    %c0_453 = arith.constant 0 : index
    %c3_454 = arith.constant 3 : index
    %456 = vector.load %arg12[%c0_451, %c3_452, %c0_453, %c3_454] : memref<1x16x4x4xf32, #tpu.memory_space<vmem>>, vector<1x1x4x1xf32>
    %457 = vector.shape_cast %456 : vector<1x1x4x1xf32> to vector<4x1xf32>
    %458 = vector.shape_cast %455 : vector<4x1xf32> to vector<1x1x4x1xf32>
    tpu.vector_store %arg12[%c0_451, %c3_452, %c0_453, %c3_454], %458 {strides = array<i32>} : memref<1x16x4x4xf32, #tpu.memory_space<vmem>>, vector<1x1x4x1xf32>,
    %c0_455 = arith.constant 0 : index
    %c8_456 = arith.constant 8 : index
    %c0_457 = arith.constant 0 : index
    %c0_458 = arith.constant 0 : index
    %459 = vector.load %arg2[%c0_455, %c8_456, %c0_457, %c0_458] : memref<1x32x4x8xf32, #tpu.memory_space<vmem>>, vector<1x1x4x1xf32>
    %460 = vector.shape_cast %459 : vector<1x1x4x1xf32> to vector<4x1xf32>
    %c0_459 = arith.constant 0 : index
    %c4_460 = arith.constant 4 : index
    %c0_461 = arith.constant 0 : index
    %c0_462 = arith.constant 0 : index
    %461 = vector.load %arg12[%c0_459, %c4_460, %c0_461, %c0_462] : memref<1x16x4x4xf32, #tpu.memory_space<vmem>>, vector<1x1x4x1xf32>
    %462 = vector.shape_cast %461 : vector<1x1x4x1xf32> to vector<4x1xf32>
    %463 = vector.shape_cast %460 : vector<4x1xf32> to vector<1x1x4x1xf32>
    tpu.vector_store %arg12[%c0_459, %c4_460, %c0_461, %c0_462], %463 {strides = array<i32>} : memref<1x16x4x4xf32, #tpu.memory_space<vmem>>, vector<1x1x4x1xf32>,
    %c0_463 = arith.constant 0 : index
    %c8_464 = arith.constant 8 : index
    %c0_465 = arith.constant 0 : index
    %c2_466 = arith.constant 2 : index
    %464 = vector.load %arg2[%c0_463, %c8_464, %c0_465, %c2_466] : memref<1x32x4x8xf32, #tpu.memory_space<vmem>>, vector<1x1x4x1xf32>
    %465 = vector.shape_cast %464 : vector<1x1x4x1xf32> to vector<4x1xf32>
    %c0_467 = arith.constant 0 : index
    %c4_468 = arith.constant 4 : index
    %c0_469 = arith.constant 0 : index
    %c1_470 = arith.constant 1 : index
    %466 = vector.load %arg12[%c0_467, %c4_468, %c0_469, %c1_470] : memref<1x16x4x4xf32, #tpu.memory_space<vmem>>, vector<1x1x4x1xf32>
    %467 = vector.shape_cast %466 : vector<1x1x4x1xf32> to vector<4x1xf32>
    %468 = vector.shape_cast %465 : vector<4x1xf32> to vector<1x1x4x1xf32>
    tpu.vector_store %arg12[%c0_467, %c4_468, %c0_469, %c1_470], %468 {strides = array<i32>} : memref<1x16x4x4xf32, #tpu.memory_space<vmem>>, vector<1x1x4x1xf32>,
    %c0_471 = arith.constant 0 : index
    %c8_472 = arith.constant 8 : index
    %c0_473 = arith.constant 0 : index
    %c4_474 = arith.constant 4 : index
    %469 = vector.load %arg2[%c0_471, %c8_472, %c0_473, %c4_474] : memref<1x32x4x8xf32, #tpu.memory_space<vmem>>, vector<1x1x4x1xf32>
    %470 = vector.shape_cast %469 : vector<1x1x4x1xf32> to vector<4x1xf32>
    %c0_475 = arith.constant 0 : index
    %c4_476 = arith.constant 4 : index
    %c0_477 = arith.constant 0 : index
    %c2_478 = arith.constant 2 : index
    %471 = vector.load %arg12[%c0_475, %c4_476, %c0_477, %c2_478] : memref<1x16x4x4xf32, #tpu.memory_space<vmem>>, vector<1x1x4x1xf32>
    %472 = vector.shape_cast %471 : vector<1x1x4x1xf32> to vector<4x1xf32>
    %473 = vector.shape_cast %470 : vector<4x1xf32> to vector<1x1x4x1xf32>
    tpu.vector_store %arg12[%c0_475, %c4_476, %c0_477, %c2_478], %473 {strides = array<i32>} : memref<1x16x4x4xf32, #tpu.memory_space<vmem>>, vector<1x1x4x1xf32>,
    %c0_479 = arith.constant 0 : index
    %c8_480 = arith.constant 8 : index
    %c0_481 = arith.constant 0 : index
    %c6_482 = arith.constant 6 : index
    %474 = vector.load %arg2[%c0_479, %c8_480, %c0_481, %c6_482] : memref<1x32x4x8xf32, #tpu.memory_space<vmem>>, vector<1x1x4x1xf32>
    %475 = vector.shape_cast %474 : vector<1x1x4x1xf32> to vector<4x1xf32>
    %c0_483 = arith.constant 0 : index
    %c4_484 = arith.constant 4 : index
    %c0_485 = arith.constant 0 : index
    %c3_486 = arith.constant 3 : index
    %476 = vector.load %arg12[%c0_483, %c4_484, %c0_485, %c3_486] : memref<1x16x4x4xf32, #tpu.memory_space<vmem>>, vector<1x1x4x1xf32>
    %477 = vector.shape_cast %476 : vector<1x1x4x1xf32> to vector<4x1xf32>
    %478 = vector.shape_cast %475 : vector<4x1xf32> to vector<1x1x4x1xf32>
    tpu.vector_store %arg12[%c0_483, %c4_484, %c0_485, %c3_486], %478 {strides = array<i32>} : memref<1x16x4x4xf32, #tpu.memory_space<vmem>>, vector<1x1x4x1xf32>,
    %c0_487 = arith.constant 0 : index
    %c10_488 = arith.constant 10 : index
    %c0_489 = arith.constant 0 : index
    %c0_490 = arith.constant 0 : index
    %479 = vector.load %arg2[%c0_487, %c10_488, %c0_489, %c0_490] : memref<1x32x4x8xf32, #tpu.memory_space<vmem>>, vector<1x1x4x1xf32>
    %480 = vector.shape_cast %479 : vector<1x1x4x1xf32> to vector<4x1xf32>
    %c0_491 = arith.constant 0 : index
    %c5_492 = arith.constant 5 : index
    %c0_493 = arith.constant 0 : index
    %c0_494 = arith.constant 0 : index
    %481 = vector.load %arg12[%c0_491, %c5_492, %c0_493, %c0_494] : memref<1x16x4x4xf32, #tpu.memory_space<vmem>>, vector<1x1x4x1xf32>
    %482 = vector.shape_cast %481 : vector<1x1x4x1xf32> to vector<4x1xf32>
    %483 = vector.shape_cast %480 : vector<4x1xf32> to vector<1x1x4x1xf32>
    tpu.vector_store %arg12[%c0_491, %c5_492, %c0_493, %c0_494], %483 {strides = array<i32>} : memref<1x16x4x4xf32, #tpu.memory_space<vmem>>, vector<1x1x4x1xf32>,
    %c0_495 = arith.constant 0 : index
    %c10_496 = arith.constant 10 : index
    %c0_497 = arith.constant 0 : index
    %c2_498 = arith.constant 2 : index
    %484 = vector.load %arg2[%c0_495, %c10_496, %c0_497, %c2_498] : memref<1x32x4x8xf32, #tpu.memory_space<vmem>>, vector<1x1x4x1xf32>
    %485 = vector.shape_cast %484 : vector<1x1x4x1xf32> to vector<4x1xf32>
    %c0_499 = arith.constant 0 : index
    %c5_500 = arith.constant 5 : index
    %c0_501 = arith.constant 0 : index
    %c1_502 = arith.constant 1 : index
    %486 = vector.load %arg12[%c0_499, %c5_500, %c0_501, %c1_502] : memref<1x16x4x4xf32, #tpu.memory_space<vmem>>, vector<1x1x4x1xf32>
    %487 = vector.shape_cast %486 : vector<1x1x4x1xf32> to vector<4x1xf32>
    %488 = vector.shape_cast %485 : vector<4x1xf32> to vector<1x1x4x1xf32>
    tpu.vector_store %arg12[%c0_499, %c5_500, %c0_501, %c1_502], %488 {strides = array<i32>} : memref<1x16x4x4xf32, #tpu.memory_space<vmem>>, vector<1x1x4x1xf32>,
    %c0_503 = arith.constant 0 : index
    %c10_504 = arith.constant 10 : index
    %c0_505 = arith.constant 0 : index
    %c4_506 = arith.constant 4 : index
    %489 = vector.load %arg2[%c0_503, %c10_504, %c0_505, %c4_506] : memref<1x32x4x8xf32, #tpu.memory_space<vmem>>, vector<1x1x4x1xf32>
    %490 = vector.shape_cast %489 : vector<1x1x4x1xf32> to vector<4x1xf32>
    %c0_507 = arith.constant 0 : index
    %c5_508 = arith.constant 5 : index
    %c0_509 = arith.constant 0 : index
    %c2_510 = arith.constant 2 : index
    %491 = vector.load %arg12[%c0_507, %c5_508, %c0_509, %c2_510] : memref<1x16x4x4xf32, #tpu.memory_space<vmem>>, vector<1x1x4x1xf32>
    %492 = vector.shape_cast %491 : vector<1x1x4x1xf32> to vector<4x1xf32>
    %493 = vector.shape_cast %490 : vector<4x1xf32> to vector<1x1x4x1xf32>
    tpu.vector_store %arg12[%c0_507, %c5_508, %c0_509, %c2_510], %493 {strides = array<i32>} : memref<1x16x4x4xf32, #tpu.memory_space<vmem>>, vector<1x1x4x1xf32>,
    %c0_511 = arith.constant 0 : index
    %c10_512 = arith.constant 10 : index
    %c0_513 = arith.constant 0 : index
    %c6_514 = arith.constant 6 : index
    %494 = vector.load %arg2[%c0_511, %c10_512, %c0_513, %c6_514] : memref<1x32x4x8xf32, #tpu.memory_space<vmem>>, vector<1x1x4x1xf32>
    %495 = vector.shape_cast %494 : vector<1x1x4x1xf32> to vector<4x1xf32>
    %c0_515 = arith.constant 0 : index
    %c5_516 = arith.constant 5 : index
    %c0_517 = arith.constant 0 : index
    %c3_518 = arith.constant 3 : index
    %496 = vector.load %arg12[%c0_515, %c5_516, %c0_517, %c3_518] : memref<1x16x4x4xf32, #tpu.memory_space<vmem>>, vector<1x1x4x1xf32>
    %497 = vector.shape_cast %496 : vector<1x1x4x1xf32> to vector<4x1xf32>
    %498 = vector.shape_cast %495 : vector<4x1xf32> to vector<1x1x4x1xf32>
    tpu.vector_store %arg12[%c0_515, %c5_516, %c0_517, %c3_518], %498 {strides = array<i32>} : memref<1x16x4x4xf32, #tpu.memory_space<vmem>>, vector<1x1x4x1xf32>,
    %c0_519 = arith.constant 0 : index
    %c12_520 = arith.constant 12 : index
    %c0_521 = arith.constant 0 : index
    %c0_522 = arith.constant 0 : index
    %499 = vector.load %arg2[%c0_519, %c12_520, %c0_521, %c0_522] : memref<1x32x4x8xf32, #tpu.memory_space<vmem>>, vector<1x1x4x1xf32>
    %500 = vector.shape_cast %499 : vector<1x1x4x1xf32> to vector<4x1xf32>
    %c0_523 = arith.constant 0 : index
    %c6_524 = arith.constant 6 : index
    %c0_525 = arith.constant 0 : index
    %c0_526 = arith.constant 0 : index
    %501 = vector.load %arg12[%c0_523, %c6_524, %c0_525, %c0_526] : memref<1x16x4x4xf32, #tpu.memory_space<vmem>>, vector<1x1x4x1xf32>
    %502 = vector.shape_cast %501 : vector<1x1x4x1xf32> to vector<4x1xf32>
    %503 = vector.shape_cast %500 : vector<4x1xf32> to vector<1x1x4x1xf32>
    tpu.vector_store %arg12[%c0_523, %c6_524, %c0_525, %c0_526], %503 {strides = array<i32>} : memref<1x16x4x4xf32, #tpu.memory_space<vmem>>, vector<1x1x4x1xf32>,
    %c0_527 = arith.constant 0 : index
    %c12_528 = arith.constant 12 : index
    %c0_529 = arith.constant 0 : index
    %c2_530 = arith.constant 2 : index
    %504 = vector.load %arg2[%c0_527, %c12_528, %c0_529, %c2_530] : memref<1x32x4x8xf32, #tpu.memory_space<vmem>>, vector<1x1x4x1xf32>
    %505 = vector.shape_cast %504 : vector<1x1x4x1xf32> to vector<4x1xf32>
    %c0_531 = arith.constant 0 : index
    %c6_532 = arith.constant 6 : index
    %c0_533 = arith.constant 0 : index
    %c1_534 = arith.constant 1 : index
    %506 = vector.load %arg12[%c0_531, %c6_532, %c0_533, %c1_534] : memref<1x16x4x4xf32, #tpu.memory_space<vmem>>, vector<1x1x4x1xf32>
    %507 = vector.shape_cast %506 : vector<1x1x4x1xf32> to vector<4x1xf32>
    %508 = vector.shape_cast %505 : vector<4x1xf32> to vector<1x1x4x1xf32>
    tpu.vector_store %arg12[%c0_531, %c6_532, %c0_533, %c1_534], %508 {strides = array<i32>} : memref<1x16x4x4xf32, #tpu.memory_space<vmem>>, vector<1x1x4x1xf32>,
    %c0_535 = arith.constant 0 : index
    %c12_536 = arith.constant 12 : index
    %c0_537 = arith.constant 0 : index
    %c4_538 = arith.constant 4 : index
    %509 = vector.load %arg2[%c0_535, %c12_536, %c0_537, %c4_538] : memref<1x32x4x8xf32, #tpu.memory_space<vmem>>, vector<1x1x4x1xf32>
    %510 = vector.shape_cast %509 : vector<1x1x4x1xf32> to vector<4x1xf32>
    %c0_539 = arith.constant 0 : index
    %c6_540 = arith.constant 6 : index
    %c0_541 = arith.constant 0 : index
    %c2_542 = arith.constant 2 : index
    %511 = vector.load %arg12[%c0_539, %c6_540, %c0_541, %c2_542] : memref<1x16x4x4xf32, #tpu.memory_space<vmem>>, vector<1x1x4x1xf32>
    %512 = vector.shape_cast %511 : vector<1x1x4x1xf32> to vector<4x1xf32>
    %513 = vector.shape_cast %510 : vector<4x1xf32> to vector<1x1x4x1xf32>
    tpu.vector_store %arg12[%c0_539, %c6_540, %c0_541, %c2_542], %513 {strides = array<i32>} : memref<1x16x4x4xf32, #tpu.memory_space<vmem>>, vector<1x1x4x1xf32>,
    %c0_543 = arith.constant 0 : index
    %c12_544 = arith.constant 12 : index
    %c0_545 = arith.constant 0 : index
    %c6_546 = arith.constant 6 : index
    %514 = vector.load %arg2[%c0_543, %c12_544, %c0_545, %c6_546] : memref<1x32x4x8xf32, #tpu.memory_space<vmem>>, vector<1x1x4x1xf32>
    %515 = vector.shape_cast %514 : vector<1x1x4x1xf32> to vector<4x1xf32>
    %c0_547 = arith.constant 0 : index
    %c6_548 = arith.constant 6 : index
    %c0_549 = arith.constant 0 : index
    %c3_550 = arith.constant 3 : index
    %516 = vector.load %arg12[%c0_547, %c6_548, %c0_549, %c3_550] : memref<1x16x4x4xf32, #tpu.memory_space<vmem>>, vector<1x1x4x1xf32>
    %517 = vector.shape_cast %516 : vector<1x1x4x1xf32> to vector<4x1xf32>
    %518 = vector.shape_cast %515 : vector<4x1xf32> to vector<1x1x4x1xf32>
    tpu.vector_store %arg12[%c0_547, %c6_548, %c0_549, %c3_550], %518 {strides = array<i32>} : memref<1x16x4x4xf32, #tpu.memory_space<vmem>>, vector<1x1x4x1xf32>,
    %c0_551 = arith.constant 0 : index
    %c14_552 = arith.constant 14 : index
    %c0_553 = arith.constant 0 : index
    %c0_554 = arith.constant 0 : index
    %519 = vector.load %arg2[%c0_551, %c14_552, %c0_553, %c0_554] : memref<1x32x4x8xf32, #tpu.memory_space<vmem>>, vector<1x1x4x1xf32>
    %520 = vector.shape_cast %519 : vector<1x1x4x1xf32> to vector<4x1xf32>
    %c0_555 = arith.constant 0 : index
    %c7_556 = arith.constant 7 : index
    %c0_557 = arith.constant 0 : index
    %c0_558 = arith.constant 0 : index
    %521 = vector.load %arg12[%c0_555, %c7_556, %c0_557, %c0_558] : memref<1x16x4x4xf32, #tpu.memory_space<vmem>>, vector<1x1x4x1xf32>
    %522 = vector.shape_cast %521 : vector<1x1x4x1xf32> to vector<4x1xf32>
    %523 = vector.shape_cast %520 : vector<4x1xf32> to vector<1x1x4x1xf32>
    tpu.vector_store %arg12[%c0_555, %c7_556, %c0_557, %c0_558], %523 {strides = array<i32>} : memref<1x16x4x4xf32, #tpu.memory_space<vmem>>, vector<1x1x4x1xf32>,
    %c0_559 = arith.constant 0 : index
    %c14_560 = arith.constant 14 : index
    %c0_561 = arith.constant 0 : index
    %c2_562 = arith.constant 2 : index
    %524 = vector.load %arg2[%c0_559, %c14_560, %c0_561, %c2_562] : memref<1x32x4x8xf32, #tpu.memory_space<vmem>>, vector<1x1x4x1xf32>
    %525 = vector.shape_cast %524 : vector<1x1x4x1xf32> to vector<4x1xf32>
    %c0_563 = arith.constant 0 : index
    %c7_564 = arith.constant 7 : index
    %c0_565 = arith.constant 0 : index
    %c1_566 = arith.constant 1 : index
    %526 = vector.load %arg12[%c0_563, %c7_564, %c0_565, %c1_566] : memref<1x16x4x4xf32, #tpu.memory_space<vmem>>, vector<1x1x4x1xf32>
    %527 = vector.shape_cast %526 : vector<1x1x4x1xf32> to vector<4x1xf32>
    %528 = vector.shape_cast %525 : vector<4x1xf32> to vector<1x1x4x1xf32>
    tpu.vector_store %arg12[%c0_563, %c7_564, %c0_565, %c1_566], %528 {strides = array<i32>} : memref<1x16x4x4xf32, #tpu.memory_space<vmem>>, vector<1x1x4x1xf32>,
    %c0_567 = arith.constant 0 : index
    %c14_568 = arith.constant 14 : index
    %c0_569 = arith.constant 0 : index
    %c4_570 = arith.constant 4 : index
    %529 = vector.load %arg2[%c0_567, %c14_568, %c0_569, %c4_570] : memref<1x32x4x8xf32, #tpu.memory_space<vmem>>, vector<1x1x4x1xf32>
    %530 = vector.shape_cast %529 : vector<1x1x4x1xf32> to vector<4x1xf32>
    %c0_571 = arith.constant 0 : index
    %c7_572 = arith.constant 7 : index
    %c0_573 = arith.constant 0 : index
    %c2_574 = arith.constant 2 : index
    %531 = vector.load %arg12[%c0_571, %c7_572, %c0_573, %c2_574] : memref<1x16x4x4xf32, #tpu.memory_space<vmem>>, vector<1x1x4x1xf32>
    %532 = vector.shape_cast %531 : vector<1x1x4x1xf32> to vector<4x1xf32>
    %533 = vector.shape_cast %530 : vector<4x1xf32> to vector<1x1x4x1xf32>
    tpu.vector_store %arg12[%c0_571, %c7_572, %c0_573, %c2_574], %533 {strides = array<i32>} : memref<1x16x4x4xf32, #tpu.memory_space<vmem>>, vector<1x1x4x1xf32>,
    %c0_575 = arith.constant 0 : index
    %c14_576 = arith.constant 14 : index
    %c0_577 = arith.constant 0 : index
    %c6_578 = arith.constant 6 : index
    %534 = vector.load %arg2[%c0_575, %c14_576, %c0_577, %c6_578] : memref<1x32x4x8xf32, #tpu.memory_space<vmem>>, vector<1x1x4x1xf32>
    %535 = vector.shape_cast %534 : vector<1x1x4x1xf32> to vector<4x1xf32>
    %c0_579 = arith.constant 0 : index
    %c7_580 = arith.constant 7 : index
    %c0_581 = arith.constant 0 : index
    %c3_582 = arith.constant 3 : index
    %536 = vector.load %arg12[%c0_579, %c7_580, %c0_581, %c3_582] : memref<1x16x4x4xf32, #tpu.memory_space<vmem>>, vector<1x1x4x1xf32>
    %537 = vector.shape_cast %536 : vector<1x1x4x1xf32> to vector<4x1xf32>
    %538 = vector.shape_cast %535 : vector<4x1xf32> to vector<1x1x4x1xf32>
    tpu.vector_store %arg12[%c0_579, %c7_580, %c0_581, %c3_582], %538 {strides = array<i32>} : memref<1x16x4x4xf32, #tpu.memory_space<vmem>>, vector<1x1x4x1xf32>,
    %c0_583 = arith.constant 0 : index
    %c16_584 = arith.constant 16 : index
    %c0_585 = arith.constant 0 : index
    %c0_586 = arith.constant 0 : index
    %539 = vector.load %arg2[%c0_583, %c16_584, %c0_585, %c0_586] : memref<1x32x4x8xf32, #tpu.memory_space<vmem>>, vector<1x1x4x1xf32>
    %540 = vector.shape_cast %539 : vector<1x1x4x1xf32> to vector<4x1xf32>
    %c0_587 = arith.constant 0 : index
    %c8_588 = arith.constant 8 : index
    %c0_589 = arith.constant 0 : index
    %c0_590 = arith.constant 0 : index
    %541 = vector.load %arg12[%c0_587, %c8_588, %c0_589, %c0_590] : memref<1x16x4x4xf32, #tpu.memory_space<vmem>>, vector<1x1x4x1xf32>
    %542 = vector.shape_cast %541 : vector<1x1x4x1xf32> to vector<4x1xf32>
    %543 = vector.shape_cast %540 : vector<4x1xf32> to vector<1x1x4x1xf32>
    tpu.vector_store %arg12[%c0_587, %c8_588, %c0_589, %c0_590], %543 {strides = array<i32>} : memref<1x16x4x4xf32, #tpu.memory_space<vmem>>, vector<1x1x4x1xf32>,
    %c0_591 = arith.constant 0 : index
    %c16_592 = arith.constant 16 : index
    %c0_593 = arith.constant 0 : index
    %c2_594 = arith.constant 2 : index
    %544 = vector.load %arg2[%c0_591, %c16_592, %c0_593, %c2_594] : memref<1x32x4x8xf32, #tpu.memory_space<vmem>>, vector<1x1x4x1xf32>
    %545 = vector.shape_cast %544 : vector<1x1x4x1xf32> to vector<4x1xf32>
    %c0_595 = arith.constant 0 : index
    %c8_596 = arith.constant 8 : index
    %c0_597 = arith.constant 0 : index
    %c1_598 = arith.constant 1 : index
    %546 = vector.load %arg12[%c0_595, %c8_596, %c0_597, %c1_598] : memref<1x16x4x4xf32, #tpu.memory_space<vmem>>, vector<1x1x4x1xf32>
    %547 = vector.shape_cast %546 : vector<1x1x4x1xf32> to vector<4x1xf32>
    %548 = vector.shape_cast %545 : vector<4x1xf32> to vector<1x1x4x1xf32>
    tpu.vector_store %arg12[%c0_595, %c8_596, %c0_597, %c1_598], %548 {strides = array<i32>} : memref<1x16x4x4xf32, #tpu.memory_space<vmem>>, vector<1x1x4x1xf32>,
    %c0_599 = arith.constant 0 : index
    %c16_600 = arith.constant 16 : index
    %c0_601 = arith.constant 0 : index
    %c4_602 = arith.constant 4 : index
    %549 = vector.load %arg2[%c0_599, %c16_600, %c0_601, %c4_602] : memref<1x32x4x8xf32, #tpu.memory_space<vmem>>, vector<1x1x4x1xf32>
    %550 = vector.shape_cast %549 : vector<1x1x4x1xf32> to vector<4x1xf32>
    %c0_603 = arith.constant 0 : index
    %c8_604 = arith.constant 8 : index
    %c0_605 = arith.constant 0 : index
    %c2_606 = arith.constant 2 : index
    %551 = vector.load %arg12[%c0_603, %c8_604, %c0_605, %c2_606] : memref<1x16x4x4xf32, #tpu.memory_space<vmem>>, vector<1x1x4x1xf32>
    %552 = vector.shape_cast %551 : vector<1x1x4x1xf32> to vector<4x1xf32>
    %553 = vector.shape_cast %550 : vector<4x1xf32> to vector<1x1x4x1xf32>
    tpu.vector_store %arg12[%c0_603, %c8_604, %c0_605, %c2_606], %553 {strides = array<i32>} : memref<1x16x4x4xf32, #tpu.memory_space<vmem>>, vector<1x1x4x1xf32>,
    %c0_607 = arith.constant 0 : index
    %c16_608 = arith.constant 16 : index
    %c0_609 = arith.constant 0 : index
    %c6_610 = arith.constant 6 : index
    %554 = vector.load %arg2[%c0_607, %c16_608, %c0_609, %c6_610] : memref<1x32x4x8xf32, #tpu.memory_space<vmem>>, vector<1x1x4x1xf32>
    %555 = vector.shape_cast %554 : vector<1x1x4x1xf32> to vector<4x1xf32>
    %c0_611 = arith.constant 0 : index
    %c8_612 = arith.constant 8 : index
    %c0_613 = arith.constant 0 : index
    %c3_614 = arith.constant 3 : index
    %556 = vector.load %arg12[%c0_611, %c8_612, %c0_613, %c3_614] : memref<1x16x4x4xf32, #tpu.memory_space<vmem>>, vector<1x1x4x1xf32>
    %557 = vector.shape_cast %556 : vector<1x1x4x1xf32> to vector<4x1xf32>
    %558 = vector.shape_cast %555 : vector<4x1xf32> to vector<1x1x4x1xf32>
    tpu.vector_store %arg12[%c0_611, %c8_612, %c0_613, %c3_614], %558 {strides = array<i32>} : memref<1x16x4x4xf32, #tpu.memory_space<vmem>>, vector<1x1x4x1xf32>,
    %c0_615 = arith.constant 0 : index
    %c18_616 = arith.constant 18 : index
    %c0_617 = arith.constant 0 : index
    %c0_618 = arith.constant 0 : index
    %559 = vector.load %arg2[%c0_615, %c18_616, %c0_617, %c0_618] : memref<1x32x4x8xf32, #tpu.memory_space<vmem>>, vector<1x1x4x1xf32>
    %560 = vector.shape_cast %559 : vector<1x1x4x1xf32> to vector<4x1xf32>
    %c0_619 = arith.constant 0 : index
    %c9_620 = arith.constant 9 : index
    %c0_621 = arith.constant 0 : index
    %c0_622 = arith.constant 0 : index
    %561 = vector.load %arg12[%c0_619, %c9_620, %c0_621, %c0_622] : memref<1x16x4x4xf32, #tpu.memory_space<vmem>>, vector<1x1x4x1xf32>
    %562 = vector.shape_cast %561 : vector<1x1x4x1xf32> to vector<4x1xf32>
    %563 = vector.shape_cast %560 : vector<4x1xf32> to vector<1x1x4x1xf32>
    tpu.vector_store %arg12[%c0_619, %c9_620, %c0_621, %c0_622], %563 {strides = array<i32>} : memref<1x16x4x4xf32, #tpu.memory_space<vmem>>, vector<1x1x4x1xf32>,
    %c0_623 = arith.constant 0 : index
    %c18_624 = arith.constant 18 : index
    %c0_625 = arith.constant 0 : index
    %c2_626 = arith.constant 2 : index
    %564 = vector.load %arg2[%c0_623, %c18_624, %c0_625, %c2_626] : memref<1x32x4x8xf32, #tpu.memory_space<vmem>>, vector<1x1x4x1xf32>
    %565 = vector.shape_cast %564 : vector<1x1x4x1xf32> to vector<4x1xf32>
    %c0_627 = arith.constant 0 : index
    %c9_628 = arith.constant 9 : index
    %c0_629 = arith.constant 0 : index
    %c1_630 = arith.constant 1 : index
    %566 = vector.load %arg12[%c0_627, %c9_628, %c0_629, %c1_630] : memref<1x16x4x4xf32, #tpu.memory_space<vmem>>, vector<1x1x4x1xf32>
    %567 = vector.shape_cast %566 : vector<1x1x4x1xf32> to vector<4x1xf32>
    %568 = vector.shape_cast %565 : vector<4x1xf32> to vector<1x1x4x1xf32>
    tpu.vector_store %arg12[%c0_627, %c9_628, %c0_629, %c1_630], %568 {strides = array<i32>} : memref<1x16x4x4xf32, #tpu.memory_space<vmem>>, vector<1x1x4x1xf32>,
    %c0_631 = arith.constant 0 : index
    %c18_632 = arith.constant 18 : index
    %c0_633 = arith.constant 0 : index
    %c4_634 = arith.constant 4 : index
    %569 = vector.load %arg2[%c0_631, %c18_632, %c0_633, %c4_634] : memref<1x32x4x8xf32, #tpu.memory_space<vmem>>, vector<1x1x4x1xf32>
    %570 = vector.shape_cast %569 : vector<1x1x4x1xf32> to vector<4x1xf32>
    %c0_635 = arith.constant 0 : index
    %c9_636 = arith.constant 9 : index
    %c0_637 = arith.constant 0 : index
    %c2_638 = arith.constant 2 : index
    %571 = vector.load %arg12[%c0_635, %c9_636, %c0_637, %c2_638] : memref<1x16x4x4xf32, #tpu.memory_space<vmem>>, vector<1x1x4x1xf32>
    %572 = vector.shape_cast %571 : vector<1x1x4x1xf32> to vector<4x1xf32>
    %573 = vector.shape_cast %570 : vector<4x1xf32> to vector<1x1x4x1xf32>
    tpu.vector_store %arg12[%c0_635, %c9_636, %c0_637, %c2_638], %573 {strides = array<i32>} : memref<1x16x4x4xf32, #tpu.memory_space<vmem>>, vector<1x1x4x1xf32>,
    %c0_639 = arith.constant 0 : index
    %c18_640 = arith.constant 18 : index
    %c0_641 = arith.constant 0 : index
    %c6_642 = arith.constant 6 : index
    %574 = vector.load %arg2[%c0_639, %c18_640, %c0_641, %c6_642] : memref<1x32x4x8xf32, #tpu.memory_space<vmem>>, vector<1x1x4x1xf32>
    %575 = vector.shape_cast %574 : vector<1x1x4x1xf32> to vector<4x1xf32>
    %c0_643 = arith.constant 0 : index
    %c9_644 = arith.constant 9 : index
    %c0_645 = arith.constant 0 : index
    %c3_646 = arith.constant 3 : index
    %576 = vector.load %arg12[%c0_643, %c9_644, %c0_645, %c3_646] : memref<1x16x4x4xf32, #tpu.memory_space<vmem>>, vector<1x1x4x1xf32>
    %577 = vector.shape_cast %576 : vector<1x1x4x1xf32> to vector<4x1xf32>
    %578 = vector.shape_cast %575 : vector<4x1xf32> to vector<1x1x4x1xf32>
    tpu.vector_store %arg12[%c0_643, %c9_644, %c0_645, %c3_646], %578 {strides = array<i32>} : memref<1x16x4x4xf32, #tpu.memory_space<vmem>>, vector<1x1x4x1xf32>,
    %c0_647 = arith.constant 0 : index
    %c20_648 = arith.constant 20 : index
    %c0_649 = arith.constant 0 : index
    %c0_650 = arith.constant 0 : index
    %579 = vector.load %arg2[%c0_647, %c20_648, %c0_649, %c0_650] : memref<1x32x4x8xf32, #tpu.memory_space<vmem>>, vector<1x1x4x1xf32>
    %580 = vector.shape_cast %579 : vector<1x1x4x1xf32> to vector<4x1xf32>
    %c0_651 = arith.constant 0 : index
    %c10_652 = arith.constant 10 : index
    %c0_653 = arith.constant 0 : index
    %c0_654 = arith.constant 0 : index
    %581 = vector.load %arg12[%c0_651, %c10_652, %c0_653, %c0_654] : memref<1x16x4x4xf32, #tpu.memory_space<vmem>>, vector<1x1x4x1xf32>
    %582 = vector.shape_cast %581 : vector<1x1x4x1xf32> to vector<4x1xf32>
    %583 = vector.shape_cast %580 : vector<4x1xf32> to vector<1x1x4x1xf32>
    tpu.vector_store %arg12[%c0_651, %c10_652, %c0_653, %c0_654], %583 {strides = array<i32>} : memref<1x16x4x4xf32, #tpu.memory_space<vmem>>, vector<1x1x4x1xf32>,
    %c0_655 = arith.constant 0 : index
    %c20_656 = arith.constant 20 : index
    %c0_657 = arith.constant 0 : index
    %c2_658 = arith.constant 2 : index
    %584 = vector.load %arg2[%c0_655, %c20_656, %c0_657, %c2_658] : memref<1x32x4x8xf32, #tpu.memory_space<vmem>>, vector<1x1x4x1xf32>
    %585 = vector.shape_cast %584 : vector<1x1x4x1xf32> to vector<4x1xf32>
    %c0_659 = arith.constant 0 : index
    %c10_660 = arith.constant 10 : index
    %c0_661 = arith.constant 0 : index
    %c1_662 = arith.constant 1 : index
    %586 = vector.load %arg12[%c0_659, %c10_660, %c0_661, %c1_662] : memref<1x16x4x4xf32, #tpu.memory_space<vmem>>, vector<1x1x4x1xf32>
    %587 = vector.shape_cast %586 : vector<1x1x4x1xf32> to vector<4x1xf32>
    %588 = vector.shape_cast %585 : vector<4x1xf32> to vector<1x1x4x1xf32>
    tpu.vector_store %arg12[%c0_659, %c10_660, %c0_661, %c1_662], %588 {strides = array<i32>} : memref<1x16x4x4xf32, #tpu.memory_space<vmem>>, vector<1x1x4x1xf32>,
    %c0_663 = arith.constant 0 : index
    %c20_664 = arith.constant 20 : index
    %c0_665 = arith.constant 0 : index
    %c4_666 = arith.constant 4 : index
    %589 = vector.load %arg2[%c0_663, %c20_664, %c0_665, %c4_666] : memref<1x32x4x8xf32, #tpu.memory_space<vmem>>, vector<1x1x4x1xf32>
    %590 = vector.shape_cast %589 : vector<1x1x4x1xf32> to vector<4x1xf32>
    %c0_667 = arith.constant 0 : index
    %c10_668 = arith.constant 10 : index
    %c0_669 = arith.constant 0 : index
    %c2_670 = arith.constant 2 : index
    %591 = vector.load %arg12[%c0_667, %c10_668, %c0_669, %c2_670] : memref<1x16x4x4xf32, #tpu.memory_space<vmem>>, vector<1x1x4x1xf32>
    %592 = vector.shape_cast %591 : vector<1x1x4x1xf32> to vector<4x1xf32>
    %593 = vector.shape_cast %590 : vector<4x1xf32> to vector<1x1x4x1xf32>
    tpu.vector_store %arg12[%c0_667, %c10_668, %c0_669, %c2_670], %593 {strides = array<i32>} : memref<1x16x4x4xf32, #tpu.memory_space<vmem>>, vector<1x1x4x1xf32>,
    %c0_671 = arith.constant 0 : index
    %c20_672 = arith.constant 20 : index
    %c0_673 = arith.constant 0 : index
    %c6_674 = arith.constant 6 : index
    %594 = vector.load %arg2[%c0_671, %c20_672, %c0_673, %c6_674] : memref<1x32x4x8xf32, #tpu.memory_space<vmem>>, vector<1x1x4x1xf32>
    %595 = vector.shape_cast %594 : vector<1x1x4x1xf32> to vector<4x1xf32>
    %c0_675 = arith.constant 0 : index
    %c10_676 = arith.constant 10 : index
    %c0_677 = arith.constant 0 : index
    %c3_678 = arith.constant 3 : index
    %596 = vector.load %arg12[%c0_675, %c10_676, %c0_677, %c3_678] : memref<1x16x4x4xf32, #tpu.memory_space<vmem>>, vector<1x1x4x1xf32>
    %597 = vector.shape_cast %596 : vector<1x1x4x1xf32> to vector<4x1xf32>
    %598 = vector.shape_cast %595 : vector<4x1xf32> to vector<1x1x4x1xf32>
    tpu.vector_store %arg12[%c0_675, %c10_676, %c0_677, %c3_678], %598 {strides = array<i32>} : memref<1x16x4x4xf32, #tpu.memory_space<vmem>>, vector<1x1x4x1xf32>,
    %c0_679 = arith.constant 0 : index
    %c22_680 = arith.constant 22 : index
    %c0_681 = arith.constant 0 : index
    %c0_682 = arith.constant 0 : index
    %599 = vector.load %arg2[%c0_679, %c22_680, %c0_681, %c0_682] : memref<1x32x4x8xf32, #tpu.memory_space<vmem>>, vector<1x1x4x1xf32>
    %600 = vector.shape_cast %599 : vector<1x1x4x1xf32> to vector<4x1xf32>
    %c0_683 = arith.constant 0 : index
    %c11_684 = arith.constant 11 : index
    %c0_685 = arith.constant 0 : index
    %c0_686 = arith.constant 0 : index
    %601 = vector.load %arg12[%c0_683, %c11_684, %c0_685, %c0_686] : memref<1x16x4x4xf32, #tpu.memory_space<vmem>>, vector<1x1x4x1xf32>
    %602 = vector.shape_cast %601 : vector<1x1x4x1xf32> to vector<4x1xf32>
    %603 = vector.shape_cast %600 : vector<4x1xf32> to vector<1x1x4x1xf32>
    tpu.vector_store %arg12[%c0_683, %c11_684, %c0_685, %c0_686], %603 {strides = array<i32>} : memref<1x16x4x4xf32, #tpu.memory_space<vmem>>, vector<1x1x4x1xf32>,
    %c0_687 = arith.constant 0 : index
    %c22_688 = arith.constant 22 : index
    %c0_689 = arith.constant 0 : index
    %c2_690 = arith.constant 2 : index
    %604 = vector.load %arg2[%c0_687, %c22_688, %c0_689, %c2_690] : memref<1x32x4x8xf32, #tpu.memory_space<vmem>>, vector<1x1x4x1xf32>
    %605 = vector.shape_cast %604 : vector<1x1x4x1xf32> to vector<4x1xf32>
    %c0_691 = arith.constant 0 : index
    %c11_692 = arith.constant 11 : index
    %c0_693 = arith.constant 0 : index
    %c1_694 = arith.constant 1 : index
    %606 = vector.load %arg12[%c0_691, %c11_692, %c0_693, %c1_694] : memref<1x16x4x4xf32, #tpu.memory_space<vmem>>, vector<1x1x4x1xf32>
    %607 = vector.shape_cast %606 : vector<1x1x4x1xf32> to vector<4x1xf32>
    %608 = vector.shape_cast %605 : vector<4x1xf32> to vector<1x1x4x1xf32>
    tpu.vector_store %arg12[%c0_691, %c11_692, %c0_693, %c1_694], %608 {strides = array<i32>} : memref<1x16x4x4xf32, #tpu.memory_space<vmem>>, vector<1x1x4x1xf32>,
    %c0_695 = arith.constant 0 : index
    %c22_696 = arith.constant 22 : index
    %c0_697 = arith.constant 0 : index
    %c4_698 = arith.constant 4 : index
    %609 = vector.load %arg2[%c0_695, %c22_696, %c0_697, %c4_698] : memref<1x32x4x8xf32, #tpu.memory_space<vmem>>, vector<1x1x4x1xf32>
    %610 = vector.shape_cast %609 : vector<1x1x4x1xf32> to vector<4x1xf32>
    %c0_699 = arith.constant 0 : index
    %c11_700 = arith.constant 11 : index
    %c0_701 = arith.constant 0 : index
    %c2_702 = arith.constant 2 : index
    %611 = vector.load %arg12[%c0_699, %c11_700, %c0_701, %c2_702] : memref<1x16x4x4xf32, #tpu.memory_space<vmem>>, vector<1x1x4x1xf32>
    %612 = vector.shape_cast %611 : vector<1x1x4x1xf32> to vector<4x1xf32>
    %613 = vector.shape_cast %610 : vector<4x1xf32> to vector<1x1x4x1xf32>
    tpu.vector_store %arg12[%c0_699, %c11_700, %c0_701, %c2_702], %613 {strides = array<i32>} : memref<1x16x4x4xf32, #tpu.memory_space<vmem>>, vector<1x1x4x1xf32>,
    %c0_703 = arith.constant 0 : index
    %c22_704 = arith.constant 22 : index
    %c0_705 = arith.constant 0 : index
    %c6_706 = arith.constant 6 : index
    %614 = vector.load %arg2[%c0_703, %c22_704, %c0_705, %c6_706] : memref<1x32x4x8xf32, #tpu.memory_space<vmem>>, vector<1x1x4x1xf32>
    %615 = vector.shape_cast %614 : vector<1x1x4x1xf32> to vector<4x1xf32>
    %c0_707 = arith.constant 0 : index
    %c11_708 = arith.constant 11 : index
    %c0_709 = arith.constant 0 : index
    %c3_710 = arith.constant 3 : index
    %616 = vector.load %arg12[%c0_707, %c11_708, %c0_709, %c3_710] : memref<1x16x4x4xf32, #tpu.memory_space<vmem>>, vector<1x1x4x1xf32>
    %617 = vector.shape_cast %616 : vector<1x1x4x1xf32> to vector<4x1xf32>
    %618 = vector.shape_cast %615 : vector<4x1xf32> to vector<1x1x4x1xf32>
    tpu.vector_store %arg12[%c0_707, %c11_708, %c0_709, %c3_710], %618 {strides = array<i32>} : memref<1x16x4x4xf32, #tpu.memory_space<vmem>>, vector<1x1x4x1xf32>,
    %c0_711 = arith.constant 0 : index
    %c24_712 = arith.constant 24 : index
    %c0_713 = arith.constant 0 : index
    %c0_714 = arith.constant 0 : index
    %619 = vector.load %arg2[%c0_711, %c24_712, %c0_713, %c0_714] : memref<1x32x4x8xf32, #tpu.memory_space<vmem>>, vector<1x1x4x1xf32>
    %620 = vector.shape_cast %619 : vector<1x1x4x1xf32> to vector<4x1xf32>
    %c0_715 = arith.constant 0 : index
    %c12_716 = arith.constant 12 : index
    %c0_717 = arith.constant 0 : index
    %c0_718 = arith.constant 0 : index
    %621 = vector.load %arg12[%c0_715, %c12_716, %c0_717, %c0_718] : memref<1x16x4x4xf32, #tpu.memory_space<vmem>>, vector<1x1x4x1xf32>
    %622 = vector.shape_cast %621 : vector<1x1x4x1xf32> to vector<4x1xf32>
    %623 = vector.shape_cast %620 : vector<4x1xf32> to vector<1x1x4x1xf32>
    tpu.vector_store %arg12[%c0_715, %c12_716, %c0_717, %c0_718], %623 {strides = array<i32>} : memref<1x16x4x4xf32, #tpu.memory_space<vmem>>, vector<1x1x4x1xf32>,
    %c0_719 = arith.constant 0 : index
    %c24_720 = arith.constant 24 : index
    %c0_721 = arith.constant 0 : index
    %c2_722 = arith.constant 2 : index
    %624 = vector.load %arg2[%c0_719, %c24_720, %c0_721, %c2_722] : memref<1x32x4x8xf32, #tpu.memory_space<vmem>>, vector<1x1x4x1xf32>
    %625 = vector.shape_cast %624 : vector<1x1x4x1xf32> to vector<4x1xf32>
    %c0_723 = arith.constant 0 : index
    %c12_724 = arith.constant 12 : index
    %c0_725 = arith.constant 0 : index
    %c1_726 = arith.constant 1 : index
    %626 = vector.load %arg12[%c0_723, %c12_724, %c0_725, %c1_726] : memref<1x16x4x4xf32, #tpu.memory_space<vmem>>, vector<1x1x4x1xf32>
    %627 = vector.shape_cast %626 : vector<1x1x4x1xf32> to vector<4x1xf32>
    %628 = vector.shape_cast %625 : vector<4x1xf32> to vector<1x1x4x1xf32>
    tpu.vector_store %arg12[%c0_723, %c12_724, %c0_725, %c1_726], %628 {strides = array<i32>} : memref<1x16x4x4xf32, #tpu.memory_space<vmem>>, vector<1x1x4x1xf32>,
    %c0_727 = arith.constant 0 : index
    %c24_728 = arith.constant 24 : index
    %c0_729 = arith.constant 0 : index
    %c4_730 = arith.constant 4 : index
    %629 = vector.load %arg2[%c0_727, %c24_728, %c0_729, %c4_730] : memref<1x32x4x8xf32, #tpu.memory_space<vmem>>, vector<1x1x4x1xf32>
    %630 = vector.shape_cast %629 : vector<1x1x4x1xf32> to vector<4x1xf32>
    %c0_731 = arith.constant 0 : index
    %c12_732 = arith.constant 12 : index
    %c0_733 = arith.constant 0 : index
    %c2_734 = arith.constant 2 : index
    %631 = vector.load %arg12[%c0_731, %c12_732, %c0_733, %c2_734] : memref<1x16x4x4xf32, #tpu.memory_space<vmem>>, vector<1x1x4x1xf32>
    %632 = vector.shape_cast %631 : vector<1x1x4x1xf32> to vector<4x1xf32>
    %633 = vector.shape_cast %630 : vector<4x1xf32> to vector<1x1x4x1xf32>
    tpu.vector_store %arg12[%c0_731, %c12_732, %c0_733, %c2_734], %633 {strides = array<i32>} : memref<1x16x4x4xf32, #tpu.memory_space<vmem>>, vector<1x1x4x1xf32>,
    %c0_735 = arith.constant 0 : index
    %c24_736 = arith.constant 24 : index
    %c0_737 = arith.constant 0 : index
    %c6_738 = arith.constant 6 : index
    %634 = vector.load %arg2[%c0_735, %c24_736, %c0_737, %c6_738] : memref<1x32x4x8xf32, #tpu.memory_space<vmem>>, vector<1x1x4x1xf32>
    %635 = vector.shape_cast %634 : vector<1x1x4x1xf32> to vector<4x1xf32>
    %c0_739 = arith.constant 0 : index
    %c12_740 = arith.constant 12 : index
    %c0_741 = arith.constant 0 : index
    %c3_742 = arith.constant 3 : index
    %636 = vector.load %arg12[%c0_739, %c12_740, %c0_741, %c3_742] : memref<1x16x4x4xf32, #tpu.memory_space<vmem>>, vector<1x1x4x1xf32>
    %637 = vector.shape_cast %636 : vector<1x1x4x1xf32> to vector<4x1xf32>
    %638 = vector.shape_cast %635 : vector<4x1xf32> to vector<1x1x4x1xf32>
    tpu.vector_store %arg12[%c0_739, %c12_740, %c0_741, %c3_742], %638 {strides = array<i32>} : memref<1x16x4x4xf32, #tpu.memory_space<vmem>>, vector<1x1x4x1xf32>,
    %c0_743 = arith.constant 0 : index
    %c26_744 = arith.constant 26 : index
    %c0_745 = arith.constant 0 : index
    %c0_746 = arith.constant 0 : index
    %639 = vector.load %arg2[%c0_743, %c26_744, %c0_745, %c0_746] : memref<1x32x4x8xf32, #tpu.memory_space<vmem>>, vector<1x1x4x1xf32>
    %640 = vector.shape_cast %639 : vector<1x1x4x1xf32> to vector<4x1xf32>
    %c0_747 = arith.constant 0 : index
    %c13_748 = arith.constant 13 : index
    %c0_749 = arith.constant 0 : index
    %c0_750 = arith.constant 0 : index
    %641 = vector.load %arg12[%c0_747, %c13_748, %c0_749, %c0_750] : memref<1x16x4x4xf32, #tpu.memory_space<vmem>>, vector<1x1x4x1xf32>
    %642 = vector.shape_cast %641 : vector<1x1x4x1xf32> to vector<4x1xf32>
    %643 = vector.shape_cast %640 : vector<4x1xf32> to vector<1x1x4x1xf32>
    tpu.vector_store %arg12[%c0_747, %c13_748, %c0_749, %c0_750], %643 {strides = array<i32>} : memref<1x16x4x4xf32, #tpu.memory_space<vmem>>, vector<1x1x4x1xf32>,
    %c0_751 = arith.constant 0 : index
    %c26_752 = arith.constant 26 : index
    %c0_753 = arith.constant 0 : index
    %c2_754 = arith.constant 2 : index
    %644 = vector.load %arg2[%c0_751, %c26_752, %c0_753, %c2_754] : memref<1x32x4x8xf32, #tpu.memory_space<vmem>>, vector<1x1x4x1xf32>
    %645 = vector.shape_cast %644 : vector<1x1x4x1xf32> to vector<4x1xf32>
    %c0_755 = arith.constant 0 : index
    %c13_756 = arith.constant 13 : index
    %c0_757 = arith.constant 0 : index
    %c1_758 = arith.constant 1 : index
    %646 = vector.load %arg12[%c0_755, %c13_756, %c0_757, %c1_758] : memref<1x16x4x4xf32, #tpu.memory_space<vmem>>, vector<1x1x4x1xf32>
    %647 = vector.shape_cast %646 : vector<1x1x4x1xf32> to vector<4x1xf32>
    %648 = vector.shape_cast %645 : vector<4x1xf32> to vector<1x1x4x1xf32>
    tpu.vector_store %arg12[%c0_755, %c13_756, %c0_757, %c1_758], %648 {strides = array<i32>} : memref<1x16x4x4xf32, #tpu.memory_space<vmem>>, vector<1x1x4x1xf32>,
    %c0_759 = arith.constant 0 : index
    %c26_760 = arith.constant 26 : index
    %c0_761 = arith.constant 0 : index
    %c4_762 = arith.constant 4 : index
    %649 = vector.load %arg2[%c0_759, %c26_760, %c0_761, %c4_762] : memref<1x32x4x8xf32, #tpu.memory_space<vmem>>, vector<1x1x4x1xf32>
    %650 = vector.shape_cast %649 : vector<1x1x4x1xf32> to vector<4x1xf32>
    %c0_763 = arith.constant 0 : index
    %c13_764 = arith.constant 13 : index
    %c0_765 = arith.constant 0 : index
    %c2_766 = arith.constant 2 : index
    %651 = vector.load %arg12[%c0_763, %c13_764, %c0_765, %c2_766] : memref<1x16x4x4xf32, #tpu.memory_space<vmem>>, vector<1x1x4x1xf32>
    %652 = vector.shape_cast %651 : vector<1x1x4x1xf32> to vector<4x1xf32>
    %653 = vector.shape_cast %650 : vector<4x1xf32> to vector<1x1x4x1xf32>
    tpu.vector_store %arg12[%c0_763, %c13_764, %c0_765, %c2_766], %653 {strides = array<i32>} : memref<1x16x4x4xf32, #tpu.memory_space<vmem>>, vector<1x1x4x1xf32>,
    %c0_767 = arith.constant 0 : index
    %c26_768 = arith.constant 26 : index
    %c0_769 = arith.constant 0 : index
    %c6_770 = arith.constant 6 : index
    %654 = vector.load %arg2[%c0_767, %c26_768, %c0_769, %c6_770] : memref<1x32x4x8xf32, #tpu.memory_space<vmem>>, vector<1x1x4x1xf32>
    %655 = vector.shape_cast %654 : vector<1x1x4x1xf32> to vector<4x1xf32>
    %c0_771 = arith.constant 0 : index
    %c13_772 = arith.constant 13 : index
    %c0_773 = arith.constant 0 : index
    %c3_774 = arith.constant 3 : index
    %656 = vector.load %arg12[%c0_771, %c13_772, %c0_773, %c3_774] : memref<1x16x4x4xf32, #tpu.memory_space<vmem>>, vector<1x1x4x1xf32>
    %657 = vector.shape_cast %656 : vector<1x1x4x1xf32> to vector<4x1xf32>
    %658 = vector.shape_cast %655 : vector<4x1xf32> to vector<1x1x4x1xf32>
    tpu.vector_store %arg12[%c0_771, %c13_772, %c0_773, %c3_774], %658 {strides = array<i32>} : memref<1x16x4x4xf32, #tpu.memory_space<vmem>>, vector<1x1x4x1xf32>,
    %c0_775 = arith.constant 0 : index
    %c28_776 = arith.constant 28 : index
    %c0_777 = arith.constant 0 : index
    %c0_778 = arith.constant 0 : index
    %659 = vector.load %arg2[%c0_775, %c28_776, %c0_777, %c0_778] : memref<1x32x4x8xf32, #tpu.memory_space<vmem>>, vector<1x1x4x1xf32>
    %660 = vector.shape_cast %659 : vector<1x1x4x1xf32> to vector<4x1xf32>
    %c0_779 = arith.constant 0 : index
    %c14_780 = arith.constant 14 : index
    %c0_781 = arith.constant 0 : index
    %c0_782 = arith.constant 0 : index
    %661 = vector.load %arg12[%c0_779, %c14_780, %c0_781, %c0_782] : memref<1x16x4x4xf32, #tpu.memory_space<vmem>>, vector<1x1x4x1xf32>
    %662 = vector.shape_cast %661 : vector<1x1x4x1xf32> to vector<4x1xf32>
    %663 = vector.shape_cast %660 : vector<4x1xf32> to vector<1x1x4x1xf32>
    tpu.vector_store %arg12[%c0_779, %c14_780, %c0_781, %c0_782], %663 {strides = array<i32>} : memref<1x16x4x4xf32, #tpu.memory_space<vmem>>, vector<1x1x4x1xf32>,
    %c0_783 = arith.constant 0 : index
    %c28_784 = arith.constant 28 : index
    %c0_785 = arith.constant 0 : index
    %c2_786 = arith.constant 2 : index
    %664 = vector.load %arg2[%c0_783, %c28_784, %c0_785, %c2_786] : memref<1x32x4x8xf32, #tpu.memory_space<vmem>>, vector<1x1x4x1xf32>
    %665 = vector.shape_cast %664 : vector<1x1x4x1xf32> to vector<4x1xf32>
    %c0_787 = arith.constant 0 : index
    %c14_788 = arith.constant 14 : index
    %c0_789 = arith.constant 0 : index
    %c1_790 = arith.constant 1 : index
    %666 = vector.load %arg12[%c0_787, %c14_788, %c0_789, %c1_790] : memref<1x16x4x4xf32, #tpu.memory_space<vmem>>, vector<1x1x4x1xf32>
    %667 = vector.shape_cast %666 : vector<1x1x4x1xf32> to vector<4x1xf32>
    %668 = vector.shape_cast %665 : vector<4x1xf32> to vector<1x1x4x1xf32>
    tpu.vector_store %arg12[%c0_787, %c14_788, %c0_789, %c1_790], %668 {strides = array<i32>} : memref<1x16x4x4xf32, #tpu.memory_space<vmem>>, vector<1x1x4x1xf32>,
    %c0_791 = arith.constant 0 : index
    %c28_792 = arith.constant 28 : index
    %c0_793 = arith.constant 0 : index
    %c4_794 = arith.constant 4 : index
    %669 = vector.load %arg2[%c0_791, %c28_792, %c0_793, %c4_794] : memref<1x32x4x8xf32, #tpu.memory_space<vmem>>, vector<1x1x4x1xf32>
    %670 = vector.shape_cast %669 : vector<1x1x4x1xf32> to vector<4x1xf32>
    %c0_795 = arith.constant 0 : index
    %c14_796 = arith.constant 14 : index
    %c0_797 = arith.constant 0 : index
    %c2_798 = arith.constant 2 : index
    %671 = vector.load %arg12[%c0_795, %c14_796, %c0_797, %c2_798] : memref<1x16x4x4xf32, #tpu.memory_space<vmem>>, vector<1x1x4x1xf32>
    %672 = vector.shape_cast %671 : vector<1x1x4x1xf32> to vector<4x1xf32>
    %673 = vector.shape_cast %670 : vector<4x1xf32> to vector<1x1x4x1xf32>
    tpu.vector_store %arg12[%c0_795, %c14_796, %c0_797, %c2_798], %673 {strides = array<i32>} : memref<1x16x4x4xf32, #tpu.memory_space<vmem>>, vector<1x1x4x1xf32>,
    %c0_799 = arith.constant 0 : index
    %c28_800 = arith.constant 28 : index
    %c0_801 = arith.constant 0 : index
    %c6_802 = arith.constant 6 : index
    %674 = vector.load %arg2[%c0_799, %c28_800, %c0_801, %c6_802] : memref<1x32x4x8xf32, #tpu.memory_space<vmem>>, vector<1x1x4x1xf32>
    %675 = vector.shape_cast %674 : vector<1x1x4x1xf32> to vector<4x1xf32>
    %c0_803 = arith.constant 0 : index
    %c14_804 = arith.constant 14 : index
    %c0_805 = arith.constant 0 : index
    %c3_806 = arith.constant 3 : index
    %676 = vector.load %arg12[%c0_803, %c14_804, %c0_805, %c3_806] : memref<1x16x4x4xf32, #tpu.memory_space<vmem>>, vector<1x1x4x1xf32>
    %677 = vector.shape_cast %676 : vector<1x1x4x1xf32> to vector<4x1xf32>
    %678 = vector.shape_cast %675 : vector<4x1xf32> to vector<1x1x4x1xf32>
    tpu.vector_store %arg12[%c0_803, %c14_804, %c0_805, %c3_806], %678 {strides = array<i32>} : memref<1x16x4x4xf32, #tpu.memory_space<vmem>>, vector<1x1x4x1xf32>,
    %c0_807 = arith.constant 0 : index
    %c30_808 = arith.constant 30 : index
    %c0_809 = arith.constant 0 : index
    %c0_810 = arith.constant 0 : index
    %679 = vector.load %arg2[%c0_807, %c30_808, %c0_809, %c0_810] : memref<1x32x4x8xf32, #tpu.memory_space<vmem>>, vector<1x1x4x1xf32>
    %680 = vector.shape_cast %679 : vector<1x1x4x1xf32> to vector<4x1xf32>
    %c0_811 = arith.constant 0 : index
    %c15_812 = arith.constant 15 : index
    %c0_813 = arith.constant 0 : index
    %c0_814 = arith.constant 0 : index
    %681 = vector.load %arg12[%c0_811, %c15_812, %c0_813, %c0_814] : memref<1x16x4x4xf32, #tpu.memory_space<vmem>>, vector<1x1x4x1xf32>
    %682 = vector.shape_cast %681 : vector<1x1x4x1xf32> to vector<4x1xf32>
    %683 = vector.shape_cast %680 : vector<4x1xf32> to vector<1x1x4x1xf32>
    tpu.vector_store %arg12[%c0_811, %c15_812, %c0_813, %c0_814], %683 {strides = array<i32>} : memref<1x16x4x4xf32, #tpu.memory_space<vmem>>, vector<1x1x4x1xf32>,
    %c0_815 = arith.constant 0 : index
    %c30_816 = arith.constant 30 : index
    %c0_817 = arith.constant 0 : index
    %c2_818 = arith.constant 2 : index
    %684 = vector.load %arg2[%c0_815, %c30_816, %c0_817, %c2_818] : memref<1x32x4x8xf32, #tpu.memory_space<vmem>>, vector<1x1x4x1xf32>
    %685 = vector.shape_cast %684 : vector<1x1x4x1xf32> to vector<4x1xf32>
    %c0_819 = arith.constant 0 : index
    %c15_820 = arith.constant 15 : index
    %c0_821 = arith.constant 0 : index
    %c1_822 = arith.constant 1 : index
    %686 = vector.load %arg12[%c0_819, %c15_820, %c0_821, %c1_822] : memref<1x16x4x4xf32, #tpu.memory_space<vmem>>, vector<1x1x4x1xf32>
    %687 = vector.shape_cast %686 : vector<1x1x4x1xf32> to vector<4x1xf32>
    %688 = vector.shape_cast %685 : vector<4x1xf32> to vector<1x1x4x1xf32>
    tpu.vector_store %arg12[%c0_819, %c15_820, %c0_821, %c1_822], %688 {strides = array<i32>} : memref<1x16x4x4xf32, #tpu.memory_space<vmem>>, vector<1x1x4x1xf32>,
    %c0_823 = arith.constant 0 : index
    %c30_824 = arith.constant 30 : index
    %c0_825 = arith.constant 0 : index
    %c4_826 = arith.constant 4 : index
    %689 = vector.load %arg2[%c0_823, %c30_824, %c0_825, %c4_826] : memref<1x32x4x8xf32, #tpu.memory_space<vmem>>, vector<1x1x4x1xf32>
    %690 = vector.shape_cast %689 : vector<1x1x4x1xf32> to vector<4x1xf32>
    %c0_827 = arith.constant 0 : index
    %c15_828 = arith.constant 15 : index
    %c0_829 = arith.constant 0 : index
    %c2_830 = arith.constant 2 : index
    %691 = vector.load %arg12[%c0_827, %c15_828, %c0_829, %c2_830] : memref<1x16x4x4xf32, #tpu.memory_space<vmem>>, vector<1x1x4x1xf32>
    %692 = vector.shape_cast %691 : vector<1x1x4x1xf32> to vector<4x1xf32>
    %693 = vector.shape_cast %690 : vector<4x1xf32> to vector<1x1x4x1xf32>
    tpu.vector_store %arg12[%c0_827, %c15_828, %c0_829, %c2_830], %693 {strides = array<i32>} : memref<1x16x4x4xf32, #tpu.memory_space<vmem>>, vector<1x1x4x1xf32>,
    %c0_831 = arith.constant 0 : index
    %c30_832 = arith.constant 30 : index
    %c0_833 = arith.constant 0 : index
    %c6_834 = arith.constant 6 : index
    %694 = vector.load %arg2[%c0_831, %c30_832, %c0_833, %c6_834] : memref<1x32x4x8xf32, #tpu.memory_space<vmem>>, vector<1x1x4x1xf32>
    %695 = vector.shape_cast %694 : vector<1x1x4x1xf32> to vector<4x1xf32>
    %c0_835 = arith.constant 0 : index
    %c15_836 = arith.constant 15 : index
    %c0_837 = arith.constant 0 : index
    %c3_838 = arith.constant 3 : index
    %696 = vector.load %arg12[%c0_835, %c15_836, %c0_837, %c3_838] : memref<1x16x4x4xf32, #tpu.memory_space<vmem>>, vector<1x1x4x1xf32>
    %697 = vector.shape_cast %696 : vector<1x1x4x1xf32> to vector<4x1xf32>
    %698 = vector.shape_cast %695 : vector<4x1xf32> to vector<1x1x4x1xf32>
    tpu.vector_store %arg12[%c0_835, %c15_836, %c0_837, %c3_838], %698 {strides = array<i32>} : memref<1x16x4x4xf32, #tpu.memory_space<vmem>>, vector<1x1x4x1xf32>,
    %c0_839 = arith.constant 0 : index
    %c0_840 = arith.constant 0 : index
    %c0_841 = arith.constant 0 : index
    %c0_842 = arith.constant 0 : index
    %699 = vector.load %arg2[%c0_839, %c0_840, %c0_841, %c0_842] : memref<1x32x4x8xf32, #tpu.memory_space<vmem>>, vector<1x1x4x1xf32>
    %700 = vector.shape_cast %699 : vector<1x1x4x1xf32> to vector<4x1xf32>
    %c0_843 = arith.constant 0 : index
    %c0_844 = arith.constant 0 : index
    %c0_845 = arith.constant 0 : index
    %c0_846 = arith.constant 0 : index
    %701 = vector.load %arg13[%c0_843, %c0_844, %c0_845, %c0_846] : memref<1x8x4x2xf32, #tpu.memory_space<vmem>>, vector<1x1x4x1xf32>
    %702 = vector.shape_cast %701 : vector<1x1x4x1xf32> to vector<4x1xf32>
    %703 = vector.shape_cast %700 : vector<4x1xf32> to vector<1x1x4x1xf32>
    tpu.vector_store %arg13[%c0_843, %c0_844, %c0_845, %c0_846], %703 {strides = array<i32>} : memref<1x8x4x2xf32, #tpu.memory_space<vmem>>, vector<1x1x4x1xf32>,
    %c0_847 = arith.constant 0 : index
    %c0_848 = arith.constant 0 : index
    %c0_849 = arith.constant 0 : index
    %c4_850 = arith.constant 4 : index
    %704 = vector.load %arg2[%c0_847, %c0_848, %c0_849, %c4_850] : memref<1x32x4x8xf32, #tpu.memory_space<vmem>>, vector<1x1x4x1xf32>
    %705 = vector.shape_cast %704 : vector<1x1x4x1xf32> to vector<4x1xf32>
    %c0_851 = arith.constant 0 : index
    %c0_852 = arith.constant 0 : index
    %c0_853 = arith.constant 0 : index
    %c1_854 = arith.constant 1 : index
    %706 = vector.load %arg13[%c0_851, %c0_852, %c0_853, %c1_854] : memref<1x8x4x2xf32, #tpu.memory_space<vmem>>, vector<1x1x4x1xf32>
    %707 = vector.shape_cast %706 : vector<1x1x4x1xf32> to vector<4x1xf32>
    %708 = vector.shape_cast %705 : vector<4x1xf32> to vector<1x1x4x1xf32>
    tpu.vector_store %arg13[%c0_851, %c0_852, %c0_853, %c1_854], %708 {strides = array<i32>} : memref<1x8x4x2xf32, #tpu.memory_space<vmem>>, vector<1x1x4x1xf32>,
    %c0_855 = arith.constant 0 : index
    %c4_856 = arith.constant 4 : index
    %c0_857 = arith.constant 0 : index
    %c0_858 = arith.constant 0 : index
    %709 = vector.load %arg2[%c0_855, %c4_856, %c0_857, %c0_858] : memref<1x32x4x8xf32, #tpu.memory_space<vmem>>, vector<1x1x4x1xf32>
    %710 = vector.shape_cast %709 : vector<1x1x4x1xf32> to vector<4x1xf32>
    %c0_859 = arith.constant 0 : index
    %c1_860 = arith.constant 1 : index
    %c0_861 = arith.constant 0 : index
    %c0_862 = arith.constant 0 : index
    %711 = vector.load %arg13[%c0_859, %c1_860, %c0_861, %c0_862] : memref<1x8x4x2xf32, #tpu.memory_space<vmem>>, vector<1x1x4x1xf32>
    %712 = vector.shape_cast %711 : vector<1x1x4x1xf32> to vector<4x1xf32>
    %713 = vector.shape_cast %710 : vector<4x1xf32> to vector<1x1x4x1xf32>
    tpu.vector_store %arg13[%c0_859, %c1_860, %c0_861, %c0_862], %713 {strides = array<i32>} : memref<1x8x4x2xf32, #tpu.memory_space<vmem>>, vector<1x1x4x1xf32>,
    %c0_863 = arith.constant 0 : index
    %c4_864 = arith.constant 4 : index
    %c0_865 = arith.constant 0 : index
    %c4_866 = arith.constant 4 : index
    %714 = vector.load %arg2[%c0_863, %c4_864, %c0_865, %c4_866] : memref<1x32x4x8xf32, #tpu.memory_space<vmem>>, vector<1x1x4x1xf32>
    %715 = vector.shape_cast %714 : vector<1x1x4x1xf32> to vector<4x1xf32>
    %c0_867 = arith.constant 0 : index
    %c1_868 = arith.constant 1 : index
    %c0_869 = arith.constant 0 : index
    %c1_870 = arith.constant 1 : index
    %716 = vector.load %arg13[%c0_867, %c1_868, %c0_869, %c1_870] : memref<1x8x4x2xf32, #tpu.memory_space<vmem>>, vector<1x1x4x1xf32>
    %717 = vector.shape_cast %716 : vector<1x1x4x1xf32> to vector<4x1xf32>
    %718 = vector.shape_cast %715 : vector<4x1xf32> to vector<1x1x4x1xf32>
    tpu.vector_store %arg13[%c0_867, %c1_868, %c0_869, %c1_870], %718 {strides = array<i32>} : memref<1x8x4x2xf32, #tpu.memory_space<vmem>>, vector<1x1x4x1xf32>,
    %c0_871 = arith.constant 0 : index
    %c8_872 = arith.constant 8 : index
    %c0_873 = arith.constant 0 : index
    %c0_874 = arith.constant 0 : index
    %719 = vector.load %arg2[%c0_871, %c8_872, %c0_873, %c0_874] : memref<1x32x4x8xf32, #tpu.memory_space<vmem>>, vector<1x1x4x1xf32>
    %720 = vector.shape_cast %719 : vector<1x1x4x1xf32> to vector<4x1xf32>
    %c0_875 = arith.constant 0 : index
    %c2_876 = arith.constant 2 : index
    %c0_877 = arith.constant 0 : index
    %c0_878 = arith.constant 0 : index
    %721 = vector.load %arg13[%c0_875, %c2_876, %c0_877, %c0_878] : memref<1x8x4x2xf32, #tpu.memory_space<vmem>>, vector<1x1x4x1xf32>
    %722 = vector.shape_cast %721 : vector<1x1x4x1xf32> to vector<4x1xf32>
    %723 = vector.shape_cast %720 : vector<4x1xf32> to vector<1x1x4x1xf32>
    tpu.vector_store %arg13[%c0_875, %c2_876, %c0_877, %c0_878], %723 {strides = array<i32>} : memref<1x8x4x2xf32, #tpu.memory_space<vmem>>, vector<1x1x4x1xf32>,
    %c0_879 = arith.constant 0 : index
    %c8_880 = arith.constant 8 : index
    %c0_881 = arith.constant 0 : index
    %c4_882 = arith.constant 4 : index
    %724 = vector.load %arg2[%c0_879, %c8_880, %c0_881, %c4_882] : memref<1x32x4x8xf32, #tpu.memory_space<vmem>>, vector<1x1x4x1xf32>
    %725 = vector.shape_cast %724 : vector<1x1x4x1xf32> to vector<4x1xf32>
    %c0_883 = arith.constant 0 : index
    %c2_884 = arith.constant 2 : index
    %c0_885 = arith.constant 0 : index
    %c1_886 = arith.constant 1 : index
    %726 = vector.load %arg13[%c0_883, %c2_884, %c0_885, %c1_886] : memref<1x8x4x2xf32, #tpu.memory_space<vmem>>, vector<1x1x4x1xf32>
    %727 = vector.shape_cast %726 : vector<1x1x4x1xf32> to vector<4x1xf32>
    %728 = vector.shape_cast %725 : vector<4x1xf32> to vector<1x1x4x1xf32>
    tpu.vector_store %arg13[%c0_883, %c2_884, %c0_885, %c1_886], %728 {strides = array<i32>} : memref<1x8x4x2xf32, #tpu.memory_space<vmem>>, vector<1x1x4x1xf32>,
    %c0_887 = arith.constant 0 : index
    %c12_888 = arith.constant 12 : index
    %c0_889 = arith.constant 0 : index
    %c0_890 = arith.constant 0 : index
    %729 = vector.load %arg2[%c0_887, %c12_888, %c0_889, %c0_890] : memref<1x32x4x8xf32, #tpu.memory_space<vmem>>, vector<1x1x4x1xf32>
    %730 = vector.shape_cast %729 : vector<1x1x4x1xf32> to vector<4x1xf32>
    %c0_891 = arith.constant 0 : index
    %c3_892 = arith.constant 3 : index
    %c0_893 = arith.constant 0 : index
    %c0_894 = arith.constant 0 : index
    %731 = vector.load %arg13[%c0_891, %c3_892, %c0_893, %c0_894] : memref<1x8x4x2xf32, #tpu.memory_space<vmem>>, vector<1x1x4x1xf32>
    %732 = vector.shape_cast %731 : vector<1x1x4x1xf32> to vector<4x1xf32>
    %733 = vector.shape_cast %730 : vector<4x1xf32> to vector<1x1x4x1xf32>
    tpu.vector_store %arg13[%c0_891, %c3_892, %c0_893, %c0_894], %733 {strides = array<i32>} : memref<1x8x4x2xf32, #tpu.memory_space<vmem>>, vector<1x1x4x1xf32>,
    %c0_895 = arith.constant 0 : index
    %c12_896 = arith.constant 12 : index
    %c0_897 = arith.constant 0 : index
    %c4_898 = arith.constant 4 : index
    %734 = vector.load %arg2[%c0_895, %c12_896, %c0_897, %c4_898] : memref<1x32x4x8xf32, #tpu.memory_space<vmem>>, vector<1x1x4x1xf32>
    %735 = vector.shape_cast %734 : vector<1x1x4x1xf32> to vector<4x1xf32>
    %c0_899 = arith.constant 0 : index
    %c3_900 = arith.constant 3 : index
    %c0_901 = arith.constant 0 : index
    %c1_902 = arith.constant 1 : index
    %736 = vector.load %arg13[%c0_899, %c3_900, %c0_901, %c1_902] : memref<1x8x4x2xf32, #tpu.memory_space<vmem>>, vector<1x1x4x1xf32>
    %737 = vector.shape_cast %736 : vector<1x1x4x1xf32> to vector<4x1xf32>
    %738 = vector.shape_cast %735 : vector<4x1xf32> to vector<1x1x4x1xf32>
    tpu.vector_store %arg13[%c0_899, %c3_900, %c0_901, %c1_902], %738 {strides = array<i32>} : memref<1x8x4x2xf32, #tpu.memory_space<vmem>>, vector<1x1x4x1xf32>,
    %c0_903 = arith.constant 0 : index
    %c16_904 = arith.constant 16 : index
    %c0_905 = arith.constant 0 : index
    %c0_906 = arith.constant 0 : index
    %739 = vector.load %arg2[%c0_903, %c16_904, %c0_905, %c0_906] : memref<1x32x4x8xf32, #tpu.memory_space<vmem>>, vector<1x1x4x1xf32>
    %740 = vector.shape_cast %739 : vector<1x1x4x1xf32> to vector<4x1xf32>
    %c0_907 = arith.constant 0 : index
    %c4_908 = arith.constant 4 : index
    %c0_909 = arith.constant 0 : index
    %c0_910 = arith.constant 0 : index
    %741 = vector.load %arg13[%c0_907, %c4_908, %c0_909, %c0_910] : memref<1x8x4x2xf32, #tpu.memory_space<vmem>>, vector<1x1x4x1xf32>
    %742 = vector.shape_cast %741 : vector<1x1x4x1xf32> to vector<4x1xf32>
    %743 = vector.shape_cast %740 : vector<4x1xf32> to vector<1x1x4x1xf32>
    tpu.vector_store %arg13[%c0_907, %c4_908, %c0_909, %c0_910], %743 {strides = array<i32>} : memref<1x8x4x2xf32, #tpu.memory_space<vmem>>, vector<1x1x4x1xf32>,
    %c0_911 = arith.constant 0 : index
    %c16_912 = arith.constant 16 : index
    %c0_913 = arith.constant 0 : index
    %c4_914 = arith.constant 4 : index
    %744 = vector.load %arg2[%c0_911, %c16_912, %c0_913, %c4_914] : memref<1x32x4x8xf32, #tpu.memory_space<vmem>>, vector<1x1x4x1xf32>
    %745 = vector.shape_cast %744 : vector<1x1x4x1xf32> to vector<4x1xf32>
    %c0_915 = arith.constant 0 : index
    %c4_916 = arith.constant 4 : index
    %c0_917 = arith.constant 0 : index
    %c1_918 = arith.constant 1 : index
    %746 = vector.load %arg13[%c0_915, %c4_916, %c0_917, %c1_918] : memref<1x8x4x2xf32, #tpu.memory_space<vmem>>, vector<1x1x4x1xf32>
    %747 = vector.shape_cast %746 : vector<1x1x4x1xf32> to vector<4x1xf32>
    %748 = vector.shape_cast %745 : vector<4x1xf32> to vector<1x1x4x1xf32>
    tpu.vector_store %arg13[%c0_915, %c4_916, %c0_917, %c1_918], %748 {strides = array<i32>} : memref<1x8x4x2xf32, #tpu.memory_space<vmem>>, vector<1x1x4x1xf32>,
    %c0_919 = arith.constant 0 : index
    %c20_920 = arith.constant 20 : index
    %c0_921 = arith.constant 0 : index
    %c0_922 = arith.constant 0 : index
    %749 = vector.load %arg2[%c0_919, %c20_920, %c0_921, %c0_922] : memref<1x32x4x8xf32, #tpu.memory_space<vmem>>, vector<1x1x4x1xf32>
    %750 = vector.shape_cast %749 : vector<1x1x4x1xf32> to vector<4x1xf32>
    %c0_923 = arith.constant 0 : index
    %c5_924 = arith.constant 5 : index
    %c0_925 = arith.constant 0 : index
    %c0_926 = arith.constant 0 : index
    %751 = vector.load %arg13[%c0_923, %c5_924, %c0_925, %c0_926] : memref<1x8x4x2xf32, #tpu.memory_space<vmem>>, vector<1x1x4x1xf32>
    %752 = vector.shape_cast %751 : vector<1x1x4x1xf32> to vector<4x1xf32>
    %753 = vector.shape_cast %750 : vector<4x1xf32> to vector<1x1x4x1xf32>
    tpu.vector_store %arg13[%c0_923, %c5_924, %c0_925, %c0_926], %753 {strides = array<i32>} : memref<1x8x4x2xf32, #tpu.memory_space<vmem>>, vector<1x1x4x1xf32>,
    %c0_927 = arith.constant 0 : index
    %c20_928 = arith.constant 20 : index
    %c0_929 = arith.constant 0 : index
    %c4_930 = arith.constant 4 : index
    %754 = vector.load %arg2[%c0_927, %c20_928, %c0_929, %c4_930] : memref<1x32x4x8xf32, #tpu.memory_space<vmem>>, vector<1x1x4x1xf32>
    %755 = vector.shape_cast %754 : vector<1x1x4x1xf32> to vector<4x1xf32>
    %c0_931 = arith.constant 0 : index
    %c5_932 = arith.constant 5 : index
    %c0_933 = arith.constant 0 : index
    %c1_934 = arith.constant 1 : index
    %756 = vector.load %arg13[%c0_931, %c5_932, %c0_933, %c1_934] : memref<1x8x4x2xf32, #tpu.memory_space<vmem>>, vector<1x1x4x1xf32>
    %757 = vector.shape_cast %756 : vector<1x1x4x1xf32> to vector<4x1xf32>
    %758 = vector.shape_cast %755 : vector<4x1xf32> to vector<1x1x4x1xf32>
    tpu.vector_store %arg13[%c0_931, %c5_932, %c0_933, %c1_934], %758 {strides = array<i32>} : memref<1x8x4x2xf32, #tpu.memory_space<vmem>>, vector<1x1x4x1xf32>,
    %c0_935 = arith.constant 0 : index
    %c24_936 = arith.constant 24 : index
    %c0_937 = arith.constant 0 : index
    %c0_938 = arith.constant 0 : index
    %759 = vector.load %arg2[%c0_935, %c24_936, %c0_937, %c0_938] : memref<1x32x4x8xf32, #tpu.memory_space<vmem>>, vector<1x1x4x1xf32>
    %760 = vector.shape_cast %759 : vector<1x1x4x1xf32> to vector<4x1xf32>
    %c0_939 = arith.constant 0 : index
    %c6_940 = arith.constant 6 : index
    %c0_941 = arith.constant 0 : index
    %c0_942 = arith.constant 0 : index
    %761 = vector.load %arg13[%c0_939, %c6_940, %c0_941, %c0_942] : memref<1x8x4x2xf32, #tpu.memory_space<vmem>>, vector<1x1x4x1xf32>
    %762 = vector.shape_cast %761 : vector<1x1x4x1xf32> to vector<4x1xf32>
    %763 = vector.shape_cast %760 : vector<4x1xf32> to vector<1x1x4x1xf32>
    tpu.vector_store %arg13[%c0_939, %c6_940, %c0_941, %c0_942], %763 {strides = array<i32>} : memref<1x8x4x2xf32, #tpu.memory_space<vmem>>, vector<1x1x4x1xf32>,
    %c0_943 = arith.constant 0 : index
    %c24_944 = arith.constant 24 : index
    %c0_945 = arith.constant 0 : index
    %c4_946 = arith.constant 4 : index
    %764 = vector.load %arg2[%c0_943, %c24_944, %c0_945, %c4_946] : memref<1x32x4x8xf32, #tpu.memory_space<vmem>>, vector<1x1x4x1xf32>
    %765 = vector.shape_cast %764 : vector<1x1x4x1xf32> to vector<4x1xf32>
    %c0_947 = arith.constant 0 : index
    %c6_948 = arith.constant 6 : index
    %c0_949 = arith.constant 0 : index
    %c1_950 = arith.constant 1 : index
    %766 = vector.load %arg13[%c0_947, %c6_948, %c0_949, %c1_950] : memref<1x8x4x2xf32, #tpu.memory_space<vmem>>, vector<1x1x4x1xf32>
    %767 = vector.shape_cast %766 : vector<1x1x4x1xf32> to vector<4x1xf32>
    %768 = vector.shape_cast %765 : vector<4x1xf32> to vector<1x1x4x1xf32>
    tpu.vector_store %arg13[%c0_947, %c6_948, %c0_949, %c1_950], %768 {strides = array<i32>} : memref<1x8x4x2xf32, #tpu.memory_space<vmem>>, vector<1x1x4x1xf32>,
    %c0_951 = arith.constant 0 : index
    %c28_952 = arith.constant 28 : index
    %c0_953 = arith.constant 0 : index
    %c0_954 = arith.constant 0 : index
    %769 = vector.load %arg2[%c0_951, %c28_952, %c0_953, %c0_954] : memref<1x32x4x8xf32, #tpu.memory_space<vmem>>, vector<1x1x4x1xf32>
    %770 = vector.shape_cast %769 : vector<1x1x4x1xf32> to vector<4x1xf32>
    %c0_955 = arith.constant 0 : index
    %c7_956 = arith.constant 7 : index
    %c0_957 = arith.constant 0 : index
    %c0_958 = arith.constant 0 : index
    %771 = vector.load %arg13[%c0_955, %c7_956, %c0_957, %c0_958] : memref<1x8x4x2xf32, #tpu.memory_space<vmem>>, vector<1x1x4x1xf32>
    %772 = vector.shape_cast %771 : vector<1x1x4x1xf32> to vector<4x1xf32>
    %773 = vector.shape_cast %770 : vector<4x1xf32> to vector<1x1x4x1xf32>
    tpu.vector_store %arg13[%c0_955, %c7_956, %c0_957, %c0_958], %773 {strides = array<i32>} : memref<1x8x4x2xf32, #tpu.memory_space<vmem>>, vector<1x1x4x1xf32>,
    %c0_959 = arith.constant 0 : index
    %c28_960 = arith.constant 28 : index
    %c0_961 = arith.constant 0 : index
    %c4_962 = arith.constant 4 : index
    %774 = vector.load %arg2[%c0_959, %c28_960, %c0_961, %c4_962] : memref<1x32x4x8xf32, #tpu.memory_space<vmem>>, vector<1x1x4x1xf32>
    %775 = vector.shape_cast %774 : vector<1x1x4x1xf32> to vector<4x1xf32>
    %c0_963 = arith.constant 0 : index
    %c7_964 = arith.constant 7 : index
    %c0_965 = arith.constant 0 : index
    %c1_966 = arith.constant 1 : index
    %776 = vector.load %arg13[%c0_963, %c7_964, %c0_965, %c1_966] : memref<1x8x4x2xf32, #tpu.memory_space<vmem>>, vector<1x1x4x1xf32>
    %777 = vector.shape_cast %776 : vector<1x1x4x1xf32> to vector<4x1xf32>
    %778 = vector.shape_cast %775 : vector<4x1xf32> to vector<1x1x4x1xf32>
    tpu.vector_store %arg13[%c0_963, %c7_964, %c0_965, %c1_966], %778 {strides = array<i32>} : memref<1x8x4x2xf32, #tpu.memory_space<vmem>>, vector<1x1x4x1xf32>,
    %c0_967 = arith.constant 0 : index
    %c0_968 = arith.constant 0 : index
    %c0_969 = arith.constant 0 : index
    %c0_970 = arith.constant 0 : index
    %779 = vector.load %arg2[%c0_967, %c0_968, %c0_969, %c0_970] : memref<1x32x4x8xf32, #tpu.memory_space<vmem>>, vector<1x1x4x1xf32>
    %780 = vector.shape_cast %779 : vector<1x1x4x1xf32> to vector<4x1xf32>
    %c0_971 = arith.constant 0 : index
    %c0_972 = arith.constant 0 : index
    %c0_973 = arith.constant 0 : index
    %c0_974 = arith.constant 0 : index
    %781 = vector.load %arg14[%c0_971, %c0_972, %c0_973, %c0_974] : memref<1x4x4x1xf32, #tpu.memory_space<vmem>>, vector<1x1x4x1xf32>
    %782 = vector.shape_cast %781 : vector<1x1x4x1xf32> to vector<4x1xf32>
    %783 = vector.shape_cast %780 : vector<4x1xf32> to vector<1x1x4x1xf32>
    tpu.vector_store %arg14[%c0_971, %c0_972, %c0_973, %c0_974], %783 {strides = array<i32>} : memref<1x4x4x1xf32, #tpu.memory_space<vmem>>, vector<1x1x4x1xf32>,
    %c0_975 = arith.constant 0 : index
    %c8_976 = arith.constant 8 : index
    %c0_977 = arith.constant 0 : index
    %c0_978 = arith.constant 0 : index
    %784 = vector.load %arg2[%c0_975, %c8_976, %c0_977, %c0_978] : memref<1x32x4x8xf32, #tpu.memory_space<vmem>>, vector<1x1x4x1xf32>
    %785 = vector.shape_cast %784 : vector<1x1x4x1xf32> to vector<4x1xf32>
    %c0_979 = arith.constant 0 : index
    %c1_980 = arith.constant 1 : index
    %c0_981 = arith.constant 0 : index
    %c0_982 = arith.constant 0 : index
    %786 = vector.load %arg14[%c0_979, %c1_980, %c0_981, %c0_982] : memref<1x4x4x1xf32, #tpu.memory_space<vmem>>, vector<1x1x4x1xf32>
    %787 = vector.shape_cast %786 : vector<1x1x4x1xf32> to vector<4x1xf32>
    %788 = vector.shape_cast %785 : vector<4x1xf32> to vector<1x1x4x1xf32>
    tpu.vector_store %arg14[%c0_979, %c1_980, %c0_981, %c0_982], %788 {strides = array<i32>} : memref<1x4x4x1xf32, #tpu.memory_space<vmem>>, vector<1x1x4x1xf32>,
    %c0_983 = arith.constant 0 : index
    %c16_984 = arith.constant 16 : index
    %c0_985 = arith.constant 0 : index
    %c0_986 = arith.constant 0 : index
    %789 = vector.load %arg2[%c0_983, %c16_984, %c0_985, %c0_986] : memref<1x32x4x8xf32, #tpu.memory_space<vmem>>, vector<1x1x4x1xf32>
    %790 = vector.shape_cast %789 : vector<1x1x4x1xf32> to vector<4x1xf32>
    %c0_987 = arith.constant 0 : index
    %c2_988 = arith.constant 2 : index
    %c0_989 = arith.constant 0 : index
    %c0_990 = arith.constant 0 : index
    %791 = vector.load %arg14[%c0_987, %c2_988, %c0_989, %c0_990] : memref<1x4x4x1xf32, #tpu.memory_space<vmem>>, vector<1x1x4x1xf32>
    %792 = vector.shape_cast %791 : vector<1x1x4x1xf32> to vector<4x1xf32>
    %793 = vector.shape_cast %790 : vector<4x1xf32> to vector<1x1x4x1xf32>
    tpu.vector_store %arg14[%c0_987, %c2_988, %c0_989, %c0_990], %793 {strides = array<i32>} : memref<1x4x4x1xf32, #tpu.memory_space<vmem>>, vector<1x1x4x1xf32>,
    %c0_991 = arith.constant 0 : index
    %c24_992 = arith.constant 24 : index
    %c0_993 = arith.constant 0 : index
    %c0_994 = arith.constant 0 : index
    %794 = vector.load %arg2[%c0_991, %c24_992, %c0_993, %c0_994] : memref<1x32x4x8xf32, #tpu.memory_space<vmem>>, vector<1x1x4x1xf32>
    %795 = vector.shape_cast %794 : vector<1x1x4x1xf32> to vector<4x1xf32>
    %c0_995 = arith.constant 0 : index
    %c3_996 = arith.constant 3 : index
    %c0_997 = arith.constant 0 : index
    %c0_998 = arith.constant 0 : index
    %796 = vector.load %arg14[%c0_995, %c3_996, %c0_997, %c0_998] : memref<1x4x4x1xf32, #tpu.memory_space<vmem>>, vector<1x1x4x1xf32>
    %797 = vector.shape_cast %796 : vector<1x1x4x1xf32> to vector<4x1xf32>
    %798 = vector.shape_cast %795 : vector<4x1xf32> to vector<1x1x4x1xf32>
    tpu.vector_store %arg14[%c0_995, %c3_996, %c0_997, %c0_998], %798 {strides = array<i32>} : memref<1x4x4x1xf32, #tpu.memory_space<vmem>>, vector<1x1x4x1xf32>,
    return
  }
  func.func @transform_0(%arg0: i32) -> (i32, i32, i32) {
    %c0_i32 = arith.constant 0 : i32
    %c0_i32_0 = arith.constant 0 : i32
    %c0_i32_1 = arith.constant 0 : i32
    return %arg0, %c0_i32, %c0_i32_0 : i32, i32, i32
  }
  func.func @transform_1(%arg0: i32) -> (i32, i32, i32, i32) {
    %c0_i32 = arith.constant 0 : i32
    %c0_i32_0 = arith.constant 0 : i32
    %c0_i32_1 = arith.constant 0 : i32
    %c0_i32_2 = arith.constant 0 : i32
    return %arg0, %c0_i32, %c0_i32_0, %c0_i32_1 : i32, i32, i32, i32
  }
  func.func @transform_2(%arg0: i32) -> (i32, i32, i32) {
    %c0_i32 = arith.constant 0 : i32
    %c0_i32_0 = arith.constant 0 : i32
    %c0_i32_1 = arith.constant 0 : i32
    %c0_i32_2 = arith.constant 0 : i32
    return %c0_i32, %c0_i32_0, %c0_i32_1 : i32, i32, i32
  }
  func.func @transform_3(%arg0: i32) -> (i32, i32) {
    %c0_i32 = arith.constant 0 : i32
    %c0_i32_0 = arith.constant 0 : i32
    %c0_i32_1 = arith.constant 0 : i32
    return %c0_i32, %c0_i32_0 : i32, i32
  }
  func.func @transform_4(%arg0: i32) -> (i32, i32, i32) {
    %c0_i32 = arith.constant 0 : i32
    %c0_i32_0 = arith.constant 0 : i32
    %c0_i32_1 = arith.constant 0 : i32
    %c0_i32_2 = arith.constant 0 : i32
    return %c0_i32, %c0_i32_0, %c0_i32_1 : i32, i32, i32
  }
  func.func @transform_5(%arg0: i32) -> (i32, i32) {
    %c0_i32 = arith.constant 0 : i32
    %c0_i32_0 = arith.constant 0 : i32
    %c0_i32_1 = arith.constant 0 : i32
    return %c0_i32, %c0_i32_0 : i32, i32
  }
  func.func @transform_6(%arg0: i32) -> (i32, i32, i32) {
    %c0_i32 = arith.constant 0 : i32
    %c0_i32_0 = arith.constant 0 : i32
    %c0_i32_1 = arith.constant 0 : i32
    %c0_i32_2 = arith.constant 0 : i32
    return %c0_i32, %c0_i32_0, %c0_i32_1 : i32, i32, i32
  }
  func.func @transform_7(%arg0: i32) -> (i32, i32) {
    %c0_i32 = arith.constant 0 : i32
    %c0_i32_0 = arith.constant 0 : i32
    %c0_i32_1 = arith.constant 0 : i32
    return %c0_i32, %c0_i32_0 : i32, i32
  }
  func.func @transform_8(%arg0: i32) -> (i32, i32, i32) {
    %c0_i32 = arith.constant 0 : i32
    %c0_i32_0 = arith.constant 0 : i32
    %c0_i32_1 = arith.constant 0 : i32
    return %arg0, %c0_i32, %c0_i32_0 : i32, i32, i32
  }
  func.func @transform_9(%arg0: i32) -> (i32, i32, i32) {
    %c0_i32 = arith.constant 0 : i32
    %c0_i32_0 = arith.constant 0 : i32
    %c0_i32_1 = arith.constant 0 : i32
    return %arg0, %c0_i32, %c0_i32_0 : i32, i32, i32
  }
  func.func @transform_10(%arg0: i32) -> (i32, i32, i32) {
    %c0_i32 = arith.constant 0 : i32
    %c0_i32_0 = arith.constant 0 : i32
    %c0_i32_1 = arith.constant 0 : i32
    return %arg0, %c0_i32, %c0_i32_0 : i32, i32, i32
  }
  func.func @transform_11(%arg0: i32) -> (i32, i32, i32, i32) {
    %c0_i32 = arith.constant 0 : i32
    %c0_i32_0 = arith.constant 0 : i32
    %c0_i32_1 = arith.constant 0 : i32
    %c0_i32_2 = arith.constant 0 : i32
    return %arg0, %c0_i32, %c0_i32_0, %c0_i32_1 : i32, i32, i32, i32
  }
  func.func @transform_12(%arg0: i32) -> (i32, i32, i32, i32) {
    %c0_i32 = arith.constant 0 : i32
    %c0_i32_0 = arith.constant 0 : i32
    %c0_i32_1 = arith.constant 0 : i32
    %c0_i32_2 = arith.constant 0 : i32
    return %arg0, %c0_i32, %c0_i32_0, %c0_i32_1 : i32, i32, i32, i32
  }
  func.func @transform_13(%arg0: i32) -> (i32, i32, i32, i32) {
    %c0_i32 = arith.constant 0 : i32
    %c0_i32_0 = arith.constant 0 : i32
    %c0_i32_1 = arith.constant 0 : i32
    %c0_i32_2 = arith.constant 0 : i32
    return %arg0, %c0_i32, %c0_i32_0, %c0_i32_1 : i32, i32, i32, i32
  }
}

</mosaic_0001>

<bundles_post_ra>
// kernel: tpu_custom_call.1
= control target key start
LH: loop header
LB: loop body
LE: loop exit
PB: predicated region body
PF: predicated region fallthrough
CT: control target
= control target key end

     0   :  { %s11622_s0 = inlined_call_operand.vmem [shape: f32[2,32,96], index: 0, kind: input, shape index: {}]   ;;  %s11623_s1 = inlined_call_operand.vmem [shape: f32[2,32,4,8], index: 1, kind: input, shape index: {}]   ;;  %s11624_s2 = inlined_call_operand.hbm [shape: f32[2,96,128], index: 2, kind: input, shape index: {}]   ;;  %s11625_s3 = inlined_call_operand.vmem [shape: f32[1,128], index: 3, kind: input, shape index: {}]   ;;  %s11626_s4 = inlined_call_operand.vmem [shape: f32[2,128,128], index: 4, kind: input, shape index: {}]   ;;  %s11627_s5 = inlined_call_operand.vmem [shape: f32[1,128], index: 5, kind: input, shape index: {}]   ;;  %s11628_s6 = inlined_call_operand.hbm [shape: f32[2,128,128], index: 6, kind: input, shape index: {}]   ;;  %s11629_s7 = inlined_call_operand.vmem [shape: f32[1,128], index: 7, kind: input, shape index: {}]   ;;  %s11630_s8 = inlined_call_operand.hbm [shape: f32[2,16,128], index: 8, kind: output, shape index: {0}]   ;;  %s11631_s9 = inlined_call_operand.hbm [shape: f32[2,8,128], index: 9, kind: output, shape index: {1}]   ;;  %s11632_s10 = inlined_call_operand.hbm [shape: f32[2,4,128], index: 10, kind: output, shape index: {2}]   ;;  %s11633_s11 = inlined_call_operand.vmem [shape: f32[2,16,4,4], index: 11, kind: output, shape index: {3}]   ;;  %s11634_s12 = inlined_call_operand.vmem [shape: f32[2,8,4,2], index: 12, kind: output, shape index: {4}]   ;;  %s11635_s13 = inlined_call_operand.vmem [shape: f32[2,4,4,1], index: 13, kind: output, shape index: {5}]  }
   0x1   :  { %11648 = sst [smem:[#allocation21_spill]] %s11632_s10 }
   0x2   :  { %19 = vsyncpa [#allocation3], 0 }
   0x3   :  { %20 = vsyncpa [#allocation6], 0 }
   0x4   :  { %21 = vsyncpa [#allocation4], 0 }
   0x5   :  { %23 = vsyncpa [#allocation4 + $0x1], 0 }
   0x6   :  { %24 = vsyncpa [#allocation9], 0 }
   0x7   :  { %26 = vsyncpa [#allocation9 + $0x1], 0  ;;  %s9808_s25 = smov 0   ;;  %s9810_s26 = smov 0  }
   0x8   :  { %s9812_s27 = smov 0   ;;  %s9814_s28 = smov 0  }
   0x9 LB: > { %11649 = sst [smem:[#allocation15_spill]] %s9709_s25  ;;  %s9829_s29 = sadd.s32 4294967295, %s9721_s28   ;;  %s9721_s28 = sphi %s9814_s28, %s11673_s28   ;;  %s9717_s27 = sphi %s9812_s27, %s11675_s27   ;;  %s9713_s26 = sphi %s9810_s26, %s11677_s26   ;;  %s9709_s25 = sphi %s9808_s25, %s11676_s25  }
   0xa   : > { %11650 = sst [smem:[#allocation16_spill]] %s9717_s27  ;;  %s11636_s30 = sadd.s32 4294967294, %s9721_s28  }
   0xb   : > { %11651 = sst [smem:[#allocation17_spill]] %s9721_s28  ;;  %s9833_s14 = sadd.s32 1, %s9721_s28  }
   0xc   : > { %11652 = sst [smem:[#allocation18_spill]] %s9833_s14  ;;  %s217_s15 = sadd.s32 1, %s9717_s27 }
   0xd   : > { %s214_s16 = ssub.s32 %s9721_s28, %s9833_s14  ;;  %p227_p0 = scmp.ne.s32.totalorder %s9717_s27, %s9713_s26 }
   0xe   : > { %p215_p1 = scmp.eq.s32.totalorder %s214_s16, 0  ;;  %p228_p2 = scmp.eq.s32.totalorder %s9829_s29, 1 }
   0xf   : > { %p233_p3 = scmp.ne.s32.totalorder %s9713_s26, %s9709_s25  ;;  %p234_p4 = scmp.eq.s32.totalorder %s11636_s30, 1 }
  0x10   : > { %s9846_s17 = scalar_select %p215_p1, %s9717_s27, %s217_s15  }
  0x11   : > { %p9848_p5 = por %p228_p2, %p227_p0  ;;  %p9852_p6 = por %p234_p4, %p233_p3 }
  0x12   : > { %11653 = sst [smem:[#allocation19_spill]] %s9846_s17  ;;  %p5537_p7 = scmp.ge.s32.totalorder %s9721_s28, 1 }
  0x13   : > { %s11654_s18 = scalar_select %p9848_p5, 1, 0 }
  0x14   : > { %s11655_s19 = scalar_select %p9852_p6, 1, 0 }
  0x15   : > { %p371_p8 = scmp.lt.s32.totalorder %s9721_s28, 3  ;;  %p11641_p9 = scmp.eq.s32.totalorder %s9829_s29, 0 }
  0x16   : > { %11656 = sst [smem:[#allocation20_spill]] %s11655_s19  ;;  %s9723_s21 = smov [#allocation2]  }
  0x17   : > { %p9859_p10 = pnand %p5537_p7, %p371_p8  ;;  %s383_s22 = sshll.u32 %s9723_s21, 4  ;;  %s384_s22 = int_to_ptr.vmem [resolvable:$true] %s383_s22 }
  0x18   : > { %s9724_s24 = smov [#allocation5]   ;;  %s9535_s17 = scalar_lea.hbm %s11624_s2, 3072 }
  0x19   : > { %s11657_s20 = scalar_select %p9859_p10, 1, 0 }
  0x1a   : > { %p9468_p11 = pneg %p9859_p10  ;;  %s405_s15 = sshll.u32 %s9724_s24, 4  ;;  %s9871_s15 = int_to_ptr.vmem [resolvable:$true] %s405_s15 }
  0x1b   : > { %p9536_p13 = scmp.ne.s32.totalorder %s11624_s2, %s9535_s17  ;;  %p9542_p3 = scmp.lt.u32.totalorder %s9535_s17, %s11624_s2 }
  0x1c   : > { %p9867_p12 = pnand %p11641_p9, %p9468_p11 }
  0x1e   : > { %p9537_p0 = pneg %p9867_p12 }
  0x20   : > { %p9538_p1 = pnand %p9537_p0, %p9536_p13 }
  0x22   : > { %p9539_p2 = pneg %p9538_p1 }
  0x24   : > { %p9544_p4 = pnand %p9542_p3, %p9539_p2 }
  0x26   : > { %9547 = shalt.err (!%p9544_p4)
}
  0x27   : > { %s9548_s24 = scalar_lea.vmem %s384_s22, 3072  ;;  %p9556_p9 = scmp.lt.s32.totalorder %s384_s22, %s384_s22 }
  0x28   : > { %p9549_p7 = scmp.ne.s32.totalorder %s384_s22, %s9548_s24  ;;  %p9557_p6 = scmp.lt.s32.totalorder %s9548_s24, %s9548_s24 }
  0x2a   : > { %p9551_p8 = pnand %p9549_p7, %p9537_p0  ;;  %p9558_p5 = por %p9557_p6, %p9556_p9 }
  0x2c   : > { %p9552_p11 = pneg %p9551_p8 }
  0x2e   : > { %p9559_p10 = pnand %p9558_p5, %p9552_p11 }
  0x30   : > { %9562 = shalt.err (!%p9559_p10)
}
  0x31   : > { %s9725_s27 = smov 128   ;;  %s9726_s30 = smov 8  }
  0x32   : > { %9471 = dma.hbm_to_vmem [thread:$0]  (!%p9867_p12), %s11624_s2, 3072, %s384_s22, [#allocation3], %s9725_s27, %s9725_s27, %s9726_s30  }
  0x33   : > { %s9563_s21 = scalar_lea.hbm %s11628_s6, 4096 }
  0x34   : > { %p9564_p13 = scmp.ne.s32.totalorder %s11628_s6, %s9563_s21  ;;  %p9570_p9 = scmp.lt.u32.totalorder %s9563_s21, %s11628_s6 }
  0x36   : > { %p9566_p5 = pnand %p9564_p13, %p9537_p0 }
  0x38   : > { %p9567_p6 = pneg %p9566_p5 }
  0x3a   : > { %p9572_p10 = pnand %p9570_p9, %p9567_p6 }
  0x3c   : > { %9575 = shalt.err (!%p9572_p10)
}
  0x3d   : > { %s9576_s22 = scalar_lea.vmem %s9871_s15, 4096  ;;  %p9584_p4 = scmp.lt.s32.totalorder %s9871_s15, %s9871_s15 }
  0x3e   : > { %p9577_p1 = scmp.ne.s32.totalorder %s9871_s15, %s9576_s22  ;;  %p9585_p7 = scmp.lt.s32.totalorder %s9576_s22, %s9576_s22 }
  0x40   : > { %p9579_p2 = pnand %p9577_p1, %p9537_p0  ;;  %p9586_p8 = por %p9585_p7, %p9584_p4 }
  0x42   : > { %p9580_p3 = pneg %p9579_p2 }
  0x44   : > { %p9587_p11 = pnand %p9586_p8, %p9580_p3 }
  0x46   : > { %9590 = shalt.err (!%p9587_p11)
}
  0x47   : > { %9474 = dma.hbm_to_vmem [thread:$0]  (!%p9867_p12), %s11628_s6, 4096, %s9871_s15, [#allocation6], %s9725_s27, %s9725_s27, %s9726_s30  }
  0x48   : > { %p11659_p13 = scmp.ne.s32.totalorder %s11657_s20, 0 }
  0x49   : > { %p11660_p5 = scmp.eq.s32.totalorder (!%p11659_p13), %s9829_s29, 0 }
  0x4a   : > { %440 = sbr.rel (%p11659_p13) target bundleno = 1188 (0x4a4), region = 52 }
  0x51   : > { %9692 = dma.done.wait (%p11660_p5), [#allocation3], 3072   ;;  %p11661_p0 = pmov %p11660_p5 }
  0x53   : > { %9694 = vsyncadd (%p11661_p0), [#allocation3], 4294964224  ;;  %p11662_p6 = pmov %p11661_p0 }
  0x54   : > { %p11663_p9 = pmov %p11661_p0 }
  0x55   : > { %9696 = dma.done.wait (%p11662_p6), [#allocation6], 4096  }
  0x56   : > { %9698 = vsyncadd (%p11663_p9), [#allocation6], 4294963200  ;;  %v9727_v0 = vmov 0.0|0.0   ;;  %vm9728_vm0 = vmmov 0   ;;  %v9729_v1 = vmov 0.0   ;;  %p518_p12 = scmp.lt.s32.totalorder %s9829_s29, 1 }
  0x57   : > { %8302 = vmatprep.subr.bf16.mxu0 %v9727_v0  ;;  %8320 = vmatprep.subr.bf16.mxu1 %v9727_v0  ;;  %v556_v2 = vld [vmem:[#allocation2 + $0x60] sm:$0xff]  ;;  %v557_v3 = vld [vmem:[#allocation2 + $0x68] sm:$0xff]  ;;  %v558_v7 = vld [vmem:[#allocation2 + $0x70] sm:$0xff]  ;;  %vm4795_vm1 = vcmask 3072   ;;  %vm571_vm2 = vcmask 785408   ;;  %s10297_s10 = sand.u32 1, %s9713_s26  }
  0x58   : > { %6622 = vmatprep.mubr.msk.f32.mxu0 %vm9728_vm0, %v9729_v1  ;;  %6649 = vmatprep.mubr.msk.f32.mxu1 %vm9728_vm0, %v9729_v1  ;;  %v543_v4 = vld [vmem:[#allocation2] sm:$0xff]  ;;  %v9937_v5 = vpack.c.bf16 %v557_v3, %v556_v2  ;;  %v544_v6 = vld [vmem:[#allocation2 + $0x8] sm:$0xff]  ;;  %v559_v8 = vld [vmem:[#allocation2 + $0x78] sm:$0xff]  ;;  %s9940_s28 = scalar_select %p518_p12, %s9829_s29, 1  ;;  %vm4802_vm3 = vcmask 11272   ;;  %vm4809_vm4 = vcmask 19472  }
  0x59   : > { %v9942_v9 = vpack.c.bf16 %v544_v6, %v543_v4  ;;  %v545_v10 = vld [vmem:[#allocation2 + $0x10] sm:$0xff]  ;;  %v546_v11 = vld [vmem:[#allocation2 + $0x18] sm:$0xff]  ;;  %v9945_v12 = vpack.c.bf16 %v559_v8, %v558_v7  ;;  %v560_v14 = vld [vmem:[#allocation2 + $0x80] sm:$0xff]  ;;  %s9731_s14 = smov 125   ;;  %s9732_s17 = smov 126   ;;  %vm4816_vm5 = vcmask 27672  }
  0x5a   : > { %8304 = vmatpush3.bf16.msra.mxu0 %v9937_v5  ;;  %s5772_s20 = sshll.u32 %s9940_s28, 4  ;;  %v9950_v13 = vpack.c.bf16 %v546_v11, %v545_v10  ;;  %v561_v15 = vld [vmem:[#allocation2 + $0x88] sm:$0xff]  ;;  %s5769_s23 = sshll.u32 %s9940_s28, 7  ;;  %v547_v16 = vld [vmem:[#allocation2 + $0x20] sm:$0xff]  ;;  %v562_v19 = vld [vmem:[#allocation2 + $0x90] sm:$0xff] }
  0x5b   : > { %8322 = vmatpush3.bf16.msra.mxu1 %v9942_v9  ;;  %8305 = vmatprep.subr.bf16.mxu0 %v9727_v0  ;;  %v548_v17 = vld [vmem:[#allocation2 + $0x28] sm:$0xff]  ;;  %s542_s30 = scalar_lea.vmem %s11635_s13, %s5772_s20  ;;  %v9958_v18 = vpack.c.bf16 %v561_v15, %v560_v14  ;;  %v563_v20 = vld [vmem:[#allocation2 + $0x98] sm:$0xff]  ;;  %s9963_s19 = scalar_lea.vmem %s11623_s1, %s5769_s23  ;;  %v549_v22 = vld [vmem:[#allocation2 + $0x30] sm:$0xff] }
  0x5c   : > { %8323 = vmatprep.subr.bf16.mxu1 %v9727_v0  ;;  %v9967_v21 = vpack.c.bf16 %v548_v17, %v547_v16  ;;  %v5219_v23 = vld [vmem:[%s9963_s19] sm:$0xf]  ;;  %v550_v25 = vld [vmem:[#allocation2 + $0x38] sm:$0xff]  ;;  %v9979_v28 = vpack.c.bf16 %v563_v20, %v562_v19  ;;  %v565_v31 = vld [vmem:[#allocation2 + $0xa8] sm:$0xff]  ;;  %s5768_s16 = sshll.u32 %s9940_s28, 5  ;;  %s5544_s23 = sshll.u32 %s10297_s10, 4 }
  0x5d   : > { %v5753_v24 = vld [vmem:[%s9963_s19 + $0x20] sm:$0xf]  ;;  %5220 = vst.msk [vmem:[%s542_s30] sm:$0xf] %vm4795_vm1, %v5219_v23  ;;  %v9983_v29 = vpack.c.bf16 %v550_v25, %v549_v22  ;;  %v552_v33 = vld [vmem:[#allocation2 + $0x48] sm:$0xff]  ;;  %v566_v36 = vld [vmem:[#allocation2 + $0xb0] sm:$0xff]  ;;  %s10007_s22 = scalar_lea.vmem %s11622_s0, %s5768_s16 }
  0x5e   : > { %8307 = vmatpush3.bf16.msra.mxu0 %v9945_v12  ;;  %5754 = vst.msk [vmem:[%s542_s30 + $0x4] sm:$0xf] %vm4795_vm1, %v5753_v24  ;;  %v5755_v26 = vld [vmem:[%s9963_s19 + $0x40] sm:$0xf]  ;;  %v567_v37 = vld [vmem:[#allocation2 + $0xb8] sm:$0xff]  ;;  %v553_v38 = vld [vmem:[#allocation2 + $0x50] sm:$0xff] }
  0x5f   : > { %8325 = vmatpush3.bf16.msra.mxu1 %v9950_v13  ;;  %8308 = vmatprep.subr.bf16.mxu0 %v9727_v0  ;;  %v5757_v27 = vld [vmem:[%s9963_s19 + $0x60] sm:$0xf]  ;;  %5756 = vst.msk [vmem:[%s542_s30 + $0x8] sm:$0xf] %vm4795_vm1, %v5755_v26  ;;  %v554_v39 = vld [vmem:[#allocation2 + $0x58] sm:$0xff]  ;;  %v9996_v40 = vpack.c.bf16 %v567_v37, %v566_v36  ;;  %s10319_s15 = scalar_lea.vmem [#allocation7], %s5544_s23 }
  0x60   : > { %8326 = vmatprep.subr.bf16.mxu1 %v9727_v0  ;;  %5758 = vst.msk [vmem:[%s542_s30 + $0xc] sm:$0xf] %vm4795_vm1, %v5757_v27  ;;  %v564_v30 = vld [vmem:[#allocation2 + $0xa0] sm:$0xff]  ;;  %v10000_v41 = vpack.c.bf16 %v554_v39, %v553_v38  ;;  %v1175_v50 = vld [vmem:[%s10007_s22 + $0x9] sm:$0x1]  ;;  %s5545_s23 = sshll.u32 %s10297_s10, 3 }
  0x61   : > { %v551_v32 = vld [vmem:[#allocation2 + $0x40] sm:$0xff]  ;;  %v9987_v34 = vpack.c.bf16 %v565_v31, %v564_v30  ;;  %v1174_v51 = vld [vmem:[%s10007_s22 + $0x8] sm:$0x1]  ;;  %v1326_v52 = vld [vmem:[%s10007_s22 + $0xb] sm:$0x1]  ;;  %s10978_s27 = scalar_lea.vmem [#allocation8], %s5545_s23 }
  0x62   : > { %8310 = vmatpush3.bf16.msra.mxu0 %v9958_v18  ;;  %v9991_v35 = vpack.c.bf16 %v552_v33, %v551_v32  ;;  %v570_v42 = vld [vmem:[%s10007_s22 + $0x1] sm:$0x1]  ;;  %v569_v43 = vld [vmem:[%s10007_s22] sm:$0x1]  ;;  %v722_v44 = vld [vmem:[%s10007_s22 + $0x3] sm:$0x1] }
  0x63   : > { %8328 = vmatpush3.bf16.msra.mxu1 %v9967_v21  ;;  %8311 = vmatprep.subr.bf16.mxu0 %v9727_v0  ;;  %v721_v45 = vld [vmem:[%s10007_s22 + $0x2] sm:$0x1]  ;;  %v873_v46 = vld [vmem:[%s10007_s22 + $0x5] sm:$0x1]  ;;  %v872_v47 = vld [vmem:[%s10007_s22 + $0x4] sm:$0x1] }
  0x64   : > { %8329 = vmatprep.subr.bf16.mxu1 %v9727_v0  ;;  %v1024_v48 = vld [vmem:[%s10007_s22 + $0x7] sm:$0x1]  ;;  %v1023_v49 = vld [vmem:[%s10007_s22 + $0x6] sm:$0x1]  ;;  %v1325_v53 = vld [vmem:[%s10007_s22 + $0xa] sm:$0x1] }
  0x65   : > { %v1477_v54 = vld [vmem:[%s10007_s22 + $0xd] sm:$0x1]  ;;  %v1476_v55 = vld [vmem:[%s10007_s22 + $0xc] sm:$0x1]  ;;  %v1628_v56 = vld [vmem:[%s10007_s22 + $0xf] sm:$0x1] }
  0x66   : > { %8313 = vmatpush3.bf16.msra.mxu0 %v9979_v28  ;;  %v1627_v57 = vld [vmem:[%s10007_s22 + $0xe] sm:$0x1]  ;;  %v1779_v58 = vld [vmem:[%s10007_s22 + $0x11] sm:$0x1]  ;;  %v1778_v59 = vld [vmem:[%s10007_s22 + $0x10] sm:$0x1] }
  0x67   : > { %8331 = vmatpush3.bf16.msra.mxu1 %v9983_v29  ;;  %8314 = vmatprep.subr.bf16.mxu0 %v9727_v0  ;;  %v10304_v61 = vld [vmem:[%s11625_s3] sm:$0x1]  ;;  %v1930_v4 = vld [vmem:[%s10007_s22 + $0x13] sm:$0x1]  ;;  %v1929_v6 = vld [vmem:[%s10007_s22 + $0x12] sm:$0x1] }
  0x68   : > { %8332 = vmatprep.subr.bf16.mxu1 %v9727_v0  ;;  %v2081_v17 = vld [vmem:[%s10007_s22 + $0x15] sm:$0x1]  ;;  %v2080_v19 = vld [vmem:[%s10007_s22 + $0x14] sm:$0x1]  ;;  %v2232_v30 = vld [vmem:[%s10007_s22 + $0x17] sm:$0x1] }
  0x69   : > { %v2231_v31 = vld [vmem:[%s10007_s22 + $0x16] sm:$0x1]  ;;  %s9730_s30 = smov 127   ;;  %s5770_s21 = sshll.u32 %s9940_s28, 6 }
  0x6a   : > { %8316 = vmatpush3.bf16.msra.mxu0 %v9987_v34  ;;  %s11280_s25 = scalar_lea.vmem %s11633_s11, %s5770_s21  ;;  %s5235_s28 = sand.u32 1, %s9829_s29  }
  0x6b   : > { %8334 = vmatpush3.bf16.msra.mxu1 %v9991_v35  ;;  %8317 = vmatprep.subr.bf16.mxu0 %v9727_v0  ;;  %s5285_s23 = sshll.u32 %s10978_s27, 4  ;;  %p11664_p1 = scmp.ne.s32.totalorder %s11654_s18, 0  ;;  %s11511_s23 = int_to_ptr.vmem [resolvable:$true] %s5285_s23 }
  0x6c   : > { %8335 = vmatprep.subr.bf16.mxu1 %v9727_v0  ;;  %s9733_s21 = smov [#allocation8]  }
  0x6e   : > { %8319 = vmatpush3.bf16.msra.mxu0 %v9996_v40 }
  0x6f   : > { %8337 = vmatpush3.bf16.msra.mxu1 %v10000_v41  ;;  %8338 = vmatprep.subr.bf16.mxu0 %v9727_v0 }
  0x70   : > { %8356 = vmatprep.subr.bf16.mxu1 %v9727_v0 }
  0x71   : > { %6623 = vmatmul.mubr.msk.f32.vlgmr.msra.gmra.mrb[0].mxu0 %vm571_vm2, %v570_v42 }
  0x72   : > { %6650 = vmatmul.mubr.msk.f32.vlgmr.msra.gmra.mrb[0].mxu1 %vm571_vm2, %v569_v43  ;;  %8340 = vmatpush3.bf16.msra.mxu0 %v9937_v5  ;;  %v2383_v43 = vld [vmem:[%s10007_s22 + $0x19] sm:$0x1] }
  0x73   : > { %8358 = vmatpush3.bf16.msra.mxu1 %v9942_v9  ;;  %8341 = vmatprep.subr.bf16.mxu0 %v9727_v0 }
  0x74   : > { %8359 = vmatprep.subr.bf16.mxu1 %v9727_v0  ;;  %6676 = vmatprep.mubr.msk.f32.mxu0 %vm9728_vm0, %v9729_v1 }
  0x75   : > { %6703 = vmatprep.mubr.msk.f32.mxu1 %vm9728_vm0, %v9729_v1 }
  0x76   : > { %8343 = vmatpush3.bf16.msra.mxu0 %v9945_v12 }
  0x77   : > { %8361 = vmatpush3.bf16.msra.mxu1 %v9950_v13  ;;  %8344 = vmatprep.subr.bf16.mxu0 %v9727_v0 }
  0x78   : > { %8362 = vmatprep.subr.bf16.mxu1 %v9727_v0 }
  0x7a   : > { %8346 = vmatpush3.bf16.msra.mxu0 %v9958_v18 }
  0x7b   : > { %8364 = vmatpush3.bf16.msra.mxu1 %v9967_v21  ;;  %8347 = vmatprep.subr.bf16.mxu0 %v9727_v0 }
  0x7c   : > { %8365 = vmatprep.subr.bf16.mxu1 %v9727_v0 }
  0x7e   : > { %8349 = vmatpush3.bf16.msra.mxu0 %v9979_v28 }
  0x7f   : > { %8367 = vmatpush3.bf16.msra.mxu1 %v9983_v29  ;;  %8350 = vmatprep.subr.bf16.mxu0 %v9727_v0 }
  0x80   : > { %8368 = vmatprep.subr.bf16.mxu1 %v9727_v0 }
  0x82   : > { %8352 = vmatpush3.bf16.msra.mxu0 %v9987_v34 }
  0x83   : > { %8370 = vmatpush3.bf16.msra.mxu1 %v9991_v35  ;;  %8353 = vmatprep.subr.bf16.mxu0 %v9727_v0 }
  0x84   : > { %8371 = vmatprep.subr.bf16.mxu1 %v9727_v0 }
  0x86   : > { %8355 = vmatpush3.bf16.msra.mxu0 %v9996_v40 }
  0x87   : > { %8373 = vmatpush3.bf16.msra.mxu1 %v10000_v41  ;;  %8374 = vmatprep.subr.bf16.mxu0 %v9727_v0 }
  0x88   : > { %8392 = vmatprep.subr.bf16.mxu1 %v9727_v0 }
  0x89   : > { %6677 = vmatmul.mubr.msk.f32.vlgmr.msra.gmra.mrb[2].mxu0 %vm571_vm2, %v722_v44  ;;  %v2382_v44 = vld [vmem:[%s10007_s22 + $0x18] sm:$0x1] }
  0x8a   : > { %6704 = vmatmul.mubr.msk.f32.vlgmr.msra.gmra.mrb[2].mxu1 %vm571_vm2, %v721_v45  ;;  %8376 = vmatpush3.bf16.msra.mxu0 %v9937_v5 }
  0x8b   : > { %8394 = vmatpush3.bf16.msra.mxu1 %v9942_v9  ;;  %8377 = vmatprep.subr.bf16.mxu0 %v9727_v0 }
  0x8c   : > { %8395 = vmatprep.subr.bf16.mxu1 %v9727_v0  ;;  %6730 = vmatprep.mubr.msk.f32.mxu0 %vm9728_vm0, %v9729_v1 }
  0x8d   : > { %6757 = vmatprep.mubr.msk.f32.mxu1 %vm9728_vm0, %v9729_v1 }
  0x8e   : > { %8379 = vmatpush3.bf16.msra.mxu0 %v9945_v12 }
  0x8f   : > { %8397 = vmatpush3.bf16.msra.mxu1 %v9950_v13  ;;  %8380 = vmatprep.subr.bf16.mxu0 %v9727_v0 }
  0x90   : > { %8398 = vmatprep.subr.bf16.mxu1 %v9727_v0 }
  0x92   : > { %8382 = vmatpush3.bf16.msra.mxu0 %v9958_v18 }
  0x93   : > { %8400 = vmatpush3.bf16.msra.mxu1 %v9967_v21  ;;  %8383 = vmatprep.subr.bf16.mxu0 %v9727_v0 }
  0x94   : > { %8401 = vmatprep.subr.bf16.mxu1 %v9727_v0 }
  0x96   : > { %8385 = vmatpush3.bf16.msra.mxu0 %v9979_v28 }
  0x97   : > { %8403 = vmatpush3.bf16.msra.mxu1 %v9983_v29  ;;  %8386 = vmatprep.subr.bf16.mxu0 %v9727_v0 }
  0x98   : > { %8404 = vmatprep.subr.bf16.mxu1 %v9727_v0 }
  0x9a   : > { %8388 = vmatpush3.bf16.msra.mxu0 %v9987_v34 }
  0x9b   : > { %8406 = vmatpush3.bf16.msra.mxu1 %v9991_v35  ;;  %8389 = vmatprep.subr.bf16.mxu0 %v9727_v0 }
  0x9c   : > { %8407 = vmatprep.subr.bf16.mxu1 %v9727_v0 }
  0x9e   : > { %8391 = vmatpush3.bf16.msra.mxu0 %v9996_v40 }
  0x9f   : > { %8409 = vmatpush3.bf16.msra.mxu1 %v10000_v41  ;;  %8410 = vmatprep.subr.bf16.mxu0 %v9727_v0 }
  0xa0   : > { %8428 = vmatprep.subr.bf16.mxu1 %v9727_v0 }
  0xa1   : > { %6731 = vmatmul.mubr.msk.f32.vlgmr.msra.gmra.mrb[4].mxu0 %vm571_vm2, %v873_v46 }
  0xa2   : > { %6758 = vmatmul.mubr.msk.f32.vlgmr.msra.gmra.mrb[4].mxu1 %vm571_vm2, %v872_v47  ;;  %8412 = vmatpush3.bf16.msra.mxu0 %v9937_v5 }
  0xa3   : > { %8430 = vmatpush3.bf16.msra.mxu1 %v9942_v9  ;;  %8413 = vmatprep.subr.bf16.mxu0 %v9727_v0 }
  0xa4   : > { %8431 = vmatprep.subr.bf16.mxu1 %v9727_v0  ;;  %6784 = vmatprep.mubr.msk.f32.mxu0 %vm9728_vm0, %v9729_v1 }
  0xa5   : > { %6811 = vmatprep.mubr.msk.f32.mxu1 %vm9728_vm0, %v9729_v1 }
  0xa6   : > { %8415 = vmatpush3.bf16.msra.mxu0 %v9945_v12 }
  0xa7   : > { %8433 = vmatpush3.bf16.msra.mxu1 %v9950_v13  ;;  %8416 = vmatprep.subr.bf16.mxu0 %v9727_v0 }
  0xa8   : > { %8434 = vmatprep.subr.bf16.mxu1 %v9727_v0 }
  0xaa   : > { %8418 = vmatpush3.bf16.msra.mxu0 %v9958_v18 }
  0xab   : > { %8436 = vmatpush3.bf16.msra.mxu1 %v9967_v21  ;;  %8419 = vmatprep.subr.bf16.mxu0 %v9727_v0 }
  0xac   : > { %8437 = vmatprep.subr.bf16.mxu1 %v9727_v0 }
  0xae   : > { %8421 = vmatpush3.bf16.msra.mxu0 %v9979_v28 }
  0xaf   : > { %8439 = vmatpush3.bf16.msra.mxu1 %v9983_v29  ;;  %8422 = vmatprep.subr.bf16.mxu0 %v9727_v0 }
  0xb0   : > { %8440 = vmatprep.subr.bf16.mxu1 %v9727_v0 }
  0xb2   : > { %8424 = vmatpush3.bf16.msra.mxu0 %v9987_v34 }
  0xb3   : > { %8442 = vmatpush3.bf16.msra.mxu1 %v9991_v35  ;;  %8425 = vmatprep.subr.bf16.mxu0 %v9727_v0 }
  0xb4   : > { %8443 = vmatprep.subr.bf16.mxu1 %v9727_v0 }
  0xb6   : > { %8427 = vmatpush3.bf16.msra.mxu0 %v9996_v40 }
  0xb7   : > { %8445 = vmatpush3.bf16.msra.mxu1 %v10000_v41  ;;  %8446 = vmatprep.subr.bf16.mxu0 %v9727_v0 }
  0xb8   : > { %8464 = vmatprep.subr.bf16.mxu1 %v9727_v0 }
  0xb9   : > { %6785 = vmatmul.mubr.msk.f32.vlgmr.msra.gmra.mrb[6].mxu0 %vm571_vm2, %v1024_v48 }
  0xba   : > { %6812 = vmatmul.mubr.msk.f32.vlgmr.msra.gmra.mrb[6].mxu1 %vm571_vm2, %v1023_v49  ;;  %8448 = vmatpush3.bf16.msra.mxu0 %v9937_v5 }
  0xbb   : > { %8466 = vmatpush3.bf16.msra.mxu1 %v9942_v9  ;;  %8449 = vmatprep.subr.bf16.mxu0 %v9727_v0 }
  0xbc   : > { %8467 = vmatprep.subr.bf16.mxu1 %v9727_v0  ;;  %6838 = vmatprep.mubr.msk.f32.mxu0 %vm9728_vm0, %v9729_v1 }
  0xbd   : > { %6865 = vmatprep.mubr.msk.f32.mxu1 %vm9728_vm0, %v9729_v1 }
  0xbe   : > { %8451 = vmatpush3.bf16.msra.mxu0 %v9945_v12 }
  0xbf   : > { %8469 = vmatpush3.bf16.msra.mxu1 %v9950_v13  ;;  %8452 = vmatprep.subr.bf16.mxu0 %v9727_v0 }
  0xc0   : > { %8470 = vmatprep.subr.bf16.mxu1 %v9727_v0 }
  0xc2   : > { %8454 = vmatpush3.bf16.msra.mxu0 %v9958_v18 }
  0xc3   : > { %8472 = vmatpush3.bf16.msra.mxu1 %v9967_v21  ;;  %8455 = vmatprep.subr.bf16.mxu0 %v9727_v0 }
  0xc4   : > { %8473 = vmatprep.subr.bf16.mxu1 %v9727_v0 }
  0xc6   : > { %8457 = vmatpush3.bf16.msra.mxu0 %v9979_v28 }
  0xc7   : > { %8475 = vmatpush3.bf16.msra.mxu1 %v9983_v29  ;;  %8458 = vmatprep.subr.bf16.mxu0 %v9727_v0 }
  0xc8   : > { %8476 = vmatprep.subr.bf16.mxu1 %v9727_v0 }
  0xca   : > { %8460 = vmatpush3.bf16.msra.mxu0 %v9987_v34 }
  0xcb   : > { %8478 = vmatpush3.bf16.msra.mxu1 %v9991_v35  ;;  %8461 = vmatprep.subr.bf16.mxu0 %v9727_v0 }
  0xcc   : > { %8479 = vmatprep.subr.bf16.mxu1 %v9727_v0 }
  0xce   : > { %8463 = vmatpush3.bf16.msra.mxu0 %v9996_v40 }
  0xcf   : > { %8481 = vmatpush3.bf16.msra.mxu1 %v10000_v41  ;;  %8482 = vmatprep.subr.bf16.mxu0 %v9727_v0 }
  0xd0   : > { %8500 = vmatprep.subr.bf16.mxu1 %v9727_v0 }
  0xd1   : > { %6839 = vmatmul.mubr.msk.f32.vlgmr.msra.gmra.mrb[8].mxu0 %vm571_vm2, %v1175_v50 }
  0xd2   : > { %6866 = vmatmul.mubr.msk.f32.vlgmr.msra.gmra.mrb[8].mxu1 %vm571_vm2, %v1174_v51  ;;  %8484 = vmatpush3.bf16.msra.mxu0 %v9937_v5 }
  0xd3   : > { %8502 = vmatpush3.bf16.msra.mxu1 %v9942_v9  ;;  %8485 = vmatprep.subr.bf16.mxu0 %v9727_v0 }
  0xd4   : > { %8503 = vmatprep.subr.bf16.mxu1 %v9727_v0  ;;  %6892 = vmatprep.mubr.msk.f32.mxu0 %vm9728_vm0, %v9729_v1 }
  0xd5   : > { %6919 = vmatprep.mubr.msk.f32.mxu1 %vm9728_vm0, %v9729_v1 }
  0xd6   : > { %8487 = vmatpush3.bf16.msra.mxu0 %v9945_v12 }
  0xd7   : > { %8505 = vmatpush3.bf16.msra.mxu1 %v9950_v13  ;;  %8488 = vmatprep.subr.bf16.mxu0 %v9727_v0 }
  0xd8   : > { %8506 = vmatprep.subr.bf16.mxu1 %v9727_v0 }
  0xda   : > { %8490 = vmatpush3.bf16.msra.mxu0 %v9958_v18 }
  0xdb   : > { %8508 = vmatpush3.bf16.msra.mxu1 %v9967_v21  ;;  %8491 = vmatprep.subr.bf16.mxu0 %v9727_v0 }
  0xdc   : > { %8509 = vmatprep.subr.bf16.mxu1 %v9727_v0 }
  0xde   : > { %8493 = vmatpush3.bf16.msra.mxu0 %v9979_v28 }
  0xdf   : > { %8511 = vmatpush3.bf16.msra.mxu1 %v9983_v29  ;;  %8494 = vmatprep.subr.bf16.mxu0 %v9727_v0 }
  0xe0   : > { %8512 = vmatprep.subr.bf16.mxu1 %v9727_v0 }
  0xe2   : > { %8496 = vmatpush3.bf16.msra.mxu0 %v9987_v34 }
  0xe3   : > { %8514 = vmatpush3.bf16.msra.mxu1 %v9991_v35  ;;  %8497 = vmatprep.subr.bf16.mxu0 %v9727_v0 }
  0xe4   : > { %8515 = vmatprep.subr.bf16.mxu1 %v9727_v0 }
  0xe6   : > { %8499 = vmatpush3.bf16.msra.mxu0 %v9996_v40 }
  0xe7   : > { %8517 = vmatpush3.bf16.msra.mxu1 %v10000_v41  ;;  %8518 = vmatprep.subr.bf16.mxu0 %v9727_v0 }
  0xe8   : > { %8536 = vmatprep.subr.bf16.mxu1 %v9727_v0 }
  0xe9   : > { %6893 = vmatmul.mubr.msk.f32.vlgmr.msra.gmra.mrb[10].mxu0 %vm571_vm2, %v1326_v52  ;;  %v2534_v52 = vld [vmem:[%s10007_s22 + $0x1b] sm:$0x1] }
  0xea   : > { %6920 = vmatmul.mubr.msk.f32.vlgmr.msra.gmra.mrb[10].mxu1 %vm571_vm2, %v1325_v53  ;;  %8520 = vmatpush3.bf16.msra.mxu0 %v9937_v5  ;;  %v2533_v53 = vld [vmem:[%s10007_s22 + $0x1a] sm:$0x1] }
  0xeb   : > { %8538 = vmatpush3.bf16.msra.mxu1 %v9942_v9  ;;  %8521 = vmatprep.subr.bf16.mxu0 %v9727_v0 }
  0xec   : > { %8539 = vmatprep.subr.bf16.mxu1 %v9727_v0  ;;  %6946 = vmatprep.mubr.msk.f32.mxu0 %vm9728_vm0, %v9729_v1 }
  0xed   : > { %6973 = vmatprep.mubr.msk.f32.mxu1 %vm9728_vm0, %v9729_v1 }
  0xee   : > { %8523 = vmatpush3.bf16.msra.mxu0 %v9945_v12 }
  0xef   : > { %8541 = vmatpush3.bf16.msra.mxu1 %v9950_v13  ;;  %8524 = vmatprep.subr.bf16.mxu0 %v9727_v0 }
  0xf0   : > { %8542 = vmatprep.subr.bf16.mxu1 %v9727_v0 }
  0xf2   : > { %8526 = vmatpush3.bf16.msra.mxu0 %v9958_v18 }
  0xf3   : > { %8544 = vmatpush3.bf16.msra.mxu1 %v9967_v21  ;;  %8527 = vmatprep.subr.bf16.mxu0 %v9727_v0 }
  0xf4   : > { %8545 = vmatprep.subr.bf16.mxu1 %v9727_v0 }
  0xf6   : > { %8529 = vmatpush3.bf16.msra.mxu0 %v9979_v28 }
  0xf7   : > { %8547 = vmatpush3.bf16.msra.mxu1 %v9983_v29  ;;  %8530 = vmatprep.subr.bf16.mxu0 %v9727_v0 }
  0xf8   : > { %8548 = vmatprep.subr.bf16.mxu1 %v9727_v0 }
  0xfa   : > { %8532 = vmatpush3.bf16.msra.mxu0 %v9987_v34 }
  0xfb   : > { %8550 = vmatpush3.bf16.msra.mxu1 %v9991_v35  ;;  %8533 = vmatprep.subr.bf16.mxu0 %v9727_v0 }
  0xfc   : > { %8551 = vmatprep.subr.bf16.mxu1 %v9727_v0 }
  0xfe   : > { %8535 = vmatpush3.bf16.msra.mxu0 %v9996_v40 }
  0xff   : > { %8553 = vmatpush3.bf16.msra.mxu1 %v10000_v41  ;;  %8554 = vmatprep.subr.bf16.mxu0 %v9727_v0 }
 0x100   : > { %8572 = vmatprep.subr.bf16.mxu1 %v9727_v0 }
 0x101   : > { %6947 = vmatmul.mubr.msk.f32.vlgmr.msra.gmra.mrb[12].mxu0 %vm571_vm2, %v1477_v54 }
 0x102   : > { %6974 = vmatmul.mubr.msk.f32.vlgmr.msra.gmra.mrb[12].mxu1 %vm571_vm2, %v1476_v55  ;;  %8556 = vmatpush3.bf16.msra.mxu0 %v9937_v5 }
 0x103   : > { %8574 = vmatpush3.bf16.msra.mxu1 %v9942_v9  ;;  %8557 = vmatprep.subr.bf16.mxu0 %v9727_v0 }
 0x104   : > { %8575 = vmatprep.subr.bf16.mxu1 %v9727_v0  ;;  %7000 = vmatprep.mubr.msk.f32.mxu0 %vm9728_vm0, %v9729_v1 }
 0x105   : > { %7027 = vmatprep.mubr.msk.f32.mxu1 %vm9728_vm0, %v9729_v1 }
 0x106   : > { %8559 = vmatpush3.bf16.msra.mxu0 %v9945_v12 }
 0x107   : > { %8577 = vmatpush3.bf16.msra.mxu1 %v9950_v13  ;;  %8560 = vmatprep.subr.bf16.mxu0 %v9727_v0 }
 0x108   : > { %8578 = vmatprep.subr.bf16.mxu1 %v9727_v0 }
 0x10a   : > { %8562 = vmatpush3.bf16.msra.mxu0 %v9958_v18 }
 0x10b   : > { %8580 = vmatpush3.bf16.msra.mxu1 %v9967_v21  ;;  %8563 = vmatprep.subr.bf16.mxu0 %v9727_v0 }
 0x10c   : > { %8581 = vmatprep.subr.bf16.mxu1 %v9727_v0 }
 0x10e   : > { %8565 = vmatpush3.bf16.msra.mxu0 %v9979_v28 }
 0x10f   : > { %8583 = vmatpush3.bf16.msra.mxu1 %v9983_v29  ;;  %8566 = vmatprep.subr.bf16.mxu0 %v9727_v0 }
 0x110   : > { %8584 = vmatprep.subr.bf16.mxu1 %v9727_v0 }
 0x112   : > { %8568 = vmatpush3.bf16.msra.mxu0 %v9987_v34 }
 0x113   : > { %8586 = vmatpush3.bf16.msra.mxu1 %v9991_v35  ;;  %8569 = vmatprep.subr.bf16.mxu0 %v9727_v0 }
 0x114   : > { %8587 = vmatprep.subr.bf16.mxu1 %v9727_v0 }
 0x116   : > { %8571 = vmatpush3.bf16.msra.mxu0 %v9996_v40 }
 0x117   : > { %8589 = vmatpush3.bf16.msra.mxu1 %v10000_v41  ;;  %8590 = vmatprep.subr.bf16.mxu0 %v9727_v0 }
 0x118   : > { %8608 = vmatprep.subr.bf16.mxu1 %v9727_v0 }
 0x119   : > { %7001 = vmatmul.mubr.msk.f32.vlgmr.msra.gmra.mrb[14].mxu0 %vm571_vm2, %v1628_v56 }
 0x11a   : > { %7028 = vmatmul.mubr.msk.f32.vlgmr.msra.gmra.mrb[14].mxu1 %vm571_vm2, %v1627_v57  ;;  %8592 = vmatpush3.bf16.msra.mxu0 %v9937_v5 }
 0x11b   : > { %8610 = vmatpush3.bf16.msra.mxu1 %v9942_v9  ;;  %8593 = vmatprep.subr.bf16.mxu0 %v9727_v0 }
 0x11c   : > { %8611 = vmatprep.subr.bf16.mxu1 %v9727_v0  ;;  %7054 = vmatprep.mubr.msk.f32.mxu0 %vm9728_vm0, %v9729_v1 }
 0x11d   : > { %7081 = vmatprep.mubr.msk.f32.mxu1 %vm9728_vm0, %v9729_v1 }
 0x11e   : > { %8595 = vmatpush3.bf16.msra.mxu0 %v9945_v12 }
 0x11f   : > { %8613 = vmatpush3.bf16.msra.mxu1 %v9950_v13  ;;  %8596 = vmatprep.subr.bf16.mxu0 %v9727_v0 }
 0x120   : > { %8614 = vmatprep.subr.bf16.mxu1 %v9727_v0 }
 0x122   : > { %8598 = vmatpush3.bf16.msra.mxu0 %v9958_v18 }
 0x123   : > { %8616 = vmatpush3.bf16.msra.mxu1 %v9967_v21  ;;  %8599 = vmatprep.subr.bf16.mxu0 %v9727_v0 }
 0x124   : > { %8617 = vmatprep.subr.bf16.mxu1 %v9727_v0 }
 0x126   : > { %8601 = vmatpush3.bf16.msra.mxu0 %v9979_v28 }
 0x127   : > { %8619 = vmatpush3.bf16.msra.mxu1 %v9983_v29  ;;  %8602 = vmatprep.subr.bf16.mxu0 %v9727_v0 }
 0x128   : > { %8620 = vmatprep.subr.bf16.mxu1 %v9727_v0 }
 0x12a   : > { %8604 = vmatpush3.bf16.msra.mxu0 %v9987_v34 }
 0x12b   : > { %8622 = vmatpush3.bf16.msra.mxu1 %v9991_v35  ;;  %8605 = vmatprep.subr.bf16.mxu0 %v9727_v0 }
 0x12c   : > { %8623 = vmatprep.subr.bf16.mxu1 %v9727_v0 }
 0x12e   : > { %8607 = vmatpush3.bf16.msra.mxu0 %v9996_v40 }
 0x12f   : > { %8625 = vmatpush3.bf16.msra.mxu1 %v10000_v41  ;;  %8626 = vmatprep.subr.bf16.mxu0 %v9727_v0 }
 0x130   : > { %8644 = vmatprep.subr.bf16.mxu1 %v9727_v0 }
 0x131   : > { %7055 = vmatmul.mubr.msk.f32.vlgmr.msra.gmra.mrb[16].mxu0 %vm571_vm2, %v1779_v58 }
 0x132   : > { %7082 = vmatmul.mubr.msk.f32.vlgmr.msra.gmra.mrb[16].mxu1 %vm571_vm2, %v1778_v59  ;;  %8628 = vmatpush3.bf16.msra.mxu0 %v9937_v5 }
 0x133   : > { %8646 = vmatpush3.bf16.msra.mxu1 %v9942_v9  ;;  %8629 = vmatprep.subr.bf16.mxu0 %v9727_v0 }
 0x134   : > { %8647 = vmatprep.subr.bf16.mxu1 %v9727_v0  ;;  %7108 = vmatprep.mubr.msk.f32.mxu0 %vm9728_vm0, %v9729_v1 }
 0x135   : > { %7135 = vmatprep.mubr.msk.f32.mxu1 %vm9728_vm0, %v9729_v1 }
 0x136   : > { %8631 = vmatpush3.bf16.msra.mxu0 %v9945_v12 }
 0x137   : > { %8649 = vmatpush3.bf16.msra.mxu1 %v9950_v13  ;;  %8632 = vmatprep.subr.bf16.mxu0 %v9727_v0 }
 0x138   : > { %8650 = vmatprep.subr.bf16.mxu1 %v9727_v0 }
 0x13a   : > { %8634 = vmatpush3.bf16.msra.mxu0 %v9958_v18 }
 0x13b   : > { %8652 = vmatpush3.bf16.msra.mxu1 %v9967_v21  ;;  %8635 = vmatprep.subr.bf16.mxu0 %v9727_v0 }
 0x13c   : > { %8653 = vmatprep.subr.bf16.mxu1 %v9727_v0 }
 0x13e   : > { %8637 = vmatpush3.bf16.msra.mxu0 %v9979_v28 }
 0x13f   : > { %8655 = vmatpush3.bf16.msra.mxu1 %v9983_v29  ;;  %8638 = vmatprep.subr.bf16.mxu0 %v9727_v0 }
 0x140   : > { %8656 = vmatprep.subr.bf16.mxu1 %v9727_v0 }
 0x142   : > { %8640 = vmatpush3.bf16.msra.mxu0 %v9987_v34 }
 0x143   : > { %8658 = vmatpush3.bf16.msra.mxu1 %v9991_v35  ;;  %8641 = vmatprep.subr.bf16.mxu0 %v9727_v0 }
 0x144   : > { %v641_v60 = vpop.f32.mrb[0].mxu0  ;;  %8659 = vmatprep.subr.bf16.mxu1 %v9727_v0 }
 0x145   : > { %v714_v62 = vpop.f32.mrb[0].mxu1  ;;  %v6624_v63 = vpop.f32.mrb[1].mxu0 }
 0x146   : > { %v715_v2 = vadd.f32 %v714_v62, %v641_v60  ;;  %v6651_v3 = vpop.f32.mrb[1].mxu1  ;;  %8643 = vmatpush3.bf16.msra.mxu0 %v9996_v40  ;;  %v2685_v62 = vld [vmem:[%s10007_s22 + $0x1d] sm:$0x1]  ;;  %v2684_v63 = vld [vmem:[%s10007_s22 + $0x1c] sm:$0x1] }
 0x147   : > { %8661 = vmatpush3.bf16.msra.mxu1 %v10000_v41  ;;  %8662 = vmatprep.subr.bf16.mxu0 %v9727_v0 }
 0x148   : > { %v718_v7 = vadd.f32 %v715_v2, %v10304_v61  ;;  %8680 = vmatprep.subr.bf16.mxu1 %v9727_v0 }
 0x149   : > { %7109 = vmatmul.mubr.msk.f32.vlgmr.msra.gmra.mrb[18].mxu0 %vm571_vm2, %v1930_v4 }
 0x14a   : > { %v719_v8 = vmax.f32 %v718_v7, 0.0  ;;  %7136 = vmatmul.mubr.msk.f32.vlgmr.msra.gmra.mrb[18].mxu1 %vm571_vm2, %v1929_v6  ;;  %8664 = vmatpush3.bf16.msra.mxu0 %v9937_v5  ;;  %v2835_v6 = vld [vmem:[%s10007_s22 + $0x1e] sm:$0x1] }
 0x14b   : > { %8682 = vmatpush3.bf16.msra.mxu1 %v9942_v9  ;;  %8665 = vmatprep.subr.bf16.mxu0 %v9727_v0 }
 0x14c   : > { %720 = vst [vmem:[%s10319_s15] sm:$0x1] %v719_v8  ;;  %8683 = vmatprep.subr.bf16.mxu1 %v9727_v0  ;;  %7162 = vmatprep.mubr.msk.f32.mxu0 %vm9728_vm0, %v9729_v1  ;;  %v5591_v8 = vld [vmem:[%s11626_s4 + $0x90] sm:$0xff] }
 0x14d   : > { %7189 = vmatprep.mubr.msk.f32.mxu1 %vm9728_vm0, %v9729_v1 }
 0x14e   : > { %8667 = vmatpush3.bf16.msra.mxu0 %v9945_v12 }
 0x14f   : > { %8685 = vmatpush3.bf16.msra.mxu1 %v9950_v13  ;;  %8668 = vmatprep.subr.bf16.mxu0 %v9727_v0 }
 0x150   : > { %8686 = vmatprep.subr.bf16.mxu1 %v9727_v0 }
 0x152   : > { %8670 = vmatpush3.bf16.msra.mxu0 %v9958_v18 }
 0x153   : > { %8688 = vmatpush3.bf16.msra.mxu1 %v9967_v21  ;;  %8671 = vmatprep.subr.bf16.mxu0 %v9727_v0 }
 0x154   : > { %8689 = vmatprep.subr.bf16.mxu1 %v9727_v0 }
 0x156   : > { %8673 = vmatpush3.bf16.msra.mxu0 %v9979_v28 }
 0x157   : > { %8691 = vmatpush3.bf16.msra.mxu1 %v9983_v29  ;;  %8674 = vmatprep.subr.bf16.mxu0 %v9727_v0 }
 0x158   : > { %8692 = vmatprep.subr.bf16.mxu1 %v9727_v0 }
 0x15a   : > { %8676 = vmatpush3.bf16.msra.mxu0 %v9987_v34 }
 0x15b   : > { %8694 = vmatpush3.bf16.msra.mxu1 %v9991_v35  ;;  %8677 = vmatprep.subr.bf16.mxu0 %v9727_v0 }
 0x15c   : > { %v792_v10 = vpop.f32.mrb[2].mxu0  ;;  %8695 = vmatprep.subr.bf16.mxu1 %v9727_v0 }
 0x15d   : > { %v865_v11 = vpop.f32.mrb[2].mxu1  ;;  %v6678_v14 = vpop.f32.mrb[3].mxu0 }
 0x15e   : > { %v866_v15 = vadd.f32 %v865_v11, %v792_v10  ;;  %v6705_v16 = vpop.f32.mrb[3].mxu1  ;;  %8679 = vmatpush3.bf16.msra.mxu0 %v9996_v40  ;;  %v5592_v10 = vld [vmem:[%s11626_s4 + $0x98] sm:$0xff] }
 0x15f   : > { %8697 = vmatpush3.bf16.msra.mxu1 %v10000_v41  ;;  %8698 = vmatprep.subr.bf16.mxu0 %v9727_v0  ;;  %v2989_v11 = vld [vmem:[%s11626_s4 + $0x18] sm:$0xff] }
 0x160   : > { %v869_v20 = vadd.f32 %v866_v15, %v10304_v61  ;;  %8716 = vmatprep.subr.bf16.mxu1 %v9727_v0  ;;  %v10551_v15 = vpack.c.bf16 %v5592_v10, %v5591_v8 }
 0x161   : > { %7163 = vmatmul.mubr.msk.f32.vlgmr.msra.gmra.mrb[20].mxu0 %vm571_vm2, %v2081_v17  ;;  %v5593_v17 = vld [vmem:[%s11626_s4 + $0xa0] sm:$0xff] }
 0x162   : > { %v870_v22 = vmax.f32 %v869_v20, 0.0  ;;  %7190 = vmatmul.mubr.msk.f32.vlgmr.msra.gmra.mrb[20].mxu1 %vm571_vm2, %v2080_v19  ;;  %8700 = vmatpush3.bf16.msra.mxu0 %v9937_v5  ;;  %v5594_v19 = vld [vmem:[%s11626_s4 + $0xa8] sm:$0xff]  ;;  %v2990_v20 = vld [vmem:[%s11626_s4 + $0x20] sm:$0xff] }
 0x163   : > { %8718 = vmatpush3.bf16.msra.mxu1 %v9942_v9  ;;  %8701 = vmatprep.subr.bf16.mxu0 %v9727_v0 }
 0x164   : > { %871 = vst [vmem:[%s10319_s15 + $0x1] sm:$0x1] %v870_v22  ;;  %8719 = vmatprep.subr.bf16.mxu1 %v9727_v0  ;;  %7216 = vmatprep.mubr.msk.f32.mxu0 %vm9728_vm0, %v9729_v1  ;;  %v2991_v22 = vld [vmem:[%s11626_s4 + $0x28] sm:$0xff] }
 0x165   : > { %7243 = vmatprep.mubr.msk.f32.mxu1 %vm9728_vm0, %v9729_v1 }
 0x166   : > { %8703 = vmatpush3.bf16.msra.mxu0 %v9945_v12 }
 0x167   : > { %8721 = vmatpush3.bf16.msra.mxu1 %v9950_v13  ;;  %8704 = vmatprep.subr.bf16.mxu0 %v9727_v0 }
 0x168   : > { %8722 = vmatprep.subr.bf16.mxu1 %v9727_v0 }
 0x16a   : > { %8706 = vmatpush3.bf16.msra.mxu0 %v9958_v18 }
 0x16b   : > { %8724 = vmatpush3.bf16.msra.mxu1 %v9967_v21  ;;  %8707 = vmatprep.subr.bf16.mxu0 %v9727_v0 }
 0x16c   : > { %8725 = vmatprep.subr.bf16.mxu1 %v9727_v0 }
 0x16e   : > { %8709 = vmatpush3.bf16.msra.mxu0 %v9979_v28 }
 0x16f   : > { %8727 = vmatpush3.bf16.msra.mxu1 %v9983_v29  ;;  %8710 = vmatprep.subr.bf16.mxu0 %v9727_v0 }
 0x170   : > { %8728 = vmatprep.subr.bf16.mxu1 %v9727_v0 }
 0x172   : > { %8712 = vmatpush3.bf16.msra.mxu0 %v9987_v34 }
 0x173   : > { %8730 = vmatpush3.bf16.msra.mxu1 %v9991_v35  ;;  %8713 = vmatprep.subr.bf16.mxu0 %v9727_v0 }
 0x174   : > { %v943_v23 = vpop.f32.mrb[4].mxu0  ;;  %8731 = vmatprep.subr.bf16.mxu1 %v9727_v0 }
 0x175   : > { %v1016_v24 = vpop.f32.mrb[4].mxu1  ;;  %v6732_v25 = vpop.f32.mrb[5].mxu0 }
 0x176   : > { %v1017_v26 = vadd.f32 %v1016_v24, %v943_v23  ;;  %v6759_v27 = vpop.f32.mrb[5].mxu1  ;;  %8715 = vmatpush3.bf16.msra.mxu0 %v9996_v40  ;;  %v10576_v23 = vpack.c.bf16 %v5594_v19, %v5593_v17  ;;  %v10580_v24 = vpack.c.bf16 %v2991_v22, %v2990_v20  ;;  %v5595_v25 = vld [vmem:[%s11626_s4 + $0xb0] sm:$0xff] }
 0x177   : > { %8733 = vmatpush3.bf16.msra.mxu1 %v10000_v41  ;;  %8734 = vmatprep.subr.bf16.mxu0 %v9727_v0  ;;  %v2992_v27 = vld [vmem:[%s11626_s4 + $0x30] sm:$0xff] }
 0x178   : > { %v1020_v32 = vadd.f32 %v1017_v26, %v10304_v61  ;;  %8752 = vmatprep.subr.bf16.mxu1 %v9727_v0  ;;  %v5596_v26 = vld [vmem:[%s11626_s4 + $0xb8] sm:$0xff] }
 0x179   : > { %7217 = vmatmul.mubr.msk.f32.vlgmr.msra.gmra.mrb[22].mxu0 %vm571_vm2, %v2232_v30  ;;  %v2993_v30 = vld [vmem:[%s11626_s4 + $0x38] sm:$0xff] }
 0x17a   : > { %v1021_v33 = vmax.f32 %v1020_v32, 0.0  ;;  %7244 = vmatmul.mubr.msk.f32.vlgmr.msra.gmra.mrb[22].mxu1 %vm571_vm2, %v2231_v31  ;;  %8736 = vmatpush3.bf16.msra.mxu0 %v9937_v5  ;;  %v10596_v31 = vpack.c.bf16 %v5596_v26, %v5595_v25  ;;  %v10600_v32 = vpack.c.bf16 %v2993_v30, %v2992_v27 }
 0x17b   : > { %8754 = vmatpush3.bf16.msra.mxu1 %v9942_v9  ;;  %8737 = vmatprep.subr.bf16.mxu0 %v9727_v0 }
 0x17c   : > { %1022 = vst [vmem:[%s10319_s15 + $0x2] sm:$0x1] %v1021_v33  ;;  %8755 = vmatprep.subr.bf16.mxu1 %v9727_v0  ;;  %7270 = vmatprep.mubr.msk.f32.mxu0 %vm9728_vm0, %v9729_v1  ;;  %v5597_v33 = vld [vmem:[%s11626_s4 + $0xc0] sm:$0xff] }
 0x17d   : > { %7297 = vmatprep.mubr.msk.f32.mxu1 %vm9728_vm0, %v9729_v1 }
 0x17e   : > { %8739 = vmatpush3.bf16.msra.mxu0 %v9945_v12 }
 0x17f   : > { %8757 = vmatpush3.bf16.msra.mxu1 %v9950_v13  ;;  %8740 = vmatprep.subr.bf16.mxu0 %v9727_v0 }
 0x180   : > { %8758 = vmatprep.subr.bf16.mxu1 %v9727_v0 }
 0x182   : > { %8742 = vmatpush3.bf16.msra.mxu0 %v9958_v18 }
 0x183   : > { %8760 = vmatpush3.bf16.msra.mxu1 %v9967_v21  ;;  %8743 = vmatprep.subr.bf16.mxu0 %v9727_v0 }
 0x184   : > { %8761 = vmatprep.subr.bf16.mxu1 %v9727_v0 }
 0x186   : > { %8745 = vmatpush3.bf16.msra.mxu0 %v9979_v28 }
 0x187   : > { %8763 = vmatpush3.bf16.msra.mxu1 %v9983_v29  ;;  %8746 = vmatprep.subr.bf16.mxu0 %v9727_v0 }
 0x188   : > { %8764 = vmatprep.subr.bf16.mxu1 %v9727_v0 }
 0x18a   : > { %8748 = vmatpush3.bf16.msra.mxu0 %v9987_v34 }
 0x18b   : > { %8766 = vmatpush3.bf16.msra.mxu1 %v9991_v35  ;;  %8749 = vmatprep.subr.bf16.mxu0 %v9727_v0 }
 0x18c   : > { %v1094_v36 = vpop.f32.mrb[6].mxu0  ;;  %8767 = vmatprep.subr.bf16.mxu1 %v9727_v0 }
 0x18d   : > { %v1167_v37 = vpop.f32.mrb[6].mxu1  ;;  %v6786_v38 = vpop.f32.mrb[7].mxu0 }
 0x18e   : > { %v1168_v39 = vadd.f32 %v1167_v37, %v1094_v36  ;;  %v6813_v42 = vpop.f32.mrb[7].mxu1  ;;  %8751 = vmatpush3.bf16.msra.mxu0 %v9996_v40  ;;  %v5598_v36 = vld [vmem:[%s11626_s4 + $0xc8] sm:$0xff]  ;;  %v2994_v37 = vld [vmem:[%s11626_s4 + $0x40] sm:$0xff] }
 0x18f   : > { %8769 = vmatpush3.bf16.msra.mxu1 %v10000_v41  ;;  %8770 = vmatprep.subr.bf16.mxu0 %v9727_v0  ;;  %v2995_v38 = vld [vmem:[%s11626_s4 + $0x48] sm:$0xff] }
 0x190   : > { %v1171_v45 = vadd.f32 %v1168_v39, %v10304_v61  ;;  %8788 = vmatprep.subr.bf16.mxu1 %v9727_v0  ;;  %v10616_v39 = vpack.c.bf16 %v5598_v36, %v5597_v33  ;;  %v10620_v42 = vpack.c.bf16 %v2995_v38, %v2994_v37 }
 0x191   : > { %7271 = vmatmul.mubr.msk.f32.vlgmr.msra.gmra.mrb[24].mxu0 %vm571_vm2, %v2383_v43  ;;  %v5599_v43 = vld [vmem:[%s11626_s4 + $0xd0] sm:$0xff] }
 0x192   : > { %v1172_v46 = vmax.f32 %v1171_v45, 0.0  ;;  %7298 = vmatmul.mubr.msk.f32.vlgmr.msra.gmra.mrb[24].mxu1 %vm571_vm2, %v2382_v44  ;;  %8772 = vmatpush3.bf16.msra.mxu0 %v9937_v5  ;;  %v5600_v44 = vld [vmem:[%s11626_s4 + $0xd8] sm:$0xff]  ;;  %v2996_v45 = vld [vmem:[%s11626_s4 + $0x50] sm:$0xff] }
 0x193   : > { %8790 = vmatpush3.bf16.msra.mxu1 %v9942_v9  ;;  %8773 = vmatprep.subr.bf16.mxu0 %v9727_v0 }
 0x194   : > { %1173 = vst [vmem:[%s10319_s15 + $0x3] sm:$0x1] %v1172_v46  ;;  %8791 = vmatprep.subr.bf16.mxu1 %v9727_v0  ;;  %7324 = vmatprep.mubr.msk.f32.mxu0 %vm9728_vm0, %v9729_v1  ;;  %v2997_v46 = vld [vmem:[%s11626_s4 + $0x58] sm:$0xff] }
 0x195   : > { %7351 = vmatprep.mubr.msk.f32.mxu1 %vm9728_vm0, %v9729_v1 }
 0x196   : > { %8775 = vmatpush3.bf16.msra.mxu0 %v9945_v12 }
 0x197   : > { %8793 = vmatpush3.bf16.msra.mxu1 %v9950_v13  ;;  %8776 = vmatprep.subr.bf16.mxu0 %v9727_v0 }
 0x198   : > { %8794 = vmatprep.subr.bf16.mxu1 %v9727_v0 }
 0x19a   : > { %8778 = vmatpush3.bf16.msra.mxu0 %v9958_v18 }
 0x19b   : > { %8796 = vmatpush3.bf16.msra.mxu1 %v9967_v21  ;;  %8779 = vmatprep.subr.bf16.mxu0 %v9727_v0  ;;  %v3166_v10 = vld [vmem:[%s10319_s15 + $0x3] sm:$0x1] }
 0x19c   : > { %8797 = vmatprep.subr.bf16.mxu1 %v9727_v0 }
 0x19e   : > { %8781 = vmatpush3.bf16.msra.mxu0 %v9979_v28 }
 0x19f   : > { %8799 = vmatpush3.bf16.msra.mxu1 %v9983_v29  ;;  %8782 = vmatprep.subr.bf16.mxu0 %v9727_v0 }
 0x1a0   : > { %8800 = vmatprep.subr.bf16.mxu1 %v9727_v0 }
 0x1a2   : > { %8784 = vmatpush3.bf16.msra.mxu0 %v9987_v34 }
 0x1a3   : > { %8802 = vmatpush3.bf16.msra.mxu1 %v9991_v35  ;;  %8785 = vmatprep.subr.bf16.mxu0 %v9727_v0 }
 0x1a4   : > { %v1245_v47 = vpop.f32.mrb[8].mxu0  ;;  %8803 = vmatprep.subr.bf16.mxu1 %v9727_v0 }
 0x1a5   : > { %v1318_v48 = vpop.f32.mrb[8].mxu1  ;;  %v6840_v49 = vpop.f32.mrb[9].mxu0 }
 0x1a6   : > { %v1319_v50 = vadd.f32 %v1318_v48, %v1245_v47  ;;  %v6867_v51 = vpop.f32.mrb[9].mxu1  ;;  %8787 = vmatpush3.bf16.msra.mxu0 %v9996_v40  ;;  %v10636_v47 = vpack.c.bf16 %v5600_v44, %v5599_v43  ;;  %v10640_v48 = vpack.c.bf16 %v2997_v46, %v2996_v45  ;;  %v5601_v49 = vld [vmem:[%s11626_s4 + $0xe0] sm:$0xff] }
 0x1a7   : > { %8805 = vmatpush3.bf16.msra.mxu1 %v10000_v41  ;;  %8806 = vmatprep.subr.bf16.mxu0 %v9727_v0 }
 0x1a8   : > { %v1322_v54 = vadd.f32 %v1319_v50, %v10304_v61  ;;  %8824 = vmatprep.subr.bf16.mxu1 %v9727_v0  ;;  %v5602_v50 = vld [vmem:[%s11626_s4 + $0xe8] sm:$0xff] }
 0x1a9   : > { %7325 = vmatmul.mubr.msk.f32.vlgmr.msra.gmra.mrb[26].mxu0 %vm571_vm2, %v2534_v52  ;;  %v2998_v52 = vld [vmem:[%s11626_s4 + $0x60] sm:$0xff] }
 0x1aa   : > { %v1323_v55 = vmax.f32 %v1322_v54, 0.0  ;;  %7352 = vmatmul.mubr.msk.f32.vlgmr.msra.gmra.mrb[26].mxu1 %vm571_vm2, %v2533_v53  ;;  %8808 = vmatpush3.bf16.msra.mxu0 %v9937_v5  ;;  %v2999_v53 = vld [vmem:[%s11626_s4 + $0x68] sm:$0xff] }
 0x1ab   : > { %8826 = vmatpush3.bf16.msra.mxu1 %v9942_v9  ;;  %8809 = vmatprep.subr.bf16.mxu0 %v9727_v0 }
 0x1ac   : > { %1324 = vst [vmem:[%s10319_s15 + $0x4] sm:$0x1] %v1323_v55  ;;  %8827 = vmatprep.subr.bf16.mxu1 %v9727_v0  ;;  %7378 = vmatprep.mubr.msk.f32.mxu0 %vm9728_vm0, %v9729_v1 }
 0x1ad   : > { %7405 = vmatprep.mubr.msk.f32.mxu1 %vm9728_vm0, %v9729_v1 }
 0x1ae   : > { %8811 = vmatpush3.bf16.msra.mxu0 %v9945_v12 }
 0x1af   : > { %8829 = vmatpush3.bf16.msra.mxu1 %v9950_v13  ;;  %8812 = vmatprep.subr.bf16.mxu0 %v9727_v0 }
 0x1b0   : > { %8830 = vmatprep.subr.bf16.mxu1 %v9727_v0 }
 0x1b2   : > { %8814 = vmatpush3.bf16.msra.mxu0 %v9958_v18 }
 0x1b3   : > { %8832 = vmatpush3.bf16.msra.mxu1 %v9967_v21  ;;  %8815 = vmatprep.subr.bf16.mxu0 %v9727_v0  ;;  %v3310_v38 = vld [vmem:[%s10319_s15 + $0x4] sm:$0x1] }
 0x1b4   : > { %8833 = vmatprep.subr.bf16.mxu1 %v9727_v0 }
 0x1b6   : > { %8817 = vmatpush3.bf16.msra.mxu0 %v9979_v28 }
 0x1b7   : > { %8835 = vmatpush3.bf16.msra.mxu1 %v9983_v29  ;;  %8818 = vmatprep.subr.bf16.mxu0 %v9727_v0 }
 0x1b8   : > { %8836 = vmatprep.subr.bf16.mxu1 %v9727_v0 }
 0x1ba   : > { %8820 = vmatpush3.bf16.msra.mxu0 %v9987_v34 }
 0x1bb   : > { %8838 = vmatpush3.bf16.msra.mxu1 %v9991_v35  ;;  %8821 = vmatprep.subr.bf16.mxu0 %v9727_v0 }
 0x1bc   : > { %v1396_v56 = vpop.f32.mrb[10].mxu0  ;;  %8839 = vmatprep.subr.bf16.mxu1 %v9727_v0 }
 0x1bd   : > { %v1469_v57 = vpop.f32.mrb[10].mxu1  ;;  %v6894_v58 = vpop.f32.mrb[11].mxu0 }
 0x1be   : > { %v1470_v59 = vadd.f32 %v1469_v57, %v1396_v56  ;;  %v6921_v60 = vpop.f32.mrb[11].mxu1  ;;  %8823 = vmatpush3.bf16.msra.mxu0 %v9996_v40  ;;  %v10656_v58 = vpack.c.bf16 %v5602_v50, %v5601_v49 }
 0x1bf   : > { %8841 = vmatpush3.bf16.msra.mxu1 %v10000_v41  ;;  %8842 = vmatprep.subr.bf16.mxu0 %v9727_v0  ;;  %v5603_v60 = vld [vmem:[%s11626_s4 + $0xf0] sm:$0xff] }
 0x1c0   : > { %v1473_v2 = vadd.f32 %v1470_v59, %v10304_v61  ;;  %8860 = vmatprep.subr.bf16.mxu1 %v9727_v0  ;;  %v10660_v59 = vpack.c.bf16 %v2999_v53, %v2998_v52 }
 0x1c1   : > { %7379 = vmatmul.mubr.msk.f32.vlgmr.msra.gmra.mrb[28].mxu0 %vm571_vm2, %v2685_v62  ;;  %v5604_v62 = vld [vmem:[%s11626_s4 + $0xf8] sm:$0xff] }
 0x1c2   : > { %v1474_v3 = vmax.f32 %v1473_v2, 0.0  ;;  %7406 = vmatmul.mubr.msk.f32.vlgmr.msra.gmra.mrb[28].mxu1 %vm571_vm2, %v2684_v63  ;;  %8844 = vmatpush3.bf16.msra.mxu0 %v9937_v5  ;;  %v5589_v5 = vld [vmem:[%s11626_s4 + $0x80] sm:$0xff]  ;;  %v3000_v2 = vld [vmem:[%s11626_s4 + $0x70] sm:$0xff] }
 0x1c3   : > { %8862 = vmatpush3.bf16.msra.mxu1 %v9942_v9  ;;  %8845 = vmatprep.subr.bf16.mxu0 %v9727_v0  ;;  %v5590_v9 = vld [vmem:[%s11626_s4 + $0x88] sm:$0xff] }
 0x1c4   : > { %1475 = vst [vmem:[%s10319_s15 + $0x5] sm:$0x1] %v1474_v3  ;;  %8863 = vmatprep.subr.bf16.mxu1 %v9727_v0  ;;  %7432 = vmatprep.mubr.msk.f32.mxu0 %vm9728_vm0, %v9729_v1  ;;  %v10527_v4 = vpack.c.bf16 %v5590_v9, %v5589_v5  ;;  %v3001_v3 = vld [vmem:[%s11626_s4 + $0x78] sm:$0xff]  ;;  %v10677_v9 = vpack.c.bf16 %v5604_v62, %v5603_v60 }
 0x1c5   : > { %7459 = vmatprep.mubr.msk.f32.mxu1 %vm9728_vm0, %v9729_v1 }
 0x1c6   : > { %8847 = vmatpush3.bf16.msra.mxu0 %v9945_v12 }
 0x1c7   : > { %8865 = vmatpush3.bf16.msra.mxu1 %v9950_v13  ;;  %8848 = vmatprep.subr.bf16.mxu0 %v9727_v0  ;;  %v2986_v13 = vld [vmem:[%s11626_s4] sm:$0xff] }
 0x1c8   : > { %8866 = vmatprep.subr.bf16.mxu1 %v9727_v0 }
 0x1ca   : > { %8850 = vmatpush3.bf16.msra.mxu0 %v9958_v18  ;;  %v2987_v18 = vld [vmem:[%s11626_s4 + $0x8] sm:$0xff] }
 0x1cb   : > { %8868 = vmatpush3.bf16.msra.mxu1 %v9967_v21  ;;  %8851 = vmatprep.subr.bf16.mxu0 %v9727_v0  ;;  %v10532_v7 = vpack.c.bf16 %v2987_v18, %v2986_v13  ;;  %v3021_v13 = vld [vmem:[%s10319_s15 + $0x1] sm:$0x1]  ;;  %v3020_v18 = vld [vmem:[%s10319_s15] sm:$0x1]  ;;  %v3311_v37 = vld [vmem:[%s10319_s15 + $0x5] sm:$0x1] }
 0x1cc   : > { %8869 = vmatprep.subr.bf16.mxu1 %v9727_v0 }
 0x1ce   : > { %8853 = vmatpush3.bf16.msra.mxu0 %v9979_v28 }
 0x1cf   : > { %8871 = vmatpush3.bf16.msra.mxu1 %v9983_v29  ;;  %8854 = vmatprep.subr.bf16.mxu0 %v9727_v0 }
 0x1d0   : > { %8872 = vmatprep.subr.bf16.mxu1 %v9727_v0 }
 0x1d2   : > { %8856 = vmatpush3.bf16.msra.mxu0 %v9987_v34 }
 0x1d3   : > { %8874 = vmatpush3.bf16.msra.mxu1 %v9991_v35  ;;  %8857 = vmatprep.subr.bf16.mxu0 %v9727_v0  ;;  %v2836_v35 = vld [vmem:[%s10007_s22 + $0x1f] sm:$0x1]  ;;  %s11435_s22 = scalar_lea.vmem %s11634_s12, %s5768_s16  ;;  %s5764_s16 = sshll.u32 %s9829_s29, 7 }
 0x1d4   : > { %v1547_v12 = vpop.f32.mrb[12].mxu0  ;;  %8875 = vmatprep.subr.bf16.mxu1 %v9727_v0  ;;  %s11501_s20 = scalar_lea.hbm %s11631_s9, %s5764_s16  ;;  %s9595_s16 = sshll.u32 %s9733_s21, 4  ;;  %s9596_s16 = int_to_ptr.vmem [resolvable:$false] %s9595_s16 }
 0x1d5   : > { %v1620_v21 = vpop.f32.mrb[12].mxu1  ;;  %v6948_v28 = vpop.f32.mrb[13].mxu0  ;;  %p9598_p4 = scmp.lt.s32.totalorder %s11511_s23, %s9596_s16 }
 0x1d6   : > { %v1621_v29 = vadd.f32 %v1620_v21, %v1547_v12  ;;  %v6975_v34 = vpop.f32.mrb[13].mxu1  ;;  %8859 = vmatpush3.bf16.msra.mxu0 %v9996_v40  ;;  %v10681_v12 = vpack.c.bf16 %v3001_v3, %v3000_v2 }
 0x1d7   : > { %8877 = vmatpush3.bf16.msra.mxu1 %v10000_v41  ;;  %8878 = vmatprep.subr.bf16.mxu0 %v9727_v0  ;;  %v2988_v41 = vld [vmem:[%s11626_s4 + $0x10] sm:$0xff] }
 0x1d8   : > { %v1624_v40 = vadd.f32 %v1621_v29, %v10304_v61  ;;  %8902 = vmatprep.subr.bf16.mxu1 %v9727_v0  ;;  %v10555_v16 = vpack.c.bf16 %v2989_v11, %v2988_v41 }
 0x1d9   : > { %7433 = vmatmul.mubr.msk.f32.vlgmr.msra.gmra.mrb[30].mxu0 %vm571_vm2, %v2836_v35 }
 0x1da   : > { %v1625_v14 = vmax.f32 %v1624_v40, 0.0  ;;  %7460 = vmatmul.mubr.msk.f32.vlgmr.msra.gmra.mrb[30].mxu1 %vm571_vm2, %v2835_v6  ;;  %8880 = vmatpush3.bf16.msra.mxu0 %v10527_v4  ;;  %v3165_v40 = vld [vmem:[%s10319_s15 + $0x2] sm:$0x1] }
 0x1db   : > { %8904 = vmatpush3.bf16.msra.mxu1 %v10532_v7  ;;  %8881 = vmatprep.subr.bf16.mxu0 %v9727_v0 }
 0x1dc   : > { %1626 = vst [vmem:[%s10319_s15 + $0x6] sm:$0x1] %v1625_v14  ;;  %8905 = vmatprep.subr.bf16.mxu1 %v9727_v0  ;;  %7494 = vmatprep.mubr.msk.f32.mxu0 %vm9728_vm0, %v9729_v1 }
 0x1dd   : > { %7529 = vmatprep.mubr.msk.f32.mxu1 %vm9728_vm0, %v9729_v1 }
 0x1de   : > { %8883 = vmatpush3.bf16.msra.mxu0 %v10551_v15 }
 0x1df   : > { %8907 = vmatpush3.bf16.msra.mxu1 %v10555_v16  ;;  %8884 = vmatprep.subr.bf16.mxu0 %v9727_v0 }
 0x1e0   : > { %8908 = vmatprep.subr.bf16.mxu1 %v9727_v0 }
 0x1e2   : > { %8886 = vmatpush3.bf16.msra.mxu0 %v10576_v23 }
 0x1e3   : > { %8910 = vmatpush3.bf16.msra.mxu1 %v10580_v24  ;;  %8887 = vmatprep.subr.bf16.mxu0 %v9727_v0 }
 0x1e4   : > { %8911 = vmatprep.subr.bf16.mxu1 %v9727_v0 }
 0x1e6   : > { %8889 = vmatpush3.bf16.msra.mxu0 %v10596_v31 }
 0x1e7   : > { %8913 = vmatpush3.bf16.msra.mxu1 %v10600_v32  ;;  %8890 = vmatprep.subr.bf16.mxu0 %v9727_v0 }
 0x1e8   : > { %8914 = vmatprep.subr.bf16.mxu1 %v9727_v0 }
 0x1ea   : > { %8892 = vmatpush3.bf16.msra.mxu0 %v10616_v39 }
 0x1eb   : > { %8916 = vmatpush3.bf16.msra.mxu1 %v10620_v42  ;;  %8893 = vmatprep.subr.bf16.mxu0 %v9727_v0 }
 0x1ec   : > { %v1698_v51 = vpop.f32.mrb[14].mxu0  ;;  %8917 = vmatprep.subr.bf16.mxu1 %v9727_v0 }
 0x1ed   : > { %v1771_v54 = vpop.f32.mrb[14].mxu1  ;;  %v7002_v55 = vpop.f32.mrb[15].mxu0 }
 0x1ee   : > { %v1772_v56 = vadd.f32 %v1771_v54, %v1698_v51  ;;  %v7029_v57 = vpop.f32.mrb[15].mxu1  ;;  %8895 = vmatpush3.bf16.msra.mxu0 %v10636_v47  ;;  %v3455_v54 = vld [vmem:[%s10319_s15 + $0x6] sm:$0x1] }
 0x1ef   : > { %8919 = vmatpush3.bf16.msra.mxu1 %v10640_v48  ;;  %8896 = vmatprep.subr.bf16.mxu0 %v9727_v0 }
 0x1f0   : > { %v1775_v63 = vadd.f32 %v1772_v56, %v10304_v61  ;;  %8920 = vmatprep.subr.bf16.mxu1 %v9727_v0 }
 0x1f2   : > { %v1776_v5 = vmax.f32 %v1775_v63, 0.0  ;;  %8898 = vmatpush3.bf16.msra.mxu0 %v10656_v58 }
 0x1f3   : > { %8922 = vmatpush3.bf16.msra.mxu1 %v10660_v59  ;;  %8899 = vmatprep.subr.bf16.mxu0 %v9727_v0 }
 0x1f4   : > { %1777 = vst [vmem:[%s10319_s15 + $0x7] sm:$0x1] %v1776_v5  ;;  %8923 = vmatprep.subr.bf16.mxu1 %v9727_v0 }
 0x1f6   : > { %8901 = vmatpush3.bf16.msra.mxu0 %v10677_v9 }
 0x1f7   : > { %8925 = vmatpush3.bf16.msra.mxu1 %v10681_v12  ;;  %8926 = vmatprep.subr.bf16.mxu0 %v9727_v0 }
 0x1f8   : > { %8950 = vmatprep.subr.bf16.mxu1 %v9727_v0 }
 0x1f9   : > { %7495 = vmatmul.mubr.f32.vlgmr.msra.gmra.mrb[32].mxu0 %v3021_v13 }
 0x1fa   : > { %7530 = vmatmul.mubr.f32.vlgmr.msra.gmra.mrb[32].mxu1 %v3020_v18  ;;  %8928 = vmatpush3.bf16.msra.mxu0 %v10527_v4 }
 0x1fb   : > { %8952 = vmatpush3.bf16.msra.mxu1 %v10532_v7  ;;  %8929 = vmatprep.subr.bf16.mxu0 %v9727_v0  ;;  %v3456_v53 = vld [vmem:[%s10319_s15 + $0x7] sm:$0x1] }
 0x1fc   : > { %8953 = vmatprep.subr.bf16.mxu1 %v9727_v0  ;;  %7564 = vmatprep.mubr.msk.f32.mxu0 %vm9728_vm0, %v9729_v1 }
 0x1fd   : > { %7599 = vmatprep.mubr.msk.f32.mxu1 %vm9728_vm0, %v9729_v1 }
 0x1fe   : > { %8931 = vmatpush3.bf16.msra.mxu0 %v10551_v15 }
 0x1ff   : > { %8955 = vmatpush3.bf16.msra.mxu1 %v10555_v16  ;;  %8932 = vmatprep.subr.bf16.mxu0 %v9727_v0 }
 0x200   : > { %8956 = vmatprep.subr.bf16.mxu1 %v9727_v0 }
 0x202   : > { %8934 = vmatpush3.bf16.msra.mxu0 %v10576_v23 }
 0x203   : > { %8958 = vmatpush3.bf16.msra.mxu1 %v10580_v24  ;;  %8935 = vmatprep.subr.bf16.mxu0 %v9727_v0 }
 0x204   : > { %v1849_v21 = vpop.f32.mrb[16].mxu0  ;;  %8959 = vmatprep.subr.bf16.mxu1 %v9727_v0 }
 0x205   : > { %v1922_v28 = vpop.f32.mrb[16].mxu1  ;;  %v7056_v29 = vpop.f32.mrb[17].mxu0 }
 0x206   : > { %v1923_v34 = vadd.f32 %v1922_v28, %v1849_v21  ;;  %v7083_v35 = vpop.f32.mrb[17].mxu1  ;;  %8937 = vmatpush3.bf16.msra.mxu0 %v10596_v31  ;;  %v10867_v29 = vld [vmem:[%s11625_s3] sm:$0x1] }
 0x207   : > { %8961 = vmatpush3.bf16.msra.mxu1 %v10600_v32  ;;  %8938 = vmatprep.subr.bf16.mxu0 %v9727_v0 }
 0x208   : > { %v1926_v6 = vadd.f32 %v1923_v34, %v10304_v61  ;;  %8962 = vmatprep.subr.bf16.mxu1 %v9727_v0 }
 0x20a   : > { %v1927_v8 = vmax.f32 %v1926_v6, 0.0  ;;  %8940 = vmatpush3.bf16.msra.mxu0 %v10616_v39 }
 0x20b   : > { %8964 = vmatpush3.bf16.msra.mxu1 %v10620_v42  ;;  %8941 = vmatprep.subr.bf16.mxu0 %v9727_v0 }
 0x20c   : > { %1928 = vst [vmem:[%s10319_s15 + $0x8] sm:$0x1] %v1927_v8  ;;  %8965 = vmatprep.subr.bf16.mxu1 %v9727_v0 }
 0x20e   : > { %8943 = vmatpush3.bf16.msra.mxu0 %v10636_v47 }
 0x20f   : > { %8967 = vmatpush3.bf16.msra.mxu1 %v10640_v48  ;;  %8944 = vmatprep.subr.bf16.mxu0 %v9727_v0 }
 0x210   : > { %8968 = vmatprep.subr.bf16.mxu1 %v9727_v0 }
 0x212   : > { %8946 = vmatpush3.bf16.msra.mxu0 %v10656_v58 }
 0x213   : > { %8970 = vmatpush3.bf16.msra.mxu1 %v10660_v59  ;;  %8947 = vmatprep.subr.bf16.mxu0 %v9727_v0  ;;  %v3600_v3 = vld [vmem:[%s10319_s15 + $0x8] sm:$0x1] }
 0x214   : > { %8971 = vmatprep.subr.bf16.mxu1 %v9727_v0 }
 0x216   : > { %8949 = vmatpush3.bf16.msra.mxu0 %v10677_v9 }
 0x217   : > { %8973 = vmatpush3.bf16.msra.mxu1 %v10681_v12  ;;  %8974 = vmatprep.subr.bf16.mxu0 %v9727_v0 }
 0x218   : > { %8998 = vmatprep.subr.bf16.mxu1 %v9727_v0 }
 0x219   : > { %7565 = vmatmul.mubr.f32.vlgmr.msra.gmra.mrb[34].mxu0 %v3166_v10 }
 0x21a   : > { %7600 = vmatmul.mubr.f32.vlgmr.msra.gmra.mrb[34].mxu1 %v3165_v40  ;;  %8976 = vmatpush3.bf16.msra.mxu0 %v10527_v4 }
 0x21b   : > { %9000 = vmatpush3.bf16.msra.mxu1 %v10532_v7  ;;  %8977 = vmatprep.subr.bf16.mxu0 %v9727_v0 }
 0x21c   : > { %v2000_v41 = vpop.f32.mrb[18].mxu0  ;;  %9001 = vmatprep.subr.bf16.mxu1 %v9727_v0  ;;  %7634 = vmatprep.mubr.msk.f32.mxu0 %vm9728_vm0, %v9729_v1 }
 0x21d   : > { %v2073_v11 = vpop.f32.mrb[18].mxu1  ;;  %v7110_v14 = vpop.f32.mrb[19].mxu0  ;;  %7669 = vmatprep.mubr.msk.f32.mxu1 %vm9728_vm0, %v9729_v1 }
 0x21e   : > { %v2074_v17 = vadd.f32 %v2073_v11, %v2000_v41  ;;  %v7137_v19 = vpop.f32.mrb[19].mxu1  ;;  %8979 = vmatpush3.bf16.msra.mxu0 %v10551_v15 }
 0x21f   : > { %9003 = vmatpush3.bf16.msra.mxu1 %v10555_v16  ;;  %8980 = vmatprep.subr.bf16.mxu0 %v9727_v0 }
 0x220   : > { %v2077_v20 = vadd.f32 %v2074_v17, %v10304_v61  ;;  %9004 = vmatprep.subr.bf16.mxu1 %v9727_v0 }
 0x222   : > { %v2078_v22 = vmax.f32 %v2077_v20, 0.0  ;;  %8982 = vmatpush3.bf16.msra.mxu0 %v10576_v23 }
 0x223   : > { %9006 = vmatpush3.bf16.msra.mxu1 %v10580_v24  ;;  %8983 = vmatprep.subr.bf16.mxu0 %v9727_v0 }
 0x224   : > { %2079 = vst [vmem:[%s10319_s15 + $0x9] sm:$0x1] %v2078_v22  ;;  %9007 = vmatprep.subr.bf16.mxu1 %v9727_v0 }
 0x226   : > { %8985 = vmatpush3.bf16.msra.mxu0 %v10596_v31 }
 0x227   : > { %9009 = vmatpush3.bf16.msra.mxu1 %v10600_v32  ;;  %8986 = vmatprep.subr.bf16.mxu0 %v9727_v0 }
 0x228   : > { %9010 = vmatprep.subr.bf16.mxu1 %v9727_v0 }
 0x22a   : > { %8988 = vmatpush3.bf16.msra.mxu0 %v10616_v39 }
 0x22b   : > { %9012 = vmatpush3.bf16.msra.mxu1 %v10620_v42  ;;  %8989 = vmatprep.subr.bf16.mxu0 %v9727_v0 }
 0x22c   : > { %9013 = vmatprep.subr.bf16.mxu1 %v9727_v0 }
 0x22e   : > { %8991 = vmatpush3.bf16.msra.mxu0 %v10636_v47 }
 0x22f   : > { %9015 = vmatpush3.bf16.msra.mxu1 %v10640_v48  ;;  %8992 = vmatprep.subr.bf16.mxu0 %v9727_v0 }
 0x230   : > { %9016 = vmatprep.subr.bf16.mxu1 %v9727_v0 }
 0x232   : > { %8994 = vmatpush3.bf16.msra.mxu0 %v10656_v58 }
 0x233   : > { %9018 = vmatpush3.bf16.msra.mxu1 %v10660_v59  ;;  %8995 = vmatprep.subr.bf16.mxu0 %v9727_v0 }
 0x234   : > { %v2151_v25 = vpop.f32.mrb[20].mxu0  ;;  %9019 = vmatprep.subr.bf16.mxu1 %v9727_v0 }
 0x235   : > { %v2224_v26 = vpop.f32.mrb[20].mxu1  ;;  %v7164_v27 = vpop.f32.mrb[21].mxu0 }
 0x236   : > { %v2225_v30 = vadd.f32 %v2224_v26, %v2151_v25  ;;  %v7191_v33 = vpop.f32.mrb[21].mxu1  ;;  %8997 = vmatpush3.bf16.msra.mxu0 %v10677_v9 }
 0x237   : > { %9021 = vmatpush3.bf16.msra.mxu1 %v10681_v12  ;;  %9022 = vmatprep.subr.bf16.mxu0 %v9727_v0 }
 0x238   : > { %v2228_v36 = vadd.f32 %v2225_v30, %v10304_v61  ;;  %9046 = vmatprep.subr.bf16.mxu1 %v9727_v0 }
 0x239   : > { %7635 = vmatmul.mubr.f32.vlgmr.msra.gmra.mrb[36].mxu0 %v3311_v37 }
 0x23a   : > { %v2229_v43 = vmax.f32 %v2228_v36, 0.0  ;;  %7670 = vmatmul.mubr.f32.vlgmr.msra.gmra.mrb[36].mxu1 %v3310_v38  ;;  %9024 = vmatpush3.bf16.msra.mxu0 %v10527_v4 }
 0x23b   : > { %9048 = vmatpush3.bf16.msra.mxu1 %v10532_v7  ;;  %9025 = vmatprep.subr.bf16.mxu0 %v9727_v0 }
 0x23c   : > { %2230 = vst [vmem:[%s10319_s15 + $0xa] sm:$0x1] %v2229_v43  ;;  %9049 = vmatprep.subr.bf16.mxu1 %v9727_v0  ;;  %7704 = vmatprep.mubr.msk.f32.mxu0 %vm9728_vm0, %v9729_v1  ;;  %v4200_v43 = vld [vmem:[#allocation5 + $0x98] sm:$0xff] }
 0x23d   : > { %7739 = vmatprep.mubr.msk.f32.mxu1 %vm9728_vm0, %v9729_v1 }
 0x23e   : > { %9027 = vmatpush3.bf16.msra.mxu0 %v10551_v15 }
 0x23f   : > { %9051 = vmatpush3.bf16.msra.mxu1 %v10555_v16  ;;  %9028 = vmatprep.subr.bf16.mxu0 %v9727_v0 }
 0x240   : > { %9052 = vmatprep.subr.bf16.mxu1 %v9727_v0 }
 0x242   : > { %9030 = vmatpush3.bf16.msra.mxu0 %v10576_v23 }
 0x243   : > { %9054 = vmatpush3.bf16.msra.mxu1 %v10580_v24  ;;  %9031 = vmatprep.subr.bf16.mxu0 %v9727_v0  ;;  %v3745_v17 = vld [vmem:[%s10319_s15 + $0xa] sm:$0x1] }
 0x244   : > { %9055 = vmatprep.subr.bf16.mxu1 %v9727_v0 }
 0x246   : > { %9033 = vmatpush3.bf16.msra.mxu0 %v10596_v31 }
 0x247   : > { %9057 = vmatpush3.bf16.msra.mxu1 %v10600_v32  ;;  %9034 = vmatprep.subr.bf16.mxu0 %v9727_v0 }
 0x248   : > { %9058 = vmatprep.subr.bf16.mxu1 %v9727_v0 }
 0x24a   : > { %9036 = vmatpush3.bf16.msra.mxu0 %v10616_v39 }
 0x24b   : > { %9060 = vmatpush3.bf16.msra.mxu1 %v10620_v42  ;;  %9037 = vmatprep.subr.bf16.mxu0 %v9727_v0 }
 0x24c   : > { %v2302_v44 = vpop.f32.mrb[22].mxu0  ;;  %9061 = vmatprep.subr.bf16.mxu1 %v9727_v0 }
 0x24d   : > { %v2375_v45 = vpop.f32.mrb[22].mxu1  ;;  %v7218_v46 = vpop.f32.mrb[23].mxu0 }
 0x24e   : > { %v2376_v49 = vadd.f32 %v2375_v45, %v2302_v44  ;;  %v7245_v50 = vpop.f32.mrb[23].mxu1  ;;  %9039 = vmatpush3.bf16.msra.mxu0 %v10636_v47  ;;  %v4182_v45 = vld [vmem:[#allocation5 + $0x10] sm:$0xff]  ;;  %v4183_v46 = vld [vmem:[#allocation5 + $0x18] sm:$0xff] }
 0x24f   : > { %9063 = vmatpush3.bf16.msra.mxu1 %v10640_v48  ;;  %9040 = vmatprep.subr.bf16.mxu0 %v9727_v0  ;;  %v4201_v50 = vld [vmem:[#allocation5 + $0xa0] sm:$0xff] }
 0x250   : > { %v2379_v51 = vadd.f32 %v2376_v49, %v10304_v61  ;;  %9064 = vmatprep.subr.bf16.mxu1 %v9727_v0 }
 0x252   : > { %v2380_v52 = vmax.f32 %v2379_v51, 0.0  ;;  %9042 = vmatpush3.bf16.msra.mxu0 %v10656_v58  ;;  %v4202_v51 = vld [vmem:[#allocation5 + $0xa8] sm:$0xff] }
 0x253   : > { %9066 = vmatpush3.bf16.msra.mxu1 %v10660_v59  ;;  %9043 = vmatprep.subr.bf16.mxu0 %v9727_v0 }
 0x254   : > { %2381 = vst [vmem:[%s10319_s15 + $0xb] sm:$0x1] %v2380_v52  ;;  %9067 = vmatprep.subr.bf16.mxu1 %v9727_v0  ;;  %v4184_v52 = vld [vmem:[#allocation5 + $0x20] sm:$0xff] }
 0x256   : > { %9045 = vmatpush3.bf16.msra.mxu0 %v10677_v9 }
 0x257   : > { %9069 = vmatpush3.bf16.msra.mxu1 %v10681_v12  ;;  %9070 = vmatprep.subr.bf16.mxu0 %v9727_v0 }
 0x258   : > { %9094 = vmatprep.subr.bf16.mxu1 %v9727_v0 }
 0x259   : > { %7705 = vmatmul.mubr.f32.vlgmr.msra.gmra.mrb[38].mxu0 %v3456_v53  ;;  %v4185_v53 = vld [vmem:[#allocation5 + $0x28] sm:$0xff] }
 0x25a   : > { %7740 = vmatmul.mubr.f32.vlgmr.msra.gmra.mrb[38].mxu1 %v3455_v54  ;;  %9072 = vmatpush3.bf16.msra.mxu0 %v10527_v4  ;;  %v11005_v54 = vpack.c.bf16 %v4202_v51, %v4201_v50 }
 0x25b   : > { %9096 = vmatpush3.bf16.msra.mxu1 %v10532_v7  ;;  %9073 = vmatprep.subr.bf16.mxu0 %v9727_v0  ;;  %v3746_v14 = vld [vmem:[%s10319_s15 + $0xb] sm:$0x1] }
 0x25c   : > { %9097 = vmatprep.subr.bf16.mxu1 %v9727_v0  ;;  %7774 = vmatprep.mubr.msk.f32.mxu0 %vm9728_vm0, %v9729_v1 }
 0x25d   : > { %7809 = vmatprep.mubr.msk.f32.mxu1 %vm9728_vm0, %v9729_v1 }
 0x25e   : > { %9075 = vmatpush3.bf16.msra.mxu0 %v10551_v15 }
 0x25f   : > { %9099 = vmatpush3.bf16.msra.mxu1 %v10555_v16  ;;  %9076 = vmatprep.subr.bf16.mxu0 %v9727_v0 }
 0x260   : > { %9100 = vmatprep.subr.bf16.mxu1 %v9727_v0 }
 0x262   : > { %9078 = vmatpush3.bf16.msra.mxu0 %v10576_v23 }
 0x263   : > { %9102 = vmatpush3.bf16.msra.mxu1 %v10580_v24  ;;  %9079 = vmatprep.subr.bf16.mxu0 %v9727_v0 }
 0x264   : > { %v2453_v55 = vpop.f32.mrb[24].mxu0  ;;  %9103 = vmatprep.subr.bf16.mxu1 %v9727_v0 }
 0x265   : > { %v2526_v56 = vpop.f32.mrb[24].mxu1  ;;  %v7272_v57 = vpop.f32.mrb[25].mxu0 }
 0x266   : > { %v2527_v60 = vadd.f32 %v2526_v56, %v2453_v55  ;;  %v7299_v62 = vpop.f32.mrb[25].mxu1  ;;  %9081 = vmatpush3.bf16.msra.mxu0 %v10596_v31  ;;  %v11008_v55 = vpack.c.bf16 %v4185_v53, %v4184_v52  ;;  %v4203_v56 = vld [vmem:[#allocation5 + $0xb0] sm:$0xff]  ;;  %v4204_v57 = vld [vmem:[#allocation5 + $0xb8] sm:$0xff]  ;;  %v4797_v53 = vld [vmem:[%s9963_s19] sm:$0xf] }
 0x267   : > { %9105 = vmatpush3.bf16.msra.mxu1 %v10600_v32  ;;  %9082 = vmatprep.subr.bf16.mxu0 %v9727_v0  ;;  %v4187_v62 = vld [vmem:[#allocation5 + $0x38] sm:$0xff] }
 0x268   : > { %v2530_v63 = vadd.f32 %v2527_v60, %v10304_v61  ;;  %9106 = vmatprep.subr.bf16.mxu1 %v9727_v0  ;;  %v3601_v61 = vld [vmem:[%s10319_s15 + $0x9] sm:$0x1]  ;;  %v4186_v60 = vld [vmem:[#allocation5 + $0x30] sm:$0xff]  ;;  %4799 = vrot.lane.b32.xlu0 %v4797_v53, %s9730_s30 }
 0x26a   : > { %v2531_v2 = vmax.f32 %v2530_v63, 0.0  ;;  %9084 = vmatpush3.bf16.msra.mxu0 %v10616_v39  ;;  %v11013_v63 = vpack.c.bf16 %v4204_v57, %v4203_v56  ;;  %v4804_v56 = vld [vmem:[%s9963_s19] sm:$0xf] }
 0x26b   : > { %9108 = vmatpush3.bf16.msra.mxu1 %v10620_v42  ;;  %9085 = vmatprep.subr.bf16.mxu0 %v9727_v0  ;;  %v4811_v57 = vld [vmem:[%s9963_s19] sm:$0xf] }
 0x26c   : > { %2532 = vst [vmem:[%s10319_s15 + $0xc] sm:$0x1] %v2531_v2  ;;  %9109 = vmatprep.subr.bf16.mxu1 %v9727_v0  ;;  %v11016_v2 = vpack.c.bf16 %v4187_v62, %v4186_v60  ;;  %4813 = vrot.lane.b32.xlu1 %v4811_v57, %s9731_s14  ;;  %v5607_v60 = vld [vmem:[%s9963_s19 + $0x8] sm:$0xf]  ;;  %v5721_v57 = vld [vmem:[%s9963_s19 + $0x78] sm:$0xf] }
 0x26d   : > { %4806 = vrot.lane.b32.xlu0 %v4804_v56, %s9732_s17  ;;  %v5681_v56 = vld [vmem:[%s9963_s19 + $0x50] sm:$0xf] }
 0x26e   : > { %9087 = vmatpush3.bf16.msra.mxu0 %v10636_v47 }
 0x26f   : > { %9111 = vmatpush3.bf16.msra.mxu1 %v10640_v48  ;;  %9088 = vmatprep.subr.bf16.mxu0 %v9727_v0 }
 0x270   : > { %9112 = vmatprep.subr.bf16.mxu1 %v9727_v0  ;;  %4824 = vrot.lane.b32.xlu1 %v5607_v60, %s9730_s30  ;;  %v5667_v60 = vld [vmem:[%s9963_s19 + $0x40] sm:$0xf] }
 0x272   : > { %9090 = vmatpush3.bf16.msra.mxu0 %v10656_v58 }
 0x273   : > { %9114 = vmatpush3.bf16.msra.mxu1 %v10660_v59  ;;  %9091 = vmatprep.subr.bf16.mxu0 %v9727_v0  ;;  %v3890_v37 = vld [vmem:[%s10319_s15 + $0xc] sm:$0x1] }
 0x274   : > { %9115 = vmatprep.subr.bf16.mxu1 %v9727_v0 }
 0x276   : > { %9093 = vmatpush3.bf16.msra.mxu0 %v10677_v9 }
 0x277   : > { %9117 = vmatpush3.bf16.msra.mxu1 %v10681_v12  ;;  %9118 = vmatprep.subr.bf16.mxu0 %v9727_v0 }
 0x278   : > { %9142 = vmatprep.subr.bf16.mxu1 %v9727_v0 }
 0x279   : > { %7775 = vmatmul.mubr.f32.vlgmr.msra.gmra.mrb[40].mxu0 %v3601_v61  ;;  %v4205_v61 = vld [vmem:[#allocation5 + $0xc0] sm:$0xff] }
 0x27a   : > { %7810 = vmatmul.mubr.f32.vlgmr.msra.gmra.mrb[40].mxu1 %v3600_v3  ;;  %9120 = vmatpush3.bf16.msra.mxu0 %v10527_v4  ;;  %v4206_v3 = vld [vmem:[#allocation5 + $0xc8] sm:$0xff] }
 0x27b   : > { %9144 = vmatpush3.bf16.msra.mxu1 %v10532_v7  ;;  %9121 = vmatprep.subr.bf16.mxu0 %v9727_v0 }
 0x27c   : > { %v2604_v5 = vpop.f32.mrb[26].mxu0  ;;  %9145 = vmatprep.subr.bf16.mxu1 %v9727_v0  ;;  %7844 = vmatprep.mubr.msk.f32.mxu0 %vm9728_vm0, %v9729_v1 }
 0x27d   : > { %v2677_v13 = vpop.f32.mrb[26].mxu1  ;;  %v7326_v18 = vpop.f32.mrb[27].mxu0  ;;  %7879 = vmatprep.mubr.msk.f32.mxu1 %vm9728_vm0, %v9729_v1 }
 0x27e   : > { %v2678_v21 = vadd.f32 %v2677_v13, %v2604_v5  ;;  %v7353_v28 = vpop.f32.mrb[27].mxu1  ;;  %9123 = vmatpush3.bf16.msra.mxu0 %v10551_v15  ;;  %v4188_v5 = vld [vmem:[#allocation5 + $0x40] sm:$0xff]  ;;  %v4189_v13 = vld [vmem:[#allocation5 + $0x48] sm:$0xff]  ;;  %v11021_v18 = vpack.c.bf16 %v4206_v3, %v4205_v61 }
 0x27f   : > { %9147 = vmatpush3.bf16.msra.mxu1 %v10555_v16  ;;  %9124 = vmatprep.subr.bf16.mxu0 %v9727_v0  ;;  %v4207_v28 = vld [vmem:[#allocation5 + $0xd0] sm:$0xff]  ;;  %v5609_v61 = vld [vmem:[%s9963_s19 + $0x8] sm:$0xf] }
 0x280   : > { %v2681_v34 = vadd.f32 %v10867_v29, %v2678_v21  ;;  %9148 = vmatprep.subr.bf16.mxu1 %v9727_v0  ;;  %v11024_v21 = vpack.c.bf16 %v4189_v13, %v4188_v5  ;;  %v5611_v3 = vld [vmem:[%s9963_s19 + $0x8] sm:$0xf]  ;;  %4830 = vrot.lane.b32.xlu0 %v5609_v61, %s9732_s17  ;;  %v5615_v5 = vld [vmem:[%s9963_s19 + $0x10] sm:$0xf] }
 0x281   : > { %4836 = vrot.lane.b32.xlu1 %v5611_v3, %s9731_s14  ;;  %v5617_v13 = vld [vmem:[%s9963_s19 + $0x10] sm:$0xf] }
 0x282   : > { %v2682_v35 = vmax.f32 %v2681_v34, 0.0  ;;  %9126 = vmatpush3.bf16.msra.mxu0 %v10576_v23  ;;  %v4190_v34 = vld [vmem:[#allocation5 + $0x50] sm:$0xff] }
 0x283   : > { %9150 = vmatpush3.bf16.msra.mxu1 %v10580_v24  ;;  %9127 = vmatprep.subr.bf16.mxu0 %v9727_v0 }
 0x284   : > { %2683 = vst [vmem:[%s10319_s15 + $0xd] sm:$0x1] %v2682_v35  ;;  %9151 = vmatprep.subr.bf16.mxu1 %v9727_v0  ;;  %v4191_v35 = vld [vmem:[#allocation5 + $0x58] sm:$0xff]  ;;  %4846 = vrot.lane.b32.xlu0 %v5615_v5, %s9730_s30 }
 0x285   : > { %4852 = vrot.lane.b32.xlu1 %v5617_v13, %s9732_s17 }
 0x286   : > { %9129 = vmatpush3.bf16.msra.mxu0 %v10596_v31 }
 0x287   : > { %9153 = vmatpush3.bf16.msra.mxu1 %v10600_v32  ;;  %9130 = vmatprep.subr.bf16.mxu0 %v9727_v0 }
 0x288   : > { %9154 = vmatprep.subr.bf16.mxu1 %v9727_v0 }
 0x28a   : > { %9132 = vmatpush3.bf16.msra.mxu0 %v10616_v39 }
 0x28b   : > { %9156 = vmatpush3.bf16.msra.mxu1 %v10620_v42  ;;  %9133 = vmatprep.subr.bf16.mxu0 %v9727_v0  ;;  %v3891_v36 = vld [vmem:[%s10319_s15 + $0xd] sm:$0x1] }
 0x28c   : > { %9157 = vmatprep.subr.bf16.mxu1 %v9727_v0 }
 0x28e   : > { %9135 = vmatpush3.bf16.msra.mxu0 %v10636_v47 }
 0x28f   : > { %9159 = vmatpush3.bf16.msra.mxu1 %v10640_v48  ;;  %9136 = vmatprep.subr.bf16.mxu0 %v9727_v0 }
 0x290   : > { %9160 = vmatprep.subr.bf16.mxu1 %v9727_v0 }
 0x292   : > { %9138 = vmatpush3.bf16.msra.mxu0 %v10656_v58 }
 0x293   : > { %9162 = vmatpush3.bf16.msra.mxu1 %v10660_v59  ;;  %9139 = vmatprep.subr.bf16.mxu0 %v9727_v0 }
 0x294   : > { %v2755_v6 = vpop.f32.mrb[28].mxu0  ;;  %9163 = vmatprep.subr.bf16.mxu1 %v9727_v0 }
 0x295   : > { %v2828_v8 = vpop.f32.mrb[28].mxu1  ;;  %v7380_v10 = vpop.f32.mrb[29].mxu0 }
 0x296   : > { %v2829_v40 = vadd.f32 %v2828_v8, %v2755_v6  ;;  %v7407_v41 = vpop.f32.mrb[29].mxu1  ;;  %9141 = vmatpush3.bf16.msra.mxu0 %v10677_v9  ;;  %v11032_v8 = vpack.c.bf16 %v4191_v35, %v4190_v34  ;;  %v4209_v10 = vld [vmem:[#allocation5 + $0xe0] sm:$0xff]  ;;  %v5625_v34 = vld [vmem:[%s9963_s19 + $0x18] sm:$0xf] }
 0x297   : > { %9165 = vmatpush3.bf16.msra.mxu1 %v10681_v12  ;;  %9166 = vmatprep.subr.bf16.mxu0 %v9727_v0  ;;  %v5627_v35 = vld [vmem:[%s9963_s19 + $0x18] sm:$0xf] }
 0x298   : > { %v2832_v11 = vadd.f32 %v10867_v29, %v2829_v40  ;;  %9190 = vmatprep.subr.bf16.mxu1 %v9727_v0  ;;  %v4210_v40 = vld [vmem:[#allocation5 + $0xe8] sm:$0xff] }
 0x299   : > { %7845 = vmatmul.mubr.f32.vlgmr.msra.gmra.mrb[42].mxu0 %v3746_v14  ;;  %v4193_v14 = vld [vmem:[#allocation5 + $0x68] sm:$0xff] }
 0x29a   : > { %v2833_v19 = vmax.f32 %v2832_v11, 0.0  ;;  %7880 = vmatmul.mubr.f32.vlgmr.msra.gmra.mrb[42].mxu1 %v3745_v17  ;;  %9168 = vmatpush3.bf16.msra.mxu0 %v10527_v4  ;;  %v4192_v11 = vld [vmem:[#allocation5 + $0x60] sm:$0xff] }
 0x29b   : > { %9192 = vmatpush3.bf16.msra.mxu1 %v10532_v7  ;;  %9169 = vmatprep.subr.bf16.mxu0 %v9727_v0 }
 0x29c   : > { %2834 = vst [vmem:[%s10319_s15 + $0xe] sm:$0x1] %v2833_v19  ;;  %9193 = vmatprep.subr.bf16.mxu1 %v9727_v0  ;;  %7914 = vmatprep.mubr.msk.f32.mxu0 %vm9728_vm0, %v9729_v1 }
 0x29d   : > { %7949 = vmatprep.mubr.msk.f32.mxu1 %vm9728_vm0, %v9729_v1 }
 0x29e   : > { %9171 = vmatpush3.bf16.msra.mxu0 %v10551_v15 }
 0x29f   : > { %9195 = vmatpush3.bf16.msra.mxu1 %v10555_v16  ;;  %9172 = vmatprep.subr.bf16.mxu0 %v9727_v0 }
 0x2a0   : > { %9196 = vmatprep.subr.bf16.mxu1 %v9727_v0 }
 0x2a2   : > { %9174 = vmatpush3.bf16.msra.mxu0 %v10576_v23 }
 0x2a3   : > { %9198 = vmatpush3.bf16.msra.mxu1 %v10580_v24  ;;  %9175 = vmatprep.subr.bf16.mxu0 %v9727_v0  ;;  %v4035_v49 = vld [vmem:[%s10319_s15 + $0xe] sm:$0x1] }
 0x2a4   : > { %9199 = vmatprep.subr.bf16.mxu1 %v9727_v0 }
 0x2a6   : > { %9177 = vmatpush3.bf16.msra.mxu0 %v10596_v31 }
 0x2a7   : > { %9201 = vmatpush3.bf16.msra.mxu1 %v10600_v32  ;;  %9178 = vmatprep.subr.bf16.mxu0 %v9727_v0 }
 0x2a8   : > { %9202 = vmatprep.subr.bf16.mxu1 %v9727_v0 }
 0x2aa   : > { %9180 = vmatpush3.bf16.msra.mxu0 %v10616_v39 }
 0x2ab   : > { %9204 = vmatpush3.bf16.msra.mxu1 %v10620_v42  ;;  %9181 = vmatprep.subr.bf16.mxu0 %v9727_v0 }
 0x2ac   : > { %v2906_v20 = vpop.f32.mrb[30].mxu0  ;;  %9205 = vmatprep.subr.bf16.mxu1 %v9727_v0 }
 0x2ad   : > { %v2979_v22 = vpop.f32.mrb[30].mxu1  ;;  %v7434_v25 = vpop.f32.mrb[31].mxu0 }
 0x2ae   : > { %v2980_v26 = vadd.f32 %v2979_v22, %v2906_v20  ;;  %v7461_v27 = vpop.f32.mrb[31].mxu1  ;;  %9183 = vmatpush3.bf16.msra.mxu0 %v10636_v47  ;;  %v11037_v25 = vpack.c.bf16 %v4210_v40, %v4209_v10 }
 0x2af   : > { %9207 = vmatpush3.bf16.msra.mxu1 %v10640_v48  ;;  %9184 = vmatprep.subr.bf16.mxu0 %v9727_v0  ;;  %v4211_v27 = vld [vmem:[#allocation5 + $0xf0] sm:$0xff] }
 0x2b0   : > { %v2983_v30 = vadd.f32 %v10867_v29, %v2980_v26  ;;  %9208 = vmatprep.subr.bf16.mxu1 %v9727_v0  ;;  %v4208_v29 = vld [vmem:[#allocation5 + $0xd8] sm:$0xff]  ;;  %v11040_v26 = vpack.c.bf16 %v4193_v14, %v4192_v11 }
 0x2b1   : > { %v11029_v6 = vpack.c.bf16 %v4208_v29, %v4207_v28  ;;  %v5619_v28 = vld [vmem:[%s9963_s19 + $0x10] sm:$0xf]  ;;  %v5623_v29 = vld [vmem:[%s9963_s19 + $0x18] sm:$0xf] }
 0x2b2   : > { %v2984_v33 = vmax.f32 %v2983_v30, 0.0  ;;  %9186 = vmatpush3.bf16.msra.mxu0 %v10656_v58  ;;  %v4212_v30 = vld [vmem:[#allocation5 + $0xf8] sm:$0xff]  ;;  %4858 = vrot.lane.b32.xlu0 %v5619_v28, %s9731_s14  ;;  %v5699_v28 = vld [vmem:[%s9963_s19 + $0x60] sm:$0xf] }
 0x2b3   : > { %9210 = vmatpush3.bf16.msra.mxu1 %v10660_v59  ;;  %9187 = vmatprep.subr.bf16.mxu0 %v9727_v0 }
 0x2b4   : > { %2985 = vst [vmem:[%s10319_s15 + $0xf] sm:$0x1] %v2984_v33  ;;  %9211 = vmatprep.subr.bf16.mxu1 %v9727_v0  ;;  %4868 = vrot.lane.b32.xlu1 %v5623_v29, %s9730_s30 }
 0x2b6   : > { %9189 = vmatpush3.bf16.msra.mxu0 %v10677_v9  ;;  %4874 = vrot.lane.b32.xlu0 %v5625_v34, %s9732_s17 }
 0x2b7   : > { %9213 = vmatpush3.bf16.msra.mxu1 %v10681_v12  ;;  %9214 = vmatprep.subr.bf16.mxu0 %v9727_v0 }
 0x2b8   : > { %9238 = vmatprep.subr.bf16.mxu1 %v9727_v0  ;;  %4880 = vrot.lane.b32.xlu1 %v5627_v35, %s9731_s14  ;;  %v5715_v35 = vld [vmem:[%s9963_s19 + $0x70] sm:$0xf] }
 0x2b9   : > { %7915 = vmatmul.mubr.f32.vlgmr.msra.gmra.mrb[44].mxu0 %v3891_v36  ;;  %v4194_v36 = vld [vmem:[#allocation5 + $0x70] sm:$0xff] }
 0x2ba   : > { %7950 = vmatmul.mubr.f32.vlgmr.msra.gmra.mrb[44].mxu1 %v3890_v37  ;;  %9216 = vmatpush3.bf16.msra.mxu0 %v10527_v4  ;;  %v4195_v37 = vld [vmem:[#allocation5 + $0x78] sm:$0xff] }
 0x2bb   : > { %9240 = vmatpush3.bf16.msra.mxu1 %v10532_v7  ;;  %9217 = vmatprep.subr.bf16.mxu0 %v9727_v0  ;;  %v10967_v7 = vld [vmem:[%s11627_s5] sm:$0x1]  ;;  %v4036_v44 = vld [vmem:[%s10319_s15 + $0xf] sm:$0x1] }
 0x2bc   : > { %9241 = vmatprep.subr.bf16.mxu1 %v9727_v0  ;;  %7984 = vmatprep.mubr.msk.f32.mxu0 %vm9728_vm0, %v9729_v1 }
 0x2bd   : > { %8019 = vmatprep.mubr.msk.f32.mxu1 %vm9728_vm0, %v9729_v1 }
 0x2be   : > { %9219 = vmatpush3.bf16.msra.mxu0 %v10551_v15 }
 0x2bf   : > { %9243 = vmatpush3.bf16.msra.mxu1 %v10555_v16  ;;  %9220 = vmatprep.subr.bf16.mxu0 %v9727_v0 }
 0x2c0   : > { %9244 = vmatprep.subr.bf16.mxu1 %v9727_v0 }
 0x2c2   : > { %9222 = vmatpush3.bf16.msra.mxu0 %v10576_v23 }
 0x2c3   : > { %9246 = vmatpush3.bf16.msra.mxu1 %v10580_v24  ;;  %9223 = vmatprep.subr.bf16.mxu0 %v9727_v0 }
 0x2c4   : > { %9247 = vmatprep.subr.bf16.mxu1 %v9727_v0 }
 0x2c6   : > { %9225 = vmatpush3.bf16.msra.mxu0 %v10596_v31 }
 0x2c7   : > { %9249 = vmatpush3.bf16.msra.mxu1 %v10600_v32  ;;  %9226 = vmatprep.subr.bf16.mxu0 %v9727_v0 }
 0x2c8   : > { %9250 = vmatprep.subr.bf16.mxu1 %v9727_v0 }
 0x2ca   : > { %9228 = vmatpush3.bf16.msra.mxu0 %v10616_v39  ;;  %v4197_v39 = vld [vmem:[#allocation5 + $0x80] sm:$0xff] }
 0x2cb   : > { %9252 = vmatpush3.bf16.msra.mxu1 %v10620_v42  ;;  %9229 = vmatprep.subr.bf16.mxu0 %v9727_v0  ;;  %v4198_v42 = vld [vmem:[#allocation5 + $0x88] sm:$0xff] }
 0x2cc   : > { %v3088_v4 = vpop.f32.mrb[32].mxu0  ;;  %9253 = vmatprep.subr.bf16.mxu1 %v9727_v0  ;;  %v10983_v38 = vpack.c.bf16 %v4198_v42, %v4197_v39 }
 0x2cd   : > { %v3158_v15 = vpop.f32.mrb[32].mxu1  ;;  %v7496_v16 = vpop.f32.mrb[33].mxu0 }
 0x2ce   : > { %v3159_v23 = vadd.f32 %v3158_v15, %v3088_v4  ;;  %v7531_v24 = vpop.f32.mrb[33].mxu1  ;;  %9231 = vmatpush3.bf16.msra.mxu0 %v10636_v47  ;;  %v4180_v47 = vld [vmem:[#allocation5] sm:$0xff]  ;;  %v11046_v15 = vpack.c.bf16 %v4212_v30, %v4211_v27  ;;  %v11049_v16 = vpack.c.bf16 %v4195_v37, %v4194_v36  ;;  %v5639_v30 = vld [vmem:[%s9963_s19 + $0x28] sm:$0xf]  ;;  %v5647_v37 = vld [vmem:[%s9963_s19 + $0x30] sm:$0xf] }
 0x2cf   : > { %9255 = vmatpush3.bf16.msra.mxu1 %v10640_v48  ;;  %9232 = vmatprep.subr.bf16.mxu0 %v9727_v0  ;;  %v4181_v48 = vld [vmem:[#allocation5 + $0x8] sm:$0xff]  ;;  %v5635_v27 = vld [vmem:[%s9963_s19 + $0x20] sm:$0xf] }
 0x2d0   : > { %v3162_v31 = vadd.f32 %v3159_v23, %v10967_v7  ;;  %9256 = vmatprep.subr.bf16.mxu1 %v9727_v0  ;;  %v5643_v36 = vld [vmem:[%s9963_s19 + $0x28] sm:$0xf] }
 0x2d2   : > { %v3163_v32 = vmax.f32 %v3162_v31, 0.0  ;;  %9234 = vmatpush3.bf16.msra.mxu0 %v10656_v58  ;;  %v10986_v58 = vpack.c.bf16 %v4181_v48, %v4180_v47 }
 0x2d3   : > { %9258 = vmatpush3.bf16.msra.mxu1 %v10660_v59  ;;  %9235 = vmatprep.subr.bf16.mxu0 %v9727_v0  ;;  %v4199_v59 = vld [vmem:[#allocation5 + $0x90] sm:$0xff] }
 0x2d4   : > { %3164 = vst [vmem:[%s10978_s27] sm:$0x1] %v3163_v32  ;;  %9259 = vmatprep.subr.bf16.mxu1 %v9727_v0 }
 0x2d6   : > { %9237 = vmatpush3.bf16.msra.mxu0 %v10677_v9  ;;  %v10993_v9 = vpack.c.bf16 %v4200_v43, %v4199_v59 }
 0x2d7   : > { %9261 = vmatpush3.bf16.msra.mxu1 %v10681_v12  ;;  %9262 = vmatprep.subr.bf16.mxu0 %v9727_v0  ;;  %v10996_v12 = vpack.c.bf16 %v4183_v46, %v4182_v45 }
 0x2d8   : > { %9286 = vmatprep.subr.bf16.mxu1 %v9727_v0 }
 0x2d9   : > { %7985 = vmatmul.mubr.f32.vlgmr.msra.gmra.mrb[46].mxu0 %v4036_v44 }
 0x2da   : > { %8020 = vmatmul.mubr.f32.vlgmr.msra.gmra.mrb[46].mxu1 %v4035_v49  ;;  %9264 = vmatpush3.bf16.msra.mxu0 %v10983_v38 }
 0x2db   : > { %9288 = vmatpush3.bf16.msra.mxu1 %v10986_v58  ;;  %9265 = vmatprep.subr.bf16.mxu0 %v9727_v0  ;;  %v4214_v23 = vld [vmem:[%s10978_s27] sm:$0x1] }
 0x2dc   : > { %9289 = vmatprep.subr.bf16.mxu1 %v9727_v0  ;;  %8089 = vmatprep.mubr.msk.f32.mxu1 %vm9728_vm0, %v9729_v1 }
 0x2dd   : > { %8054 = vmatprep.mubr.msk.f32.mxu0 %vm9728_vm0, %v9729_v1 }
 0x2de   : > { %9267 = vmatpush3.bf16.msra.mxu0 %v10993_v9 }
 0x2df   : > { %9291 = vmatpush3.bf16.msra.mxu1 %v10996_v12  ;;  %9268 = vmatprep.subr.bf16.mxu0 %v9727_v0 }
 0x2e0   : > { %9292 = vmatprep.subr.bf16.mxu1 %v9727_v0 }
 0x2e2   : > { %9270 = vmatpush3.bf16.msra.mxu0 %v11005_v54 }
 0x2e3   : > { %9294 = vmatpush3.bf16.msra.mxu1 %v11008_v55  ;;  %9271 = vmatprep.subr.bf16.mxu0 %v9727_v0 }
 0x2e4   : > { %9295 = vmatprep.subr.bf16.mxu1 %v9727_v0 }
 0x2e6   : > { %9273 = vmatpush3.bf16.msra.mxu0 %v11013_v63 }
 0x2e7   : > { %9297 = vmatpush3.bf16.msra.mxu1 %v11016_v2  ;;  %9274 = vmatprep.subr.bf16.mxu0 %v9727_v0 }
 0x2e8   : > { %9298 = vmatprep.subr.bf16.mxu1 %v9727_v0 }
 0x2ea   : > { %9276 = vmatpush3.bf16.msra.mxu0 %v11021_v18 }
 0x2eb   : > { %9300 = vmatpush3.bf16.msra.mxu1 %v11024_v21  ;;  %9277 = vmatprep.subr.bf16.mxu0 %v9727_v0 }
 0x2ec   : > { %v3233_v41 = vpop.f32.mrb[34].mxu0  ;;  %9301 = vmatprep.subr.bf16.mxu1 %v9727_v0 }
 0x2ed   : > { %v3303_v17 = vpop.f32.mrb[34].mxu1  ;;  %v7566_v19 = vpop.f32.mrb[35].mxu0 }
 0x2ee   : > { %v3304_v20 = vadd.f32 %v3303_v17, %v3233_v41  ;;  %v7601_v22 = vpop.f32.mrb[35].mxu1  ;;  %9279 = vmatpush3.bf16.msra.mxu0 %v11029_v6  ;;  %v5631_v17 = vld [vmem:[%s9963_s19 + $0x20] sm:$0xf] }
 0x2ef   : > { %9303 = vmatpush3.bf16.msra.mxu1 %v11032_v8  ;;  %9280 = vmatprep.subr.bf16.mxu0 %v9727_v0  ;;  %v5633_v19 = vld [vmem:[%s9963_s19 + $0x20] sm:$0xf] }
 0x2f0   : > { %v3307_v33 = vadd.f32 %v3304_v20, %v10967_v7  ;;  %9304 = vmatprep.subr.bf16.mxu1 %v9727_v0  ;;  %4890 = vrot.lane.b32.xlu0 %v5631_v17, %s9730_s30  ;;  %v5751_v17 = vld [vmem:[%s9963_s19 + $0x70] sm:$0xf] }
 0x2f1   : > { %4896 = vrot.lane.b32.xlu1 %v5633_v19, %s9732_s17  ;;  %v5747_v19 = vld [vmem:[%s9963_s19 + $0x60] sm:$0xf] }
 0x2f2   : > { %v3308_v4 = vmax.f32 %v3307_v33, 0.0  ;;  %9282 = vmatpush3.bf16.msra.mxu0 %v11037_v25  ;;  %v5641_v33 = vld [vmem:[%s9963_s19 + $0x28] sm:$0xf] }
 0x2f3   : > { %9306 = vmatpush3.bf16.msra.mxu1 %v11040_v26  ;;  %9283 = vmatprep.subr.bf16.mxu0 %v9727_v0 }
 0x2f4   : > { %3309 = vst [vmem:[%s10978_s27 + $0x1] sm:$0x1] %v3308_v4  ;;  %9307 = vmatprep.subr.bf16.mxu1 %v9727_v0  ;;  %4902 = vrot.lane.b32.xlu0 %v5635_v27, %s9731_s14  ;;  %v5649_v4 = vld [vmem:[%s9963_s19 + $0x30] sm:$0xf] }
 0x2f5   : > { %4912 = vrot.lane.b32.xlu1 %v5639_v30, %s9730_s30 }
 0x2f6   : > { %9285 = vmatpush3.bf16.msra.mxu0 %v11046_v15 }
 0x2f7   : > { %9309 = vmatpush3.bf16.msra.mxu1 %v11049_v16  ;;  %9310 = vmatprep.subr.bf16.mxu0 %v9727_v0 }
 0x2f8   : > { %9334 = vmatprep.subr.bf16.mxu1 %v9727_v0  ;;  %4918 = vrot.lane.b32.xlu0 %v5641_v33, %s9732_s17 }
 0x2f9   : > { %4924 = vrot.lane.b32.xlu1 %v5643_v36, %s9731_s14 }
 0x2fa   : > { %8090 = vmatmul.mubr.f32.vlgmr.msra.gmra.mrb[48].mxu1 %v4214_v23 }
 0x2fb   : > { %v4215_v24 = vld [vmem:[%s10978_s27 + $0x1] sm:$0x1]  ;;  %9336 = vmatpush3.bf16.msra.mxu1 %v10986_v58  ;;  %8159 = vmatprep.mubr.msk.f32.mxu1 %vm9728_vm0, %v9729_v1 }
 0x2fc   : > { %8055 = vmatmul.mubr.f32.vlgmr.msra.gmra.mrb[48].mxu0 %v4215_v24  ;;  %9337 = vmatprep.subr.bf16.mxu1 %v9727_v0  ;;  %v5651_v24 = vld [vmem:[%s9963_s19 + $0x30] sm:$0xf] }
 0x2fd   : > { %9312 = vmatpush3.bf16.msra.mxu0 %v10983_v38  ;;  %8124 = vmatprep.mubr.msk.f32.mxu0 %vm9728_vm0, %v9729_v1 }
 0x2fe   : > { %9313 = vmatprep.subr.bf16.mxu0 %v9727_v0  ;;  %4934 = vrot.lane.b32.xlu0 %v5647_v37, %s9730_s30 }
 0x2ff   : > { %9339 = vmatpush3.bf16.msra.mxu1 %v10996_v12  ;;  %4940 = vrot.lane.b32.xlu1 %v5649_v4, %s9732_s17 }
 0x300   : > { %9340 = vmatprep.subr.bf16.mxu1 %v9727_v0 }
 0x301   : > { %9315 = vmatpush3.bf16.msra.mxu0 %v10993_v9 }
 0x302   : > { %9316 = vmatprep.subr.bf16.mxu0 %v9727_v0  ;;  %4946 = vrot.lane.b32.xlu0 %v5651_v24, %s9731_s14 }
 0x303   : > { %9342 = vmatpush3.bf16.msra.mxu1 %v11008_v55 }
 0x304   : > { %9343 = vmatprep.subr.bf16.mxu1 %v9727_v0 }
 0x305   : > { %9318 = vmatpush3.bf16.msra.mxu0 %v11005_v54 }
 0x306   : > { %9319 = vmatprep.subr.bf16.mxu0 %v9727_v0 }
 0x307   : > { %9345 = vmatpush3.bf16.msra.mxu1 %v11016_v2 }
 0x308   : > { %9346 = vmatprep.subr.bf16.mxu1 %v9727_v0 }
 0x309   : > { %9321 = vmatpush3.bf16.msra.mxu0 %v11013_v63 }
 0x30a   : > { %9322 = vmatprep.subr.bf16.mxu0 %v9727_v0 }
 0x30b   : > { %9348 = vmatpush3.bf16.msra.mxu1 %v11024_v21 }
 0x30c   : > { %v3378_v31 = vpop.f32.mrb[36].mxu0  ;;  %9349 = vmatprep.subr.bf16.mxu1 %v9727_v0 }
 0x30d   : > { %v3448_v32 = vpop.f32.mrb[36].mxu1  ;;  %v7636_v39 = vpop.f32.mrb[37].mxu0  ;;  %9324 = vmatpush3.bf16.msra.mxu0 %v11021_v18 }
 0x30e   : > { %v3449_v42 = vadd.f32 %v3448_v32, %v3378_v31  ;;  %v7671_v47 = vpop.f32.mrb[37].mxu1  ;;  %9325 = vmatprep.subr.bf16.mxu0 %v9727_v0  ;;  %v5655_v31 = vld [vmem:[%s9963_s19 + $0x38] sm:$0xf] }
 0x30f   : > { %9351 = vmatpush3.bf16.msra.mxu1 %v11032_v8  ;;  %4956 = vrot.lane.b32.xlu1 %v5655_v31, %s9730_s30  ;;  %v5657_v32 = vld [vmem:[%s9963_s19 + $0x38] sm:$0xf]  ;;  %v5679_v47 = vld [vmem:[%s9963_s19 + $0x50] sm:$0xf] }
 0x310   : > { %v3452_v48 = vadd.f32 %v3449_v42, %v10967_v7  ;;  %9352 = vmatprep.subr.bf16.mxu1 %v9727_v0  ;;  %v5659_v39 = vld [vmem:[%s9963_s19 + $0x38] sm:$0xf]  ;;  %4962 = vrot.lane.b32.xlu0 %v5657_v32, %s9732_s17  ;;  %v5665_v42 = vld [vmem:[%s9963_s19 + $0x40] sm:$0xf]  ;;  %v5613_v32 = vld [vmem:[%s9963_s19 + $0x10] sm:$0xf] }
 0x311   : > { %9327 = vmatpush3.bf16.msra.mxu0 %v11029_v6  ;;  %5614 = vst.msk [vmem:[%s11280_s25 + $0x8] sm:$0xf] %vm4795_vm1, %v5613_v32 }
 0x312   : > { %v3453_v59 = vmax.f32 %v3452_v48, 0.0  ;;  %9328 = vmatprep.subr.bf16.mxu0 %v9727_v0 }
 0x313   : > { %9354 = vmatpush3.bf16.msra.mxu1 %v11040_v26  ;;  %4968 = vrot.lane.b32.xlu1 %v5659_v39, %s9731_s14  ;;  %v5621_v39 = vld [vmem:[%s9963_s19 + $0x18] sm:$0xf] }
 0x314   : > { %3454 = vst [vmem:[%s10978_s27 + $0x2] sm:$0x1] %v3453_v59  ;;  %9355 = vmatprep.subr.bf16.mxu1 %v9727_v0  ;;  %5622 = vst.msk [vmem:[%s11280_s25 + $0xc] sm:$0xf] %vm4795_vm1, %v5621_v39 }
 0x315   : > { %9330 = vmatpush3.bf16.msra.mxu0 %v11037_v25 }
 0x316   : > { %9331 = vmatprep.subr.bf16.mxu0 %v9727_v0 }
 0x317   : > { %9357 = vmatpush3.bf16.msra.mxu1 %v11049_v16  ;;  %4984 = vrot.lane.b32.xlu1 %v5665_v42, %s9732_s17 }
 0x318   : > { %9382 = vmatprep.subr.bf16.mxu1 %v9727_v0 }
 0x319   : > { %9333 = vmatpush3.bf16.msra.mxu0 %v11046_v15 }
 0x31a   : > { %9358 = vmatprep.subr.bf16.mxu0 %v9727_v0 }
 0x31b   : > { %v4359_v43 = vld [vmem:[%s10978_s27 + $0x2] sm:$0x1]  ;;  %5022 = vrot.lane.b32.xlu1 %v5679_v47, %s9730_s30 }
 0x31c   : > { %8160 = vmatmul.mubr.f32.vlgmr.msra.gmra.mrb[50].mxu1 %v4359_v43 }
 0x31d   : > { %9384 = vmatpush3.bf16.msra.mxu1 %v10986_v58  ;;  %8229 = vmatprep.mubr.msk.f32.mxu1 %vm9728_vm0, %v9729_v1 }
 0x31e   : > { %9385 = vmatprep.subr.bf16.mxu1 %v9727_v0 }
 0x321   : > { %9387 = vmatpush3.bf16.msra.mxu1 %v10996_v12 }
 0x322   : > { %9388 = vmatprep.subr.bf16.mxu1 %v9727_v0 }
 0x325   : > { %9390 = vmatpush3.bf16.msra.mxu1 %v11008_v55 }
 0x326   : > { %9391 = vmatprep.subr.bf16.mxu1 %v9727_v0 }
 0x329   : > { %9393 = vmatpush3.bf16.msra.mxu1 %v11016_v2 }
 0x32a   : > { %9394 = vmatprep.subr.bf16.mxu1 %v9727_v0 }
 0x32c   : > { %v3523_v44 = vpop.f32.mrb[38].mxu0 }
 0x32d   : > { %v3593_v45 = vpop.f32.mrb[38].mxu1  ;;  %v7706_v46 = vpop.f32.mrb[39].mxu0  ;;  %9396 = vmatpush3.bf16.msra.mxu1 %v11024_v21 }
 0x32e   : > { %v3594_v49 = vadd.f32 %v3593_v45, %v3523_v44  ;;  %v7741_v50 = vpop.f32.mrb[39].mxu1  ;;  %9397 = vmatprep.subr.bf16.mxu1 %v9727_v0  ;;  %v5687_v45 = vld [vmem:[%s9963_s19 + $0x58] sm:$0xf] }
 0x330   : > { %v3597_v51 = vadd.f32 %v3594_v49, %v10967_v7  ;;  %v5711_v49 = vld [vmem:[%s9963_s19 + $0x70] sm:$0xf] }
 0x331   : > { %9399 = vmatpush3.bf16.msra.mxu1 %v11032_v8 }
 0x332   : > { %v3598_v52 = vmax.f32 %v3597_v51, 0.0  ;;  %9400 = vmatprep.subr.bf16.mxu1 %v9727_v0  ;;  %v5673_v51 = vld [vmem:[%s9963_s19 + $0x48] sm:$0xf] }
 0x334   : > { %3599 = vst [vmem:[%s10978_s27 + $0x3] sm:$0x1] %v3598_v52  ;;  %v5719_v52 = vld [vmem:[%s9963_s19 + $0x78] sm:$0xf] }
 0x335   : > { %9402 = vmatpush3.bf16.msra.mxu1 %v11040_v26 }
 0x336   : > { %9403 = vmatprep.subr.bf16.mxu1 %v9727_v0 }
 0x339   : > { %9405 = vmatpush3.bf16.msra.mxu1 %v11049_v16 }
 0x33a   : > { %9430 = vmatprep.subr.bf16.mxu1 %v9727_v0 }
 0x33b   : > { %v4360_v62 = vld [vmem:[%s10978_s27 + $0x3] sm:$0x1] }
 0x33c   : > { %8125 = vmatmul.mubr.f32.vlgmr.msra.gmra.mrb[50].mxu0 %v4360_v62  ;;  %v5683_v62 = vld [vmem:[%s9963_s19 + $0x50] sm:$0xf] }
 0x33d   : > { %9360 = vmatpush3.bf16.msra.mxu0 %v10983_v38  ;;  %8194 = vmatprep.mubr.msk.f32.mxu0 %vm9728_vm0, %v9729_v1 }
 0x33e   : > { %9361 = vmatprep.subr.bf16.mxu0 %v9727_v0 }
 0x341   : > { %9363 = vmatpush3.bf16.msra.mxu0 %v10993_v9 }
 0x342   : > { %9364 = vmatprep.subr.bf16.mxu0 %v9727_v0 }
 0x345   : > { %9366 = vmatpush3.bf16.msra.mxu0 %v11005_v54 }
 0x346   : > { %9367 = vmatprep.subr.bf16.mxu0 %v9727_v0 }
 0x349   : > { %9369 = vmatpush3.bf16.msra.mxu0 %v11013_v63 }
 0x34a   : > { %9370 = vmatprep.subr.bf16.mxu0 %v9727_v0 }
 0x34c   : > { %v3668_v10 = vpop.f32.mrb[40].mxu0 }
 0x34d   : > { %v3738_v40 = vpop.f32.mrb[40].mxu1  ;;  %v7776_v41 = vpop.f32.mrb[41].mxu0  ;;  %9372 = vmatpush3.bf16.msra.mxu0 %v11021_v18 }
 0x34e   : > { %v3739_v11 = vadd.f32 %v3738_v40, %v3668_v10  ;;  %v7811_v14 = vpop.f32.mrb[41].mxu1  ;;  %9373 = vmatprep.subr.bf16.mxu0 %v9727_v0  ;;  %v5150_v10 = vld [vmem:[%s9963_s19] sm:$0xf]  ;;  %v5605_v40 = vld [vmem:[%s9963_s19 + $0x8] sm:$0xf] }
 0x34f   : > { %5606 = vst.msk [vmem:[%s11280_s25 + $0x4] sm:$0xf] %vm4795_vm1, %v5605_v40  ;;  %v5743_v14 = vld [vmem:[%s9963_s19 + $0x50] sm:$0xf] }
 0x350   : > { %v3742_v20 = vadd.f32 %v3739_v11, %v10967_v7  ;;  %v5731_v11 = vld [vmem:[%s9963_s19 + $0x20] sm:$0xf] }
 0x351   : > { %9375 = vmatpush3.bf16.msra.mxu0 %v11029_v6 }
 0x352   : > { %v3743_v22 = vmax.f32 %v3742_v20, 0.0  ;;  %9376 = vmatprep.subr.bf16.mxu0 %v9727_v0  ;;  %v4800_v20 = vpop.permute.xlu0 %4799 }
 0x354   : > { %3744 = vst [vmem:[%s10978_s27 + $0x4] sm:$0x1] %v3743_v22  ;;  %v4814_v22 = vpop.permute.xlu1 %4813 }
 0x355   : > { %9378 = vmatpush3.bf16.msra.mxu0 %v11037_v25 }
 0x356   : > { %9379 = vmatprep.subr.bf16.mxu0 %v9727_v0  ;;  %v4807_v27 = vpop.permute.xlu0 %4806 }
 0x358   : > { %v4825_v30 = vpop.permute.xlu1 %4824 }
 0x359   : > { %9381 = vmatpush3.bf16.msra.mxu0 %v11046_v15  ;;  %5608 = vst.msk [vmem:[%s11280_s25 + $0x4] sm:$0xf] %vm4802_vm3, %v4825_v30 }
 0x35a   : > { %9406 = vmatprep.subr.bf16.mxu0 %v9727_v0  ;;  %v4831_v31 = vpop.permute.xlu0 %4830 }
 0x35b   : > { %v4504_v23 = vld [vmem:[%s10978_s27 + $0x4] sm:$0x1]  ;;  %5610 = vst.msk [vmem:[%s11280_s25 + $0x4] sm:$0xf] %vm4809_vm4, %v4831_v31 }
 0x35c   : > { %8230 = vmatmul.mubr.f32.vlgmr.msra.gmra.mrb[52].mxu1 %v4504_v23  ;;  %v4837_v42 = vpop.permute.xlu1 %4836 }
 0x35d   : > { %9432 = vmatpush3.bf16.msra.mxu1 %v10986_v58  ;;  %8299 = vmatprep.mubr.msk.f32.mxu1 %vm9728_vm0, %v9729_v1  ;;  %v5663_v58 = vld [vmem:[%s9963_s19 + $0x40] sm:$0xf]  ;;  %5612 = vst.msk [vmem:[%s11280_s25 + $0x4] sm:$0xf] %vm4816_vm5, %v4837_v42 }
 0x35e   : > { %9433 = vmatprep.subr.bf16.mxu1 %v9727_v0  ;;  %4978 = vrot.lane.b32.xlu0 %v5663_v58, %s9730_s30  ;;  %v5629_v58 = vld [vmem:[%s9963_s19 + $0x20] sm:$0xf] }
 0x35f   : > { %5630 = vst.msk [vmem:[%s11280_s25 + $0x10] sm:$0xf] %vm4795_vm1, %v5629_v58 }
 0x361   : > { %9435 = vmatpush3.bf16.msra.mxu1 %v10996_v12  ;;  %v5671_v12 = vld [vmem:[%s9963_s19 + $0x48] sm:$0xf] }
 0x362   : > { %9436 = vmatprep.subr.bf16.mxu1 %v9727_v0  ;;  %5000 = vrot.lane.b32.xlu0 %v5671_v12, %s9730_s30  ;;  %v5645_v12 = vld [vmem:[%s9963_s19 + $0x30] sm:$0xf] }
 0x363   : > { %5646 = vst.msk [vmem:[%s11280_s25 + $0x18] sm:$0xf] %vm4795_vm1, %v5645_v12 }
 0x365   : > { %9438 = vmatpush3.bf16.msra.mxu1 %v11008_v55 }
 0x366   : > { %9439 = vmatprep.subr.bf16.mxu1 %v9727_v0  ;;  %5044 = vrot.lane.b32.xlu0 %v5687_v45, %s9730_s30 }
 0x369   : > { %9441 = vmatpush3.bf16.msra.mxu1 %v11016_v2  ;;  %v5695_v2 = vld [vmem:[%s9963_s19 + $0x60] sm:$0xf] }
 0x36a   : > { %9442 = vmatprep.subr.bf16.mxu1 %v9727_v0  ;;  %5066 = vrot.lane.b32.xlu1 %v5695_v2, %s9730_s30 }
 0x36c   : > { %v3813_v55 = vpop.f32.mrb[42].mxu0 }
 0x36d   : > { %v3883_v48 = vpop.f32.mrb[42].mxu1  ;;  %v7846_v59 = vpop.f32.mrb[43].mxu0  ;;  %9444 = vmatpush3.bf16.msra.mxu1 %v11024_v21  ;;  %v5703_v21 = vld [vmem:[%s9963_s19 + $0x68] sm:$0xf] }
 0x36e   : > { %v3884_v43 = vadd.f32 %v3883_v48, %v3813_v55  ;;  %v7881_v44 = vpop.f32.mrb[43].mxu1  ;;  %9445 = vmatprep.subr.bf16.mxu1 %v9727_v0  ;;  %5110 = vrot.lane.b32.xlu1 %v5711_v49, %s9730_s30  ;;  %v4847_v55 = vpop.permute.xlu0 %4846 }
 0x36f   : > { %5088 = vrot.lane.b32.xlu0 %v5703_v21, %s9730_s30  ;;  %5616 = vst.msk [vmem:[%s11280_s25 + $0x8] sm:$0xf] %vm4802_vm3, %v4847_v55  ;;  %v4853_v48 = vpop.permute.xlu1 %4852 }
 0x370   : > { %v3887_v46 = vadd.f32 %v3884_v43, %v10967_v7  ;;  %5618 = vst.msk [vmem:[%s11280_s25 + $0x8] sm:$0xf] %vm4809_vm4, %v4853_v48 }
 0x371   : > { %9447 = vmatpush3.bf16.msra.mxu1 %v11032_v8  ;;  %v5689_v8 = vld [vmem:[%s9963_s19 + $0x58] sm:$0xf] }
 0x372   : > { %v3888_v50 = vmax.f32 %v3887_v46, 0.0  ;;  %9448 = vmatprep.subr.bf16.mxu1 %v9727_v0  ;;  %5006 = vrot.lane.b32.xlu1 %v5673_v51, %s9732_s17  ;;  %v4859_v59 = vpop.permute.xlu0 %4858 }
 0x373   : > { %5132 = vrot.lane.b32.xlu0 %v5719_v52, %s9730_s30  ;;  %5620 = vst.msk [vmem:[%s11280_s25 + $0x8] sm:$0xf] %vm4816_vm5, %v4859_v59  ;;  %v4869_v43 = vpop.permute.xlu1 %4868  ;;  %s5546_s30 = sshll.u32 %s10297_s10, 2 }
 0x374   : > { %3889 = vst [vmem:[%s10978_s27 + $0x5] sm:$0x1] %v3888_v50  ;;  %5624 = vst.msk [vmem:[%s11280_s25 + $0xc] sm:$0xf] %vm4802_vm3, %v4869_v43 }
 0x375   : > { %9450 = vmatpush3.bf16.msra.mxu1 %v11040_v26  ;;  %v5705_v26 = vld [vmem:[%s9963_s19 + $0x68] sm:$0xf] }
 0x376   : > { %9451 = vmatprep.subr.bf16.mxu1 %v9727_v0  ;;  %5050 = vrot.lane.b32.xlu1 %v5689_v8, %s9732_s17  ;;  %v4875_v2 = vpop.permute.xlu0 %4874 }
 0x377   : > { %5028 = vrot.lane.b32.xlu0 %v5681_v56, %s9732_s17  ;;  %5626 = vst.msk [vmem:[%s11280_s25 + $0xc] sm:$0xf] %vm4809_vm4, %v4875_v2  ;;  %v4881_v45 = vpop.permute.xlu1 %4880 }
 0x378   : > { %5628 = vst.msk [vmem:[%s11280_s25 + $0xc] sm:$0xf] %vm4816_vm5, %v4881_v45 }
 0x379   : > { %9453 = vmatpush3.bf16.msra.mxu1 %v11049_v16  ;;  %v5697_v16 = vld [vmem:[%s9963_s19 + $0x60] sm:$0xf] }
 0x37a   : > { %5094 = vrot.lane.b32.xlu1 %v5705_v26, %s9732_s17  ;;  %v4891_v46 = vpop.permute.xlu0 %4890 }
 0x37b   : > { %v4505_v53 = vld [vmem:[%s10978_s27 + $0x5] sm:$0x1]  ;;  %5072 = vrot.lane.b32.xlu0 %v5697_v16, %s9732_s17  ;;  %5632 = vst.msk [vmem:[%s11280_s25 + $0x10] sm:$0xf] %vm4802_vm3, %v4891_v46  ;;  %v4897_v49 = vpop.permute.xlu1 %4896  ;;  %v11364_v16 = vld [vmem:[%s11629_s7] sm:$0x1] }
 0x37c   : > { %8195 = vmatmul.mubr.f32.vlgmr.msra.gmra.mrb[52].mxu0 %v4505_v53  ;;  %5634 = vst.msk [vmem:[%s11280_s25 + $0x10] sm:$0xf] %vm4809_vm4, %v4897_v49 }
 0x37d   : > { %9408 = vmatpush3.bf16.msra.mxu0 %v10983_v38  ;;  %8264 = vmatprep.mubr.msk.f32.mxu0 %vm9728_vm0, %v9729_v1  ;;  %v5713_v38 = vld [vmem:[%s9963_s19 + $0x70] sm:$0xf]  ;;  %v5675_v1 = vld [vmem:[%s9963_s19 + $0x48] sm:$0xf] }
 0x37e   : > { %9409 = vmatprep.subr.bf16.mxu0 %v9727_v0  ;;  %5138 = vrot.lane.b32.xlu1 %v5721_v57, %s9732_s17  ;;  %v4903_v21 = vpop.permute.xlu0 %4902 }
 0x37f   : > { %5116 = vrot.lane.b32.xlu0 %v5713_v38, %s9732_s17  ;;  %5636 = vst.msk [vmem:[%s11280_s25 + $0x10] sm:$0xf] %vm4816_vm5, %v4903_v21  ;;  %v4913_v50 = vpop.permute.xlu1 %4912  ;;  %v5741_v21 = vld [vmem:[%s9963_s19 + $0x50] sm:$0xf]  ;;  %s9591_s17 = scalar_lea.vmem %s11511_s23, 128 }
 0x380   : > { %5742 = vst.msk [vmem:[%s11435_s22 + $0x14] sm:$0xf] %vm4795_vm1, %v5741_v21  ;;  %p9592_p10 = scmp.ne.s32.totalorder %s11511_s23, %s9591_s17 }
 0x381   : > { %9411 = vmatpush3.bf16.msra.mxu0 %v10993_v9  ;;  %v5691_v9 = vld [vmem:[%s9963_s19 + $0x58] sm:$0xf] }
 0x382   : > { %9412 = vmatprep.subr.bf16.mxu0 %v9727_v0  ;;  %5012 = vrot.lane.b32.xlu1 %v5675_v1, %s9731_s14  ;;  %v4919_v51 = vpop.permute.xlu0 %4918  ;;  %p9593_p2 = pnand %p9592_p10, %p11664_p1 }
 0x383   : > { %4990 = vrot.lane.b32.xlu0 %v5667_v60, %s9731_s14  ;;  %v4925_v52 = vpop.permute.xlu1 %4924 }
 0x384   : > { %p9594_p3 = pneg %p9593_p2 }
 0x385   : > { %9414 = vmatpush3.bf16.msra.mxu0 %v11005_v54 }
 0x386   : > { %9415 = vmatprep.subr.bf16.mxu0 %v9727_v0  ;;  %5056 = vrot.lane.b32.xlu1 %v5691_v9, %s9731_s14  ;;  %v4935_v53 = vpop.permute.xlu0 %4934  ;;  %v5653_v9 = vld [vmem:[%s9963_s19 + $0x38] sm:$0xf] }
 0x387   : > { %5034 = vrot.lane.b32.xlu0 %v5683_v62, %s9731_s14  ;;  %5648 = vst.msk [vmem:[%s11280_s25 + $0x18] sm:$0xf] %vm4802_vm3, %v4935_v53  ;;  %v4941_v26 = vpop.permute.xlu1 %4940 }
 0x388   : > { %5650 = vst.msk [vmem:[%s11280_s25 + $0x18] sm:$0xf] %vm4809_vm4, %v4941_v26  ;;  %v5745_v26 = vld [vmem:[%s9963_s19 + $0x60] sm:$0xf] }
 0x389   : > { %9417 = vmatpush3.bf16.msra.mxu0 %v11013_v63  ;;  %v5707_v63 = vld [vmem:[%s9963_s19 + $0x68] sm:$0xf]  ;;  %5654 = vst.msk [vmem:[%s11280_s25 + $0x1c] sm:$0xf] %vm4795_vm1, %v5653_v9  ;;  %5746 = vst.msk [vmem:[%s11435_s22 + $0x18] sm:$0xf] %vm4795_vm1, %v5745_v26 }
 0x38a   : > { %9418 = vmatprep.subr.bf16.mxu0 %v9727_v0  ;;  %5100 = vrot.lane.b32.xlu1 %v5707_v63, %s9731_s14  ;;  %v4947_v60 = vpop.permute.xlu0 %4946  ;;  %v5677_v63 = vld [vmem:[%s9963_s19 + $0x50] sm:$0xf] }
 0x38b   : > { %5078 = vrot.lane.b32.xlu0 %v5699_v28, %s9731_s14  ;;  %5652 = vst.msk [vmem:[%s11280_s25 + $0x18] sm:$0xf] %vm4816_vm5, %v4947_v60  ;;  %v5669_v28 = vld [vmem:[%s9963_s19 + $0x48] sm:$0xf] }
 0x38c   : > { %v3958_v61 = vpop.f32.mrb[44].mxu0  ;;  %5678 = vst.msk [vmem:[%s11280_s25 + $0x28] sm:$0xf] %vm4795_vm1, %v5677_v63  ;;  %5670 = vst.msk [vmem:[%s11280_s25 + $0x24] sm:$0xf] %vm4795_vm1, %v5669_v28 }
 0x38d   : > { %v4028_v54 = vpop.f32.mrb[44].mxu1  ;;  %v7916_v3 = vpop.f32.mrb[45].mxu0  ;;  %9420 = vmatpush3.bf16.msra.mxu0 %v11021_v18  ;;  %v5723_v18 = vld [vmem:[%s9963_s19 + $0x78] sm:$0xf] }
 0x38e   : > { %v4029_v5 = vadd.f32 %v4028_v54, %v3958_v61  ;;  %v7951_v13 = vpop.f32.mrb[45].mxu1  ;;  %9421 = vmatprep.subr.bf16.mxu0 %v9727_v0  ;;  %5144 = vrot.lane.b32.xlu1 %v5723_v18, %s9731_s14  ;;  %v4957_v61 = vpop.permute.xlu1 %4956  ;;  %v5709_v18 = vld [vmem:[%s9963_s19 + $0x70] sm:$0xf] }
 0x38f   : > { %5122 = vrot.lane.b32.xlu0 %v5715_v35, %s9731_s14  ;;  %5656 = vst.msk [vmem:[%s11280_s25 + $0x1c] sm:$0xf] %vm4802_vm3, %v4957_v61  ;;  %v4963_v3 = vpop.permute.xlu0 %4962  ;;  %v5661_v13 = vld [vmem:[%s9963_s19 + $0x40] sm:$0xf]  ;;  %v5701_v35 = vld [vmem:[%s9963_s19 + $0x68] sm:$0xf] }
 0x390   : > { %v4032_v29 = vadd.f32 %v4029_v5, %v10967_v7  ;;  %5658 = vst.msk [vmem:[%s11280_s25 + $0x1c] sm:$0xf] %vm4809_vm4, %v4963_v3 }
 0x391   : > { %9423 = vmatpush3.bf16.msra.mxu0 %v11029_v6  ;;  %v5727_v6 = vld [vmem:[%s9963_s19 + $0x10] sm:$0xf]  ;;  %5662 = vst.msk [vmem:[%s11280_s25 + $0x20] sm:$0xf] %vm4795_vm1, %v5661_v13  ;;  %5710 = vst.msk [vmem:[%s11280_s25 + $0x38] sm:$0xf] %vm4795_vm1, %v5709_v18 }
 0x392   : > { %v4033_v34 = vmax.f32 %v4032_v29, 0.0  ;;  %9424 = vmatprep.subr.bf16.mxu0 %v9727_v0  ;;  %5161 = vrot.lane.b32.xlu1 %v5727_v6, %s9731_s14  ;;  %v4969_v5 = vpop.permute.xlu1 %4968  ;;  %v5693_v29 = vld [vmem:[%s9963_s19 + $0x60] sm:$0xf]  ;;  %v5717_v6 = vld [vmem:[%s9963_s19 + $0x78] sm:$0xf] }
 0x393   : > { %5152 = vrot.lane.b32.xlu0 %v5150_v10, %s9731_s14  ;;  %5660 = vst.msk [vmem:[%s11280_s25 + $0x1c] sm:$0xf] %vm4816_vm5, %v4969_v5 }
 0x394   : > { %4034 = vst [vmem:[%s10978_s27 + $0x6] sm:$0x1] %v4033_v34  ;;  %v5685_v34 = vld [vmem:[%s9963_s19 + $0x58] sm:$0xf]  ;;  %5694 = vst.msk [vmem:[%s11280_s25 + $0x30] sm:$0xf] %vm4795_vm1, %v5693_v29 }
 0x395   : > { %9426 = vmatpush3.bf16.msra.mxu0 %v11037_v25  ;;  %v5735_v25 = vld [vmem:[%s9963_s19 + $0x30] sm:$0xf]  ;;  %5686 = vst.msk [vmem:[%s11280_s25 + $0x2c] sm:$0xf] %vm4795_vm1, %v5685_v34  ;;  %5702 = vst.msk [vmem:[%s11280_s25 + $0x34] sm:$0xf] %vm4795_vm1, %v5701_v35 }
 0x396   : > { %9427 = vmatprep.subr.bf16.mxu0 %v9727_v0  ;;  %v4794_v0 = vld [vmem:[%s9963_s19] sm:$0xf]  ;;  %5179 = vrot.lane.b32.xlu1 %v5735_v25, %s9731_s14  ;;  %5718 = vst.msk [vmem:[%s11280_s25 + $0x3c] sm:$0xf] %vm4795_vm1, %v5717_v6  ;;  %v4985_v25 = vpop.permute.xlu1 %4984 }
 0x397   : > { %4796 = vst.msk [vmem:[%s11280_s25] sm:$0xf] %vm4795_vm1, %v4794_v0  ;;  %5170 = vrot.lane.b32.xlu0 %v5731_v11, %s9731_s14 }
 0x398   : > { %4803 = vst.msk [vmem:[%s11280_s25] sm:$0xf] %vm4802_vm3, %v4800_v20 }
 0x399   : > { %9429 = vmatpush3.bf16.msra.mxu0 %v11046_v15  ;;  %v5739_v15 = vld [vmem:[%s9963_s19 + $0x40] sm:$0xf]  ;;  %4810 = vst.msk [vmem:[%s11280_s25] sm:$0xf] %vm4809_vm4, %v4807_v27 }
 0x39a   : > { %5197 = vrot.lane.b32.xlu1 %v5743_v14, %s9731_s14  ;;  %4817 = vst.msk [vmem:[%s11280_s25] sm:$0xf] %vm4816_vm5, %v4814_v22  ;;  %v5023_v40 = vpop.permute.xlu1 %5022 }
 0x39b   : > { %v4649_v41 = vld [vmem:[%s10978_s27 + $0x6] sm:$0x1]  ;;  %5188 = vrot.lane.b32.xlu0 %v5739_v15, %s9731_s14  ;;  %5680 = vst.msk [vmem:[%s11280_s25 + $0x28] sm:$0xf] %vm4802_vm3, %v5023_v40 }
 0x39c   : > { %8300 = vmatmul.mubr.f32.vlgmr.msra.gmra.mrb[54].mxu1 %v4649_v41 }
 0x39e   : > { %5215 = vrot.lane.b32.xlu1 %v5751_v17, %s9731_s14 }
 0x39f   : > { %5206 = vrot.lane.b32.xlu0 %v5747_v19, %s9731_s14  ;;  %s11377_s14 = scalar_lea.vmem [#allocation10], %s5546_s30  ;;  %s11514_s30 = scalar_lea.sflag [#allocation9], %s5235_s28 }
 0x3ac   : > { %v4103_v33 = vpop.f32.mrb[46].mxu0 }
 0x3ad   : > { %v4173_v36 = vpop.f32.mrb[46].mxu1  ;;  %v7986_v37 = vpop.f32.mrb[47].mxu0 }
 0x3ae   : > { %v4174_v4 = vadd.f32 %v4173_v36, %v4103_v33  ;;  %v8021_v23 = vpop.f32.mrb[47].mxu1  ;;  %v5725_v33 = vld [vmem:[%s9963_s19 + $0x10] sm:$0xf]  ;;  %v5148_v36 = vld [vmem:[%s9963_s19] sm:$0xf] }
 0x3af   : > { %5726 = vst.msk [vmem:[%s11435_s22 + $0x4] sm:$0xf] %vm4795_vm1, %v5725_v33  ;;  %5149 = vst.msk [vmem:[%s11435_s22] sm:$0xf] %vm4795_vm1, %v5148_v36  ;;  %v5733_v37 = vld [vmem:[%s9963_s19 + $0x30] sm:$0xf] }
 0x3b0   : > { %v4177_v24 = vadd.f32 %v4174_v4, %v10967_v7  ;;  %v5637_v7 = vld [vmem:[%s9963_s19 + $0x28] sm:$0xf]  ;;  %v5729_v4 = vld [vmem:[%s9963_s19 + $0x20] sm:$0xf]  ;;  %5734 = vst.msk [vmem:[%s11435_s22 + $0xc] sm:$0xf] %vm4795_vm1, %v5733_v37 }
 0x3b1   : > { %5638 = vst.msk [vmem:[%s11280_s25 + $0x14] sm:$0xf] %vm4795_vm1, %v5637_v7  ;;  %5730 = vst.msk [vmem:[%s11435_s22 + $0x8] sm:$0xf] %vm4795_vm1, %v5729_v4 }
 0x3b2   : > { %v4178_v47 = vmax.f32 %v4177_v24, 0.0  ;;  %5640 = vst.msk [vmem:[%s11280_s25 + $0x14] sm:$0xf] %vm4802_vm3, %v4913_v50  ;;  %v5737_v50 = vld [vmem:[%s9963_s19 + $0x40] sm:$0xf] }
 0x3b3   : > { %5642 = vst.msk [vmem:[%s11280_s25 + $0x14] sm:$0xf] %vm4809_vm4, %v4919_v51 }
 0x3b4   : > { %4179 = vst [vmem:[%s10978_s27 + $0x7] sm:$0x1] %v4178_v47  ;;  %5644 = vst.msk [vmem:[%s11280_s25 + $0x14] sm:$0xf] %vm4816_vm5, %v4925_v52 }
 0x3b5   : > { %5738 = vst.msk [vmem:[%s11435_s22 + $0x10] sm:$0xf] %vm4795_vm1, %v5737_v50 }
 0x3bb   : > { %v4650_v44 = vld [vmem:[%s10978_s27 + $0x7] sm:$0x1]  ;;  %s9597_s27 = scalar_lea.vmem %s9596_s16, 256 }
 0x3bc   : > { %8265 = vmatmul.mubr.f32.vlgmr.msra.gmra.mrb[54].mxu0 %v4650_v44  ;;  %p9599_p7 = scmp.lt.s32.totalorder %s9597_s27, %s9591_s17 }
 0x3be   : > { %p9600_p8 = por %p9599_p7, %p9598_p4 }
 0x3c0   : > { %p9601_p11 = pnand %p9600_p8, %p9594_p3 }
 0x3cd   : > { %v4352_v8 = vpop.f32.mrb[48].mxu1 }
 0x3ce   : > { %v8091_v56 = vpop.f32.mrb[49].mxu1 }
 0x3cf   : > { %v4282_v57 = vpop.f32.mrb[48].mxu0  ;;  %v5749_v56 = vld [vmem:[%s9963_s19 + $0x70] sm:$0xf] }
 0x3d0   : > { %v4353_v38 = vadd.f32 %v4352_v8, %v4282_v57  ;;  %v8056_v1 = vpop.f32.mrb[49].mxu0  ;;  %v4979_v10 = vpop.permute.xlu0 %4978  ;;  %5750 = vst.msk [vmem:[%s11435_s22 + $0x1c] sm:$0xf] %vm4795_vm1, %v5749_v56 }
 0x3d1   : > { %5664 = vst.msk [vmem:[%s11280_s25 + $0x20] sm:$0xf] %vm4802_vm3, %v4979_v10 }
 0x3d2   : > { %v4356_v62 = vadd.f32 %v4353_v38, %v11364_v16  ;;  %5666 = vst.msk [vmem:[%s11280_s25 + $0x20] sm:$0xf] %vm4809_vm4, %v4985_v25 }
 0x3d4   : > { %v4357_v54 = vmax.f32 %v4356_v62, 0.0  ;;  %v5001_v0 = vpop.permute.xlu0 %5000 }
 0x3d5   : > { %5672 = vst.msk [vmem:[%s11280_s25 + $0x24] sm:$0xf] %vm4802_vm3, %v5001_v0 }
 0x3d6   : > { %4358 = vst [vmem:[%s11377_s14] sm:$0x1] %v4357_v54 }
 0x3d8   : > { %v5045_v11 = vpop.permute.xlu0 %5044 }
 0x3d9   : > { %5688 = vst.msk [vmem:[%s11280_s25 + $0x2c] sm:$0xf] %vm4802_vm3, %v5045_v11 }
 0x3dc   : > { %v5067_v41 = vpop.permute.xlu1 %5066 }
 0x3dd   : > { %5696 = vst.msk [vmem:[%s11280_s25 + $0x30] sm:$0xf] %vm4802_vm3, %v5067_v41 }
 0x3e0   : > { %v5111_v14 = vpop.permute.xlu1 %5110 }
 0x3e1   : > { %v5089_v15 = vpop.permute.xlu0 %5088  ;;  %5712 = vst.msk [vmem:[%s11280_s25 + $0x38] sm:$0xf] %vm4802_vm3, %v5111_v14 }
 0x3e2   : > { %5704 = vst.msk [vmem:[%s11280_s25 + $0x34] sm:$0xf] %vm4802_vm3, %v5089_v15 }
 0x3e4   : > { %v5007_v17 = vpop.permute.xlu1 %5006 }
 0x3e5   : > { %v5133_v19 = vpop.permute.xlu0 %5132  ;;  %5674 = vst.msk [vmem:[%s11280_s25 + $0x24] sm:$0xf] %vm4809_vm4, %v5007_v17 }
 0x3e6   : > { %5720 = vst.msk [vmem:[%s11280_s25 + $0x3c] sm:$0xf] %vm4802_vm3, %v5133_v19 }
 0x3e8   : > { %v5051_v20 = vpop.permute.xlu1 %5050 }
 0x3e9   : > { %5690 = vst.msk [vmem:[%s11280_s25 + $0x2c] sm:$0xf] %vm4809_vm4, %v5051_v20  ;;  %v5029_v30 = vpop.permute.xlu0 %5028 }
 0x3ea   : > { %5682 = vst.msk [vmem:[%s11280_s25 + $0x28] sm:$0xf] %vm4809_vm4, %v5029_v30 }
 0x3ec   : > { %v5095_v23 = vpop.permute.xlu1 %5094 }
 0x3ed   : > { %5706 = vst.msk [vmem:[%s11280_s25 + $0x34] sm:$0xf] %vm4809_vm4, %v5095_v23  ;;  %v5073_v24 = vpop.permute.xlu0 %5072 }
 0x3ee   : > { %5698 = vst.msk [vmem:[%s11280_s25 + $0x30] sm:$0xf] %vm4809_vm4, %v5073_v24 }
 0x3ef   : > { %v4497_v22 = vpop.f32.mrb[50].mxu1 }
 0x3f0   : > { %v8161_v27 = vpop.f32.mrb[51].mxu1  ;;  %v5139_v31 = vpop.permute.xlu1 %5138 }
 0x3f1   : > { %5722 = vst.msk [vmem:[%s11280_s25 + $0x3c] sm:$0xf] %vm4809_vm4, %v5139_v31  ;;  %v5117_v32 = vpop.permute.xlu0 %5116 }
 0x3f2   : > { %5714 = vst.msk [vmem:[%s11280_s25 + $0x38] sm:$0xf] %vm4809_vm4, %v5117_v32 }
 0x3f4   : > { %v5013_v39 = vpop.permute.xlu1 %5012 }
 0x3f5   : > { %5676 = vst.msk [vmem:[%s11280_s25 + $0x24] sm:$0xf] %vm4816_vm5, %v5013_v39  ;;  %v4991_v58 = vpop.permute.xlu0 %4990 }
 0x3f6   : > { %5668 = vst.msk [vmem:[%s11280_s25 + $0x20] sm:$0xf] %vm4816_vm5, %v4991_v58 }
 0x3f8   : > { %v5057_v42 = vpop.permute.xlu1 %5056 }
 0x3f9   : > { %5692 = vst.msk [vmem:[%s11280_s25 + $0x2c] sm:$0xf] %vm4816_vm5, %v5057_v42  ;;  %v5035_v7 = vpop.permute.xlu0 %5034 }
 0x3fa   : > { %5684 = vst.msk [vmem:[%s11280_s25 + $0x28] sm:$0xf] %vm4816_vm5, %v5035_v7 }
 0x3fc   : > { %v5101_v12 = vpop.permute.xlu1 %5100 }
 0x3fd   : > { %5708 = vst.msk [vmem:[%s11280_s25 + $0x34] sm:$0xf] %vm4816_vm5, %v5101_v12  ;;  %v5079_v47 = vpop.permute.xlu0 %5078 }
 0x3fe   : > { %5700 = vst.msk [vmem:[%s11280_s25 + $0x30] sm:$0xf] %vm4816_vm5, %v5079_v47 }
 0x400   : > { %v5145_v55 = vpop.permute.xlu1 %5144 }
 0x401   : > { %5724 = vst.msk [vmem:[%s11280_s25 + $0x3c] sm:$0xf] %vm4816_vm5, %v5145_v55  ;;  %v5123_v48 = vpop.permute.xlu0 %5122 }
 0x402   : > { %5716 = vst.msk [vmem:[%s11280_s25 + $0x38] sm:$0xf] %vm4816_vm5, %v5123_v48 }
 0x404   : > { %v5162_v59 = vpop.permute.xlu1 %5161 }
 0x405   : > { %5728 = vst.msk [vmem:[%s11435_s22 + $0x4] sm:$0xf] %vm4802_vm3, %v5162_v59  ;;  %v5153_v43 = vpop.permute.xlu0 %5152 }
 0x406   : > { %5155 = vst.msk [vmem:[%s11435_s22] sm:$0xf] %vm4802_vm3, %v5153_v43 }
 0x408   : > { %v5180_v44 = vpop.permute.xlu1 %5179 }
 0x409   : > { %5736 = vst.msk [vmem:[%s11435_s22 + $0xc] sm:$0xf] %vm4802_vm3, %v5180_v44  ;;  %v5171_v49 = vpop.permute.xlu0 %5170 }
 0x40a   : > { %5732 = vst.msk [vmem:[%s11435_s22 + $0x8] sm:$0xf] %vm4802_vm3, %v5171_v49 }
 0x40c   : > { %v5198_v52 = vpop.permute.xlu1 %5197 }
 0x40d   : > { %5744 = vst.msk [vmem:[%s11435_s22 + $0x14] sm:$0xf] %vm4802_vm3, %v5198_v52  ;;  %v5189_v53 = vpop.permute.xlu0 %5188 }
 0x40e   : > { %5740 = vst.msk [vmem:[%s11435_s22 + $0x10] sm:$0xf] %vm4802_vm3, %v5189_v53 }
 0x40f   : > { %v4427_v2 = vpop.f32.mrb[50].mxu0 }
 0x410   : > { %v4498_v45 = vadd.f32 %v4497_v22, %v4427_v2  ;;  %v8126_v46 = vpop.f32.mrb[51].mxu0  ;;  %v5216_v57 = vpop.permute.xlu1 %5215 }
 0x411   : > { %5752 = vst.msk [vmem:[%s11435_s22 + $0x1c] sm:$0xf] %vm4802_vm3, %v5216_v57  ;;  %v5207_v38 = vpop.permute.xlu0 %5206 }
 0x412   : > { %v4501_v51 = vadd.f32 %v4498_v45, %v11364_v16 }
 0x414   : > { %v4502_v8 = vmax.f32 %v4501_v51, 0.0 }
 0x416   : > { %4503 = vst [vmem:[%s11377_s14 + $0x1] sm:$0x1] %v4502_v8 }
 0x417   : > { %9604 = shalt.err (!%p9601_p11)
}
 0x418   : > { %s9605_s28 = scalar_lea.hbm %s11501_s20, 128  ;;  %s9609_s21 = scalar_lea.hbm %s11631_s9, 256 }
 0x419   : > { %p9606_p13 = scmp.ne.s32.totalorder %s11501_s20, %s9605_s28  ;;  %p9610_p6 = scmp.lt.u32.totalorder %s11501_s20, %s11631_s9 }
 0x41a   : > { %p9611_p9 = scmp.lt.u32.totalorder %s9609_s21, %s9605_s28  ;;  %p9613_p10 = scmp.lt.u32.totalorder %s9605_s28, %s11501_s20 }
 0x41b   : > { %p9607_p5 = pnand %p9606_p13, %p11664_p1 }
 0x41c   : > { %p9612_p12 = por %p9611_p9, %p9610_p6 }
 0x41d   : > { %p9608_p0 = pneg %p9607_p5 }
 0x41e   : > { %p9614_p2 = por %p9613_p10, %p9612_p12 }
 0x420   : > { %p9615_p3 = pnand %p9614_p2, %p9608_p0 }
 0x422   : > { %9618 = shalt.err (!%p9615_p3)
}
 0x423   : > { %9463 = dma.vmem_to_hbm [thread:$0]  (%p11664_p1), %s11511_s23, 128, %s11501_s20, %s11514_s30   ;;  %5748 = vst.msk [vmem:[%s11435_s22 + $0x18] sm:$0xf] %vm4802_vm3, %v5207_v38 }
 0x424   : > { %s11665_s19 = sshll.u32 %s9829_s29, 8  ;;  %s5269_s24 = sshll.u32 %s10319_s15, 4  ;;  %s11548_s24 = int_to_ptr.vmem [resolvable:$true] %s5269_s24 }
 0x425   : > { %s11545_s28 = scalar_lea.hbm %s11630_s8, %s11665_s19  ;;  %s5231_s25 = scalar_lea.sflag [#allocation4], %s10297_s10 }
 0x426   : > { %s9619_s21 = scalar_lea.vmem %s11548_s24, 256  ;;  %s9734_s20 = smov [#allocation7]  }
 0x427   : > { %p9620_p4 = scmp.ne.s32.totalorder %s11548_s24, %s9619_s21  ;;  %s9623_s22 = sshll.u32 %s9734_s20, 4  ;;  %s9624_s22 = int_to_ptr.vmem [resolvable:$false] %s9623_s22 }
 0x428   : > { %s9625_s23 = scalar_lea.vmem %s9624_s22, 512  ;;  %p9626_p11 = scmp.lt.s32.totalorder %s11548_s24, %s9624_s22 }
 0x429   : > { %p9621_p7 = pnand %p9620_p4, %p11664_p1  ;;  %p9627_p13 = scmp.lt.s32.totalorder %s9625_s23, %s9619_s21 }
 0x42b   : > { %p9622_p8 = pneg %p9621_p7  ;;  %p9628_p5 = por %p9627_p13, %p9626_p11 }
 0x42d   : > { %p9629_p0 = pnand %p9628_p5, %p9622_p8 }
 0x42f   : > { %9632 = shalt.err (!%p9629_p0)
}
 0x430   : > { %s9633_s15 = scalar_lea.hbm %s11545_s28, 256  ;;  %s9637_s17 = scalar_lea.hbm %s11630_s8, 512 }
 0x431   : > { %p9634_p6 = scmp.ne.s32.totalorder %s11545_s28, %s9633_s15  ;;  %p9638_p10 = scmp.lt.u32.totalorder %s11545_s28, %s11630_s8 }
 0x432   : > { %p9639_p2 = scmp.lt.u32.totalorder %s9637_s17, %s9633_s15  ;;  %p9641_p4 = scmp.lt.u32.totalorder %s9633_s15, %s11545_s28 }
 0x433   : > { %p9635_p9 = pnand %p9634_p6, %p11664_p1 }
 0x434   : > { %p9640_p3 = por %p9639_p2, %p9638_p10 }
 0x435   : > { %p9636_p12 = pneg %p9635_p9 }
 0x436   : > { %p9642_p7 = por %p9641_p4, %p9640_p3 }
 0x438   : > { %p9643_p8 = pnand %p9642_p7, %p9636_p12 }
 0x43a   : > { %9646 = shalt.err (!%p9643_p8)
}
 0x43b   : > { %s9735_s21 = smov 128   ;;  %s9736_s22 = smov 8   ;;  %v4642_v1 = vpop.f32.mrb[52].mxu1 }
 0x43c   : > { %9462 = dma.vmem_to_hbm [thread:$0]  (%p11664_p1), %s11548_s24, 256, %s11545_s28, %s5231_s25, %s9735_s21, %s9735_s21, %s9736_s22   ;;  %v8231_v60 = vpop.f32.mrb[53].mxu1 }
 0x43d   : > { %s5765_s23 = sshll.u32 %s9829_s29, 6  ;;  %s5298_s10 = sshll.u32 %s11377_s14, 4  ;;  %s5299_s10 = int_to_ptr.vmem [resolvable:$true] %s5298_s10 }
 0x43e   : > { %s11666_s25 = sld [smem:[#allocation21_spill]]  ;;  %s9647_s19 = scalar_lea.vmem %s5299_s10, 64 }
 0x43f   : > { %p9648_p11 = scmp.ne.s32.totalorder %s5299_s10, %s9647_s19  ;;  %s9737_s17 = smov [#allocation10]  }
 0x440   : > { %s9651_s27 = sshll.u32 %s9737_s17, 4  ;;  %s9652_s27 = int_to_ptr.vmem [resolvable:$false] %s9651_s27 }
 0x441   : > { %p9649_p13 = pnand %p9648_p11, %p11664_p1  ;;  %s9653_s29 = scalar_lea.vmem %s9652_s27, 128 }
 0x442   : > { %p9654_p0 = scmp.lt.s32.totalorder %s5299_s10, %s9652_s27  ;;  %p9655_p6 = scmp.lt.s32.totalorder %s9653_s29, %s9647_s19 }
 0x443   : > { %p9650_p5 = pneg %p9649_p13 }
 0x444   : > { %s11667_s15 = smov %s11666_s25  ;;  %s11582_s16 = scalar_lea.hbm %s11666_s25, %s5765_s23 }
 0x445   : > { %p9656_p9 = por %p9655_p6, %p9654_p0 }
 0x447   : > { %p9657_p12 = pnand %p9656_p9, %p9650_p5 }
 0x44f   : > { %v4572_v9 = vpop.f32.mrb[52].mxu0 }
 0x450   : > { %v4643_v62 = vadd.f32 %v4642_v1, %v4572_v9  ;;  %v8196_v61 = vpop.f32.mrb[53].mxu0 }
 0x452   : > { %v4646_v54 = vadd.f32 %v4643_v62, %v11364_v16 }
 0x454   : > { %v4647_v3 = vmax.f32 %v4646_v54, 0.0 }
 0x456   : > { %4648 = vst [vmem:[%s11377_s14 + $0x2] sm:$0x1] %v4647_v3 }
 0x46f   : > { %v4787_v5 = vpop.f32.mrb[54].mxu1 }
 0x470   : > { %v8301_v13 = vpop.f32.mrb[55].mxu1 }
 0x48f   : > { %v4717_v63 = vpop.f32.mrb[54].mxu0 }
 0x490   : > { %v4788_v28 = vadd.f32 %v4787_v5, %v4717_v63  ;;  %v8266_v29 = vpop.f32.mrb[55].mxu0 }
 0x492   : > { %v4791_v34 = vadd.f32 %v4788_v28, %v11364_v16 }
 0x494   : > { %v4792_v18 = vmax.f32 %v4791_v34, 0.0 }
 0x496   : > { %4793 = vst [vmem:[%s11377_s14 + $0x3] sm:$0x1] %v4792_v18 }
 0x497   : > { %9660 = shalt.err (!%p9657_p12)
}
 0x498   : > { %s9661_s14 = scalar_lea.hbm %s11582_s16, 64  ;;  %s9665_s22 = scalar_lea.hbm %s11667_s15, 128 }
 0x499   : > { %p9662_p10 = scmp.ne.s32.totalorder %s11582_s16, %s9661_s14  ;;  %p9666_p4 = scmp.lt.u32.totalorder %s11582_s16, %s11667_s15 }
 0x49a   : > { %p9667_p7 = scmp.lt.u32.totalorder %s9665_s22, %s9661_s14  ;;  %p9669_p11 = scmp.lt.u32.totalorder %s9661_s14, %s11582_s16 }
 0x49b   : > { %p9663_p2 = pnand %p9662_p10, %p11664_p1 }
 0x49c   : > { %p9668_p8 = por %p9667_p7, %p9666_p4 }
 0x49d   : > { %p9664_p3 = pneg %p9663_p2 }
 0x49e   : > { %p9670_p13 = por %p9669_p11, %p9668_p8 }
 0x4a0   : > { %p9671_p5 = pnand %p9670_p13, %p9664_p3 }
 0x4a2   : > { %9674 = shalt.err (!%p9671_p5)
}
 0x4a3   : > { %9464 = dma.vmem_to_hbm [thread:$0]  (%p11664_p1), %s5299_s10, 64, %s11582_s16, %s11514_s30  }
 0x4a4 PF: > { %s11668_s24 = sld [smem:[#allocation17_spill]]  ;;  %s11669_s25 = sld [smem:[#allocation15_spill]] }
 0x4a5   : > { %s11670_s19 = sld [smem:[#allocation20_spill]] }
 0x4aa   : > { %p9489_p0 = scmp.ge.s32.totalorder %s11668_s24, 2  ;;  %s5319_s17 = sand.u32 1, %s11669_s25  }
 0x4ab   : > { %p11671_p6 = scmp.ne.s32.totalorder %s11670_s19, 0  ;;  %s5320_s27 = scalar_lea.sflag [#allocation4], %s5319_s17 }
 0x4ad   : > { %p9476_p9 = pnand %p9489_p0, %p11671_p6 }
 0x4af   : > { %9700 = dma.done.wait (!%p9476_p9), %s5320_s27, 256  }
 0x4b0   : > { %9702 = vsyncadd (!%p9476_p9), %s5320_s27, 4294967040  ;;  %s11672_s29 = sadd.s32 4294967294, %s11668_s24  }
 0x4b1   : > { %s5328_s14 = sand.u32 1, %s11672_s29  }
 0x4b2   : > { %s5329_s20 = scalar_lea.sflag [#allocation9], %s5328_s14 }
 0x4b3   : > { %9704 = dma.done.wait (!%p9476_p9), %s5329_s20, 192  }
 0x4b4   : > { %9706 = vsyncadd (!%p9476_p9), %s5329_s20, 4294967104  ;;  %s11673_s28 = sld [smem:[#allocation18_spill]]  ;;  %s11674_s18 = sld [smem:[#allocation16_spill]] }
 0x4b5   : > { %s11675_s27 = sld [smem:[#allocation19_spill]]  ;;  %s11676_s25 = smov %s9713_s26 }
 0x4ba   : > { %p29_p1 = scmp.ge.s32.totalorder %s11673_s28, 4   ;;  %s11677_s26 = smov %s11674_s18 }
 0x4bc   :  { %31 = sbr.rel (!%p29_p1) target bundleno = 9 (0x9), region = 210 }
 0x4c3   :  { %5367 = vsyncpa [#allocation3], 1 }
 0x4c4   :  { %5369 = vsyncpa [#allocation3 + $0x1], 1 }
 0x4c5   :  { %5370 = vsyncpa [#allocation6], 1 }
 0x4c6   :  { %5371 = vsyncpa [#allocation4], 1 }
 0x4c7   :  { %5373 = vsyncpa [#allocation4 + $0x1], 1 }
 0x4c8   :  { %5374 = vsyncpa [#allocation9], 1 }
 0x4c9   :  { %5376 = vsyncpa [#allocation9 + $0x1], 1 }

</bundles_post_ra>
